<compile_context>
chip_gen: v5e
topology: v5e:2x2
jax: 0.10.0
libtpu: 0.0.40
codegen_flags: <defaults>
</compile_context>

<pallas_src>
import functools
import math

import jax
import jax.numpy as jnp
from jax.experimental import pallas as pl
from jax.experimental.pallas import tpu as pltpu


# ----------------------------- tuning constants -----------------------------

_TOKEN_TILE = 256            # token-tile target (fills 256-wide v6e/v7x MXU)
_EXPAND_ROWS = 256           # target rows (Hb*W) per expand matmul
_VMEM_LIMIT = 40 * 1024 * 1024   # above v5e/v6e/v7x scoped defaults, < v7x 64 MiB


# ----------------------------- Pallas kernels ------------------------------

def _expand_shuffle_kernel(x_ref, w_ref, o_ref):
    # x: (Hb, W, D), w: (D, 2D) bf16 resident, o: (Hb, 2, W, D) bf16.
    # One matmul per step (M = Hb*W, N = 2D); the pixel shuffle "a" axis is
    # realised by the lane-aligned column split at D and the output layout.
    Hb, W, D = x_ref.shape
    x16 = x_ref[...].reshape(Hb * W, D).astype(jnp.bfloat16)
    y = jnp.dot(x16, w_ref[...], preferred_element_type=jnp.float32)   # (Hb*W, 2D)
    y = y.reshape(Hb, W, 2 * D)
    o_ref[:, 0:1, :, :] = y[:, :, :D].reshape(Hb, 1, W, D).astype(o_ref.dtype)
    o_ref[:, 1:2, :, :] = y[:, :, D:].reshape(Hb, 1, W, D).astype(o_ref.dtype)


def _fused_skip_na_kernel(xe_ref, enc_ref, knb_ref, vnb_ref, rows_ref,
                          w1_ref, w2_ref, wq_ref, wo_ref, rb_ref, o_ref,
                          *, num_neighbors, total_tokens):
    """LayerNorm + skip-concat Linear + neighborhood attention for one token tile.

    Neighbor K/V (knb_ref/vnb_ref, shape (nn, Ch)) are precomputed once per
    batch in the wrapper -- no per-tile recomputation of the tiny M=8 matmuls.
    rows_ref packs [gamma, beta, skip_b, scale*bq, bo, 0, 0, 0] as (8, Ch).
    """
    nn_ = num_neighbors

    gamma = rows_ref[0:1, :]
    beta = rows_ref[1:2, :]
    bsk = rows_ref[2:3, :]
    bq = rows_ref[3:4, :]
    bo = rows_ref[4:5, :]

    # --- LayerNorm (torch semantics: biased variance, eps=1e-5, f32 stats) ---
    x = xe_ref[...].astype(jnp.float32)
    mu = jnp.mean(x, axis=-1, keepdims=True)
    var = jnp.mean((x - mu) ** 2, axis=-1, keepdims=True)
    xn = (x - mu) * jax.lax.rsqrt(var + 1e-5) * gamma + beta

    # --- skip-concat Linear: concat([ln(x), enc]) @ Wskip + b == ln@W1 + enc@W2 + b
    y = jnp.dot(xn.astype(jnp.bfloat16), w1_ref[...],
                preferred_element_type=jnp.float32)
    y = y + jnp.dot(enc_ref[...], w2_ref[...],
                    preferred_element_type=jnp.float32)
    y = y + bsk                                                        # (TM, Ch)

    # --- Q projection; 1/sqrt(Ch) folded into wq/bq at parameter-prep time ---
    q = jnp.dot(y.astype(jnp.bfloat16), wq_ref[...],
                preferred_element_type=jnp.float32) + bq               # (TM, Ch)

    # scores: (TM, nn) = q . k_nb^T (contract channel dim, no transpose op)
    s = jax.lax.dot_general(q.astype(jnp.bfloat16), knb_ref[...],
                            (((1,), (1,)), ((), ())),
                            preferred_element_type=jnp.float32)
    # TODO(synk): original adds the full (nn, nn) relative_bias to a (B, nn) row
    # (shape-inconsistent); the parameter is zero-initialised, so one pre-scaled
    # broadcast row is numerically identical.  Reference order is
    # (QK + bias)/sqrt(dim), so the scale correctly multiplies the bias too.
    s = s + rb_ref[...]

    # Reproduce F.softmax over the full length-N row whose non-neighbor entries
    # are zero: the (N - nn) zeros each contribute exp(0 - m) to the denominator.
    m = jnp.maximum(jnp.max(s, axis=-1, keepdims=True), 0.0)
    num = jnp.exp(s - m)
    denom = jnp.sum(num, axis=-1, keepdims=True) + (total_tokens - nn_) * jnp.exp(-m)
    prob = num * pl.reciprocal(denom, approx=True)                     # (TM, nn)

    # TODO(synk): original bmm's probs against V_neighbors flattened to (N, nn*C)
    # and feeds nn*C into Linear(C, C) (cannot run); use the intended per-token
    # weighted sum of neighbor values instead.
    att = jnp.dot(prob.astype(jnp.bfloat16), vnb_ref[...],
                  preferred_element_type=jnp.float32)                  # (TM, Ch)
    out = jnp.dot(att.astype(jnp.bfloat16), wo_ref[...],
                  preferred_element_type=jnp.float32) + bo
    o_ref[...] = out.astype(o_ref.dtype)


# ----------------------------- wrappers -------------------------------------

def expand_shuffle_pallas(x, w):
    """PatchExpansion expand Linear (bias=False) + pixel shuffle.
    x: (B, H, W, D) f32/bf16, w: (D, 2D) bf16.
    Returns (B, H, 2, W, D) bf16 -- contiguous-reshapeable to (B, 2H, 2W, D//2)
    or directly to (B, 4HW, D//2)."""
    B, H, W, D = x.shape
    Hb = min(H, max(1, -(-_EXPAND_ROWS // W)))     # ~_EXPAND_ROWS rows per matmul
    grid = (B, pl.cdiv(H, Hb))
    return pl.pallas_call(
        _expand_shuffle_kernel,
        out_shape=jax.ShapeDtypeStruct((B, H, 2, W, D), jnp.bfloat16),
        grid=grid,
        in_specs=[
            pl.BlockSpec((None, Hb, W, D), lambda i, h: (i, h, 0, 0)),
            # full weight, constant block index -> DMA'd once, stays resident
            pl.BlockSpec((D, 2 * D), lambda i, h: (0, 0)),
        ],
        out_specs=pl.BlockSpec((None, Hb, 2, W, D), lambda i, h: (i, h, 0, 0, 0)),
        compiler_params=pltpu.CompilerParams(
            dimension_semantics=("parallel", "parallel"),
            vmem_limit_bytes=_VMEM_LIMIT),
    )(x, w)


def _neighbor_kv(xe_nb, enc_nb, p):
    """Once-per-batch neighbor K/V (hoisted out of the per-tile kernel).
    xe_nb, enc_nb: (B, nn, Ch).  Tiny -- plain JAX is the cheapest place."""
    x = xe_nb.astype(jnp.float32)
    mu = jnp.mean(x, axis=-1, keepdims=True)
    var = jnp.mean((x - mu) ** 2, axis=-1, keepdims=True)
    xn = (x - mu) * jax.lax.rsqrt(var + 1e-5) * p["gamma"] + p["beta"]
    y = (xn @ p["skip_w1"].astype(jnp.float32)
         + enc_nb.astype(jnp.float32) @ p["skip_w2"].astype(jnp.float32)
         + p["skip_b"])
    k_nb = (y @ p["wk"] + p["bk"]).astype(jnp.bfloat16)
    v_nb = (y @ p["wv"] + p["bv"]).astype(jnp.bfloat16)
    return k_nb, v_nb


def fused_skip_na_pallas(xe, enc, k_nb, v_nb, p, total_tokens):
    """Fused LayerNorm + skip-concat Linear + NA block.
    xe, enc: (B, T, Ch) bf16; k_nb, v_nb: (B, nn, Ch) bf16.  Output bf16."""
    B, T, Ch = xe.shape
    nn_ = k_nb.shape[1]
    tm = T if T <= _TOKEN_TILE else _TOKEN_TILE    # multiple of 8, or full T
    grid = (B, pl.cdiv(T, tm))

    kern = functools.partial(_fused_skip_na_kernel,
                             num_neighbors=nn_, total_tokens=total_tokens)

    tile_spec = pl.BlockSpec((None, tm, Ch), lambda i, t: (i, t, 0))
    nb_spec = pl.BlockSpec((None, nn_, Ch), lambda i, t: (i, 0, 0))

    def full2d(a):
        return pl.BlockSpec(a.shape, lambda i, t: (0, 0))

    args = (xe, enc, k_nb, v_nb,
            p["rows"], p["skip_w1"], p["skip_w2"], p["wq"], p["wo"], p["rb_row"])
    in_specs = [tile_spec, tile_spec, nb_spec, nb_spec] + [full2d(a) for a in args[4:]]

    # TODO(synk): when Ch < 128 (tiny demo stages) the output tile is lane-sparse
    # (masked vst); real deployments keep Ch a multiple of 128.
    return pl.pallas_call(
        kern,
        out_shape=jax.ShapeDtypeStruct((B, T, Ch), jnp.bfloat16),
        grid=grid,
        in_specs=in_specs,
        out_specs=tile_spec,
        compiler_params=pltpu.CompilerParams(
            dimension_semantics=("parallel", "parallel"),
            vmem_limit_bytes=_VMEM_LIMIT),
    )(*args)


# ----------------------------- parameters -----------------------------------

def _init_linear(key, din, dout, scale=0.05):
    kw, kb = jax.random.split(key)
    w = scale * jax.random.normal(kw, (din, dout), jnp.float32)  # (in, out)
    b = scale * jax.random.normal(kb, (dout,), jnp.float32)
    return w, b


def init_decoder_params(key, C, num_neighbors=8):
    stages = []
    for k in range(3):
        D = (8 * C) >> k          # 8C, 4C, 2C
        Ch = D // 2               # 4C, 2C, C
        key, *ks = jax.random.split(key, 8)
        expand_w = 0.05 * jax.random.normal(ks[0], (D, 2 * D), jnp.float32)
        skip_w, skip_b = _init_linear(ks[1], D, Ch)
        wq, bq = _init_linear(ks[2], Ch, Ch)
        wk, bk = _init_linear(ks[3], Ch, Ch)
        wv, bv = _init_linear(ks[4], Ch, Ch)
        wo, bo = _init_linear(ks[5], Ch, Ch)
        rel_bias = jnp.zeros((num_neighbors, num_neighbors), jnp.float32)
        scale = 1.0 / math.sqrt(Ch)

        gamma = jnp.ones((Ch,), jnp.float32)     # LayerNorm(D//2)
        beta = jnp.zeros((Ch,), jnp.float32)

        # Packed per-channel rows for the kernel: one DMA instead of five.
        rows = jnp.zeros((8, Ch), jnp.float32)
        rows = rows.at[0].set(gamma).at[1].set(beta).at[2].set(skip_b)
        rows = rows.at[3].set(scale * bq).at[4].set(bo)

        stages.append(dict(
            # PatchExpansion expand is nn.Linear(D, 2D, bias=False) in the reference.
            expand_w=expand_w.astype(jnp.bfloat16),           # (D, 2D)
            rows=rows,                                        # (8, Ch) packed rows
            skip_w1=skip_w[:Ch, :].astype(jnp.bfloat16),      # Linear(2Ch, Ch), split
            skip_w2=skip_w[Ch:, :].astype(jnp.bfloat16),
            wq=(scale * wq).astype(jnp.bfloat16),             # 1/sqrt(Ch) folded in
            wo=wo.astype(jnp.bfloat16),
            # Reference computes (Q.K + rel_bias)/sqrt(dim): scale multiplies the
            # bias too, so folding it into rb_row matches the reference exactly.
            rb_row=scale * rel_bias[0:1, :],                  # (1, nn), zero-init
            # wrapper-side (once-per-batch) neighbor K/V projection params (f32)
            gamma=gamma, beta=beta, skip_b=skip_b,
            wk=wk, bk=bk, wv=wv, bv=bv,
        ))
    return stages


# ----------------------------- forward --------------------------------------

def decoder_forward(x, encoder_features, params, num_neighbors=8):
    """x: (B, H, W, 8C); encoder_features[k]: (B, 2^{k+1}H, 2^{k+1}W, 8C/2^{k+1})."""
    for p, enc in zip(params, encoder_features):
        B, H, W, D = x.shape
        Ch = D // 2
        T = 4 * H * W

        # --- PatchExpansion: expand Linear + pixel shuffle (one Pallas call) ---
        xe = expand_shuffle_pallas(x, p["expand_w"])          # (B, H, 2, W, D) bf16
        xe = xe.reshape(B, T, Ch)                             # free contiguous reshape

        # TODO(synk): original hands a 4-D tensor to the NA block (would fail);
        # tokens are the flattened spatial positions here.
        enc_t = enc.reshape(B, T, Ch).astype(jnp.bfloat16)

        # neighbor K/V: identical for every token tile -> computed once per batch
        nn_ = min(num_neighbors, T)
        k_nb, v_nb = _neighbor_kv(xe[:, :nn_, :], enc_t[:, :nn_, :], p)

        # --- fused LayerNorm + skip-concat Linear + NA block (one Pallas call) ---
        y = fused_skip_na_pallas(xe, enc_t, k_nb, v_nb, p, T)

        x = y.reshape(B, 2 * H, 2 * W, Ch)
    return x.astype(jnp.float32)


# ----------------------------- demo ------------------------------------------

if __name__ == "__main__":
    key = jax.random.PRNGKey(0)
    B, C, H, W, NN = 2, 4, 2, 2, 8
    k1, k2, k3, k4, kp = jax.random.split(key, 5)

    x = jax.random.normal(k1, (B, H, W, 8 * C), jnp.float32)
    encoder_features = [
        jax.random.normal(k2, (B, 2 * H, 2 * W, 4 * C), jnp.float32),
        jax.random.normal(k3, (B, 4 * H, 4 * W, 2 * C), jnp.float32),
        jax.random.normal(k4, (B, 8 * H, 8 * W, C), jnp.float32),
    ]
    params = init_decoder_params(kp, C, NN)

    fwd = jax.jit(functools.partial(decoder_forward, num_neighbors=NN))
    out = fwd(x, encoder_features, params)
    out = jax.block_until_ready(out)
    assert out.shape == (B, 8 * H, 8 * W, C), out.shape
    assert bool(jnp.all(jnp.isfinite(out)))
    print("KERNEL_OK")
</pallas_src>

<mosaic_0001>
module attributes {stable_mosaic.version = 11 : i64} {
  func.func @_expand_shuffle_kernel(%arg0: i32, %arg1: i32, %arg2: memref<1x2x2x32xf32, #tpu.memory_space<vmem>>, %arg3: memref<32x64xbf16, #tpu.memory_space<vmem>>, %arg4: memref<1x2x2x2x32xbf16, #tpu.memory_space<vmem>>) attributes {dimension_semantics = [#tpu.dimension_semantics<parallel>, #tpu.dimension_semantics<parallel>], iteration_bounds = array<i64: 2, 1>, scalar_prefetch = 0 : i64, scratch_operands = 0 : i64, tpu.core_type = #tpu.core_type<tc>, window_params = [{transform_indices = @transform_0, window_bounds = array<i64: 1, 2, 2, 32>}, {pipeline_mode = #tpu.pipeline_mode<synchronous>, transform_indices = @transform_1, window_bounds = array<i64: 32, 64>}, {transform_indices = @transform_2, window_bounds = array<i64: 1, 2, 2, 2, 32>}]} {
    %c0 = arith.constant 0 : index
    %c0_0 = arith.constant 0 : index
    %c0_1 = arith.constant 0 : index
    %c0_2 = arith.constant 0 : index
    %0 = vector.load %arg2[%c0, %c0_0, %c0_1, %c0_2] : memref<1x2x2x32xf32, #tpu.memory_space<vmem>>, vector<1x2x2x32xf32>
    %1 = vector.shape_cast %0 : vector<1x2x2x32xf32> to vector<2x2x32xf32>
    %2 = vector.shape_cast %1 : vector<2x2x32xf32> to vector<4x32xf32>
    %3 = arith.truncf %2 : vector<4x32xf32> to vector<4x32xbf16>
    %c0_3 = arith.constant 0 : index
    %c0_4 = arith.constant 0 : index
    %4 = vector.load %arg3[%c0_3, %c0_4] : memref<32x64xbf16, #tpu.memory_space<vmem>>, vector<32x64xbf16>
    %cst = arith.constant dense<0.000000e+00> : vector<4x64xf32>
    %5 = tpu.matmul %3, %4, %cst {dimension_numbers = #tpu.dot_dimension_numbers<[1], [0], [0], [1], [0, 0, 1, 1], [], []>} : vector<4x32xbf16>, vector<32x64xbf16>, vector<4x64xf32> -> vector<4x64xf32>
    %6 = vector.shape_cast %5 : vector<4x64xf32> to vector<2x2x64xf32>
    %7 = vector.extract_strided_slice %6 {offsets = [0, 0, 0], sizes = [2, 2, 32], strides = [1, 1, 1]} : vector<2x2x64xf32> to vector<2x2x32xf32>
    %8 = vector.shape_cast %7 : vector<2x2x32xf32> to vector<2x1x2x32xf32>
    %9 = arith.truncf %8 : vector<2x1x2x32xf32> to vector<2x1x2x32xbf16>
    %c0_5 = arith.constant 0 : index
    %c0_6 = arith.constant 0 : index
    %c0_7 = arith.constant 0 : index
    %c0_8 = arith.constant 0 : index
    %c0_9 = arith.constant 0 : index
    %10 = vector.load %arg4[%c0_5, %c0_6, %c0_7, %c0_8, %c0_9] : memref<1x2x2x2x32xbf16, #tpu.memory_space<vmem>>, vector<1x2x1x2x32xbf16>
    %11 = vector.shape_cast %10 : vector<1x2x1x2x32xbf16> to vector<2x1x2x32xbf16>
    %12 = vector.shape_cast %9 : vector<2x1x2x32xbf16> to vector<1x2x1x2x32xbf16>
    tpu.vector_store %arg4[%c0_5, %c0_6, %c0_7, %c0_8, %c0_9], %12 {strides = array<i32>} : memref<1x2x2x2x32xbf16, #tpu.memory_space<vmem>>, vector<1x2x1x2x32xbf16>,
    %13 = vector.extract_strided_slice %6 {offsets = [0, 0, 32], sizes = [2, 2, 32], strides = [1, 1, 1]} : vector<2x2x64xf32> to vector<2x2x32xf32>
    %14 = vector.shape_cast %13 : vector<2x2x32xf32> to vector<2x1x2x32xf32>
    %15 = arith.truncf %14 : vector<2x1x2x32xf32> to vector<2x1x2x32xbf16>
    %c0_10 = arith.constant 0 : index
    %c0_11 = arith.constant 0 : index
    %c1 = arith.constant 1 : index
    %c0_12 = arith.constant 0 : index
    %c0_13 = arith.constant 0 : index
    %16 = vector.load %arg4[%c0_10, %c0_11, %c1, %c0_12, %c0_13] : memref<1x2x2x2x32xbf16, #tpu.memory_space<vmem>>, vector<1x2x1x2x32xbf16>
    %17 = vector.shape_cast %16 : vector<1x2x1x2x32xbf16> to vector<2x1x2x32xbf16>
    %18 = vector.shape_cast %15 : vector<2x1x2x32xbf16> to vector<1x2x1x2x32xbf16>
    tpu.vector_store %arg4[%c0_10, %c0_11, %c1, %c0_12, %c0_13], %18 {strides = array<i32>} : memref<1x2x2x2x32xbf16, #tpu.memory_space<vmem>>, vector<1x2x1x2x32xbf16>,
    return
  }
  func.func @transform_0(%arg0: i32, %arg1: i32) -> (i32, i32, i32, i32) {
    %c0_i32 = arith.constant 0 : i32
    %c0_i32_0 = arith.constant 0 : i32
    %c0_i32_1 = arith.constant 0 : i32
    return %arg0, %arg1, %c0_i32, %c0_i32_0 : i32, i32, i32, i32
  }
  func.func @transform_1(%arg0: i32, %arg1: i32) -> (i32, i32) {
    %c0_i32 = arith.constant 0 : i32
    %c0_i32_0 = arith.constant 0 : i32
    %c0_i32_1 = arith.constant 0 : i32
    return %c0_i32, %c0_i32_0 : i32, i32
  }
  func.func @transform_2(%arg0: i32, %arg1: i32) -> (i32, i32, i32, i32, i32) {
    %c0_i32 = arith.constant 0 : i32
    %c0_i32_0 = arith.constant 0 : i32
    %c0_i32_1 = arith.constant 0 : i32
    %c0_i32_2 = arith.constant 0 : i32
    return %arg0, %arg1, %c0_i32, %c0_i32_0, %c0_i32_1 : i32, i32, i32, i32, i32
  }
}

module attributes {stable_mosaic.version = 11 : i64} {
  func.func @_expand_shuffle_kernel(%arg0: i32, %arg1: i32, %arg2: memref<1x4x4x16xbf16, #tpu.memory_space<vmem>>, %arg3: memref<16x32xbf16, #tpu.memory_space<vmem>>, %arg4: memref<1x4x2x4x16xbf16, #tpu.memory_space<vmem>>) attributes {dimension_semantics = [#tpu.dimension_semantics<parallel>, #tpu.dimension_semantics<parallel>], iteration_bounds = array<i64: 2, 1>, scalar_prefetch = 0 : i64, scratch_operands = 0 : i64, tpu.core_type = #tpu.core_type<tc>, window_params = [{transform_indices = @transform_0, window_bounds = array<i64: 1, 4, 4, 16>}, {pipeline_mode = #tpu.pipeline_mode<synchronous>, transform_indices = @transform_1, window_bounds = array<i64: 16, 32>}, {transform_indices = @transform_2, window_bounds = array<i64: 1, 4, 2, 4, 16>}]} {
    %c0 = arith.constant 0 : index
    %c0_0 = arith.constant 0 : index
    %c0_1 = arith.constant 0 : index
    %c0_2 = arith.constant 0 : index
    %0 = vector.load %arg2[%c0, %c0_0, %c0_1, %c0_2] : memref<1x4x4x16xbf16, #tpu.memory_space<vmem>>, vector<1x4x4x16xbf16>
    %1 = vector.shape_cast %0 : vector<1x4x4x16xbf16> to vector<4x4x16xbf16>
    %2 = vector.shape_cast %1 : vector<4x4x16xbf16> to vector<16x16xbf16>
    %c0_3 = arith.constant 0 : index
    %c0_4 = arith.constant 0 : index
    %3 = vector.load %arg3[%c0_3, %c0_4] : memref<16x32xbf16, #tpu.memory_space<vmem>>, vector<16x32xbf16>
    %cst = arith.constant dense<0.000000e+00> : vector<16x32xf32>
    %4 = tpu.matmul %2, %3, %cst {dimension_numbers = #tpu.dot_dimension_numbers<[1], [0], [0], [1], [0, 0, 1, 1], [], []>} : vector<16x16xbf16>, vector<16x32xbf16>, vector<16x32xf32> -> vector<16x32xf32>
    %5 = vector.shape_cast %4 : vector<16x32xf32> to vector<4x4x32xf32>
    %6 = vector.extract_strided_slice %5 {offsets = [0, 0, 0], sizes = [4, 4, 16], strides = [1, 1, 1]} : vector<4x4x32xf32> to vector<4x4x16xf32>
    %7 = vector.shape_cast %6 : vector<4x4x16xf32> to vector<4x1x4x16xf32>
    %8 = arith.truncf %7 : vector<4x1x4x16xf32> to vector<4x1x4x16xbf16>
    %c0_5 = arith.constant 0 : index
    %c0_6 = arith.constant 0 : index
    %c0_7 = arith.constant 0 : index
    %c0_8 = arith.constant 0 : index
    %c0_9 = arith.constant 0 : index
    %9 = vector.load %arg4[%c0_5, %c0_6, %c0_7, %c0_8, %c0_9] : memref<1x4x2x4x16xbf16, #tpu.memory_space<vmem>>, vector<1x4x1x4x16xbf16>
    %10 = vector.shape_cast %9 : vector<1x4x1x4x16xbf16> to vector<4x1x4x16xbf16>
    %11 = vector.shape_cast %8 : vector<4x1x4x16xbf16> to vector<1x4x1x4x16xbf16>
    tpu.vector_store %arg4[%c0_5, %c0_6, %c0_7, %c0_8, %c0_9], %11 {strides = array<i32>} : memref<1x4x2x4x16xbf16, #tpu.memory_space<vmem>>, vector<1x4x1x4x16xbf16>,
    %12 = vector.extract_strided_slice %5 {offsets = [0, 0, 16], sizes = [4, 4, 16], strides = [1, 1, 1]} : vector<4x4x32xf32> to vector<4x4x16xf32>
    %13 = vector.shape_cast %12 : vector<4x4x16xf32> to vector<4x1x4x16xf32>
    %14 = arith.truncf %13 : vector<4x1x4x16xf32> to vector<4x1x4x16xbf16>
    %c0_10 = arith.constant 0 : index
    %c0_11 = arith.constant 0 : index
    %c1 = arith.constant 1 : index
    %c0_12 = arith.constant 0 : index
    %c0_13 = arith.constant 0 : index
    %15 = vector.load %arg4[%c0_10, %c0_11, %c1, %c0_12, %c0_13] : memref<1x4x2x4x16xbf16, #tpu.memory_space<vmem>>, vector<1x4x1x4x16xbf16>
    %16 = vector.shape_cast %15 : vector<1x4x1x4x16xbf16> to vector<4x1x4x16xbf16>
    %17 = vector.shape_cast %14 : vector<4x1x4x16xbf16> to vector<1x4x1x4x16xbf16>
    tpu.vector_store %arg4[%c0_10, %c0_11, %c1, %c0_12, %c0_13], %17 {strides = array<i32>} : memref<1x4x2x4x16xbf16, #tpu.memory_space<vmem>>, vector<1x4x1x4x16xbf16>,
    return
  }
  func.func @transform_0(%arg0: i32, %arg1: i32) -> (i32, i32, i32, i32) {
    %c0_i32 = arith.constant 0 : i32
    %c0_i32_0 = arith.constant 0 : i32
    %c0_i32_1 = arith.constant 0 : i32
    return %arg0, %arg1, %c0_i32, %c0_i32_0 : i32, i32, i32, i32
  }
  func.func @transform_1(%arg0: i32, %arg1: i32) -> (i32, i32) {
    %c0_i32 = arith.constant 0 : i32
    %c0_i32_0 = arith.constant 0 : i32
    %c0_i32_1 = arith.constant 0 : i32
    return %c0_i32, %c0_i32_0 : i32, i32
  }
  func.func @transform_2(%arg0: i32, %arg1: i32) -> (i32, i32, i32, i32, i32) {
    %c0_i32 = arith.constant 0 : i32
    %c0_i32_0 = arith.constant 0 : i32
    %c0_i32_1 = arith.constant 0 : i32
    %c0_i32_2 = arith.constant 0 : i32
    return %arg0, %arg1, %c0_i32, %c0_i32_0, %c0_i32_1 : i32, i32, i32, i32, i32
  }
}

module attributes {stable_mosaic.version = 11 : i64} {
  func.func @_fused_skip_na_kernel(%arg0: i32, %arg1: i32, %arg2: memref<1x16x16xbf16, #tpu.memory_space<vmem>>, %arg3: memref<1x16x16xbf16, #tpu.memory_space<vmem>>, %arg4: memref<1x8x16xbf16, #tpu.memory_space<vmem>>, %arg5: memref<1x8x16xbf16, #tpu.memory_space<vmem>>, %arg6: memref<8x16xf32, #tpu.memory_space<vmem>>, %arg7: memref<16x16xbf16, #tpu.memory_space<vmem>>, %arg8: memref<16x16xbf16, #tpu.memory_space<vmem>>, %arg9: memref<16x16xbf16, #tpu.memory_space<vmem>>, %arg10: memref<16x16xbf16, #tpu.memory_space<vmem>>, %arg11: memref<1x8xf32, #tpu.memory_space<vmem>>, %arg12: memref<1x16x16xbf16, #tpu.memory_space<vmem>>) attributes {dimension_semantics = [#tpu.dimension_semantics<parallel>, #tpu.dimension_semantics<parallel>], iteration_bounds = array<i64: 2, 1>, scalar_prefetch = 0 : i64, scratch_operands = 0 : i64, tpu.core_type = #tpu.core_type<tc>, window_params = [{transform_indices = @transform_0, window_bounds = array<i64: 1, 16, 16>}, {transform_indices = @transform_1, window_bounds = array<i64: 1, 16, 16>}, {transform_indices = @transform_2, window_bounds = array<i64: 1, 8, 16>}, {transform_indices = @transform_3, window_bounds = array<i64: 1, 8, 16>}, {pipeline_mode = #tpu.pipeline_mode<synchronous>, transform_indices = @transform_4, window_bounds = array<i64: 8, 16>}, {pipeline_mode = #tpu.pipeline_mode<synchronous>, transform_indices = @transform_5, window_bounds = array<i64: 16, 16>}, {pipeline_mode = #tpu.pipeline_mode<synchronous>, transform_indices = @transform_6, window_bounds = array<i64: 16, 16>}, {pipeline_mode = #tpu.pipeline_mode<synchronous>, transform_indices = @transform_7, window_bounds = array<i64: 16, 16>}, {pipeline_mode = #tpu.pipeline_mode<synchronous>, transform_indices = @transform_8, window_bounds = array<i64: 16, 16>}, {pipeline_mode = #tpu.pipeline_mode<synchronous>, transform_indices = @transform_9, window_bounds = array<i64: 1, 8>}, {transform_indices = @transform_10, window_bounds = array<i64: 1, 16, 16>}]} {
    %c0 = arith.constant 0 : index
    %c0_0 = arith.constant 0 : index
    %0 = vector.load %arg6[%c0, %c0_0] : memref<8x16xf32, #tpu.memory_space<vmem>>, vector<1x16xf32>
    %c1 = arith.constant 1 : index
    %c0_1 = arith.constant 0 : index
    %1 = vector.load %arg6[%c1, %c0_1] : memref<8x16xf32, #tpu.memory_space<vmem>>, vector<1x16xf32>
    %c2 = arith.constant 2 : index
    %c0_2 = arith.constant 0 : index
    %2 = vector.load %arg6[%c2, %c0_2] : memref<8x16xf32, #tpu.memory_space<vmem>>, vector<1x16xf32>
    %c3 = arith.constant 3 : index
    %c0_3 = arith.constant 0 : index
    %3 = vector.load %arg6[%c3, %c0_3] : memref<8x16xf32, #tpu.memory_space<vmem>>, vector<1x16xf32>
    %c4 = arith.constant 4 : index
    %c0_4 = arith.constant 0 : index
    %4 = vector.load %arg6[%c4, %c0_4] : memref<8x16xf32, #tpu.memory_space<vmem>>, vector<1x16xf32>
    %c0_5 = arith.constant 0 : index
    %c0_6 = arith.constant 0 : index
    %c0_7 = arith.constant 0 : index
    %5 = vector.load %arg2[%c0_5, %c0_6, %c0_7] : memref<1x16x16xbf16, #tpu.memory_space<vmem>>, vector<1x16x16xbf16>
    %6 = vector.shape_cast %5 : vector<1x16x16xbf16> to vector<16x16xbf16>
    %7 = arith.extf %6 : vector<16x16xbf16> to vector<16x16xf32>
    %cst = arith.constant dense<0.000000e+00> : vector<16xf32>
    %8 = vector.multi_reduction <add>, %7, %cst [1] : vector<16x16xf32> to vector<16xf32>
    %9 = vector.shape_cast %8 : vector<16xf32> to vector<16x1xf32>
    %cst_8 = arith.constant 1.600000e+01 : f32
    %10 = vector.broadcast %cst_8 : f32 to vector<16x1xf32>
    %11 = arith.divf %9, %10 : vector<16x1xf32>
    %12 = vector.broadcast %11 : vector<16x1xf32> to vector<16x16xf32>
    %13 = arith.subf %7, %12 : vector<16x16xf32>
    %14 = arith.mulf %13, %13 : vector<16x16xf32>
    %cst_9 = arith.constant dense<0.000000e+00> : vector<16xf32>
    %15 = vector.multi_reduction <add>, %14, %cst_9 [1] : vector<16x16xf32> to vector<16xf32>
    %16 = vector.shape_cast %15 : vector<16xf32> to vector<16x1xf32>
    %cst_10 = arith.constant 1.600000e+01 : f32
    %17 = vector.broadcast %cst_10 : f32 to vector<16x1xf32>
    %18 = arith.divf %16, %17 : vector<16x1xf32>
    %19 = vector.broadcast %11 : vector<16x1xf32> to vector<16x16xf32>
    %20 = arith.subf %7, %19 : vector<16x16xf32>
    %cst_11 = arith.constant 9.99999974E-6 : f32
    %21 = vector.broadcast %cst_11 : f32 to vector<16x1xf32>
    %22 = arith.addf %18, %21 : vector<16x1xf32>
    %23 = math.rsqrt %22 : vector<16x1xf32>
    %24 = vector.broadcast %23 : vector<16x1xf32> to vector<16x16xf32>
    %25 = arith.mulf %20, %24 : vector<16x16xf32>
    %26 = vector.broadcast %0 : vector<1x16xf32> to vector<16x16xf32>
    %27 = arith.mulf %25, %26 : vector<16x16xf32>
    %28 = vector.broadcast %1 : vector<1x16xf32> to vector<16x16xf32>
    %29 = arith.addf %27, %28 : vector<16x16xf32>
    %30 = arith.truncf %29 : vector<16x16xf32> to vector<16x16xbf16>
    %c0_12 = arith.constant 0 : index
    %c0_13 = arith.constant 0 : index
    %31 = vector.load %arg7[%c0_12, %c0_13] : memref<16x16xbf16, #tpu.memory_space<vmem>>, vector<16x16xbf16>
    %cst_14 = arith.constant dense<0.000000e+00> : vector<16x16xf32>
    %32 = tpu.matmul %30, %31, %cst_14 {dimension_numbers = #tpu.dot_dimension_numbers<[1], [0], [0], [1], [0, 0, 1, 1], [], []>} : vector<16x16xbf16>, vector<16x16xbf16>, vector<16x16xf32> -> vector<16x16xf32>
    %c0_15 = arith.constant 0 : index
    %c0_16 = arith.constant 0 : index
    %c0_17 = arith.constant 0 : index
    %33 = vector.load %arg3[%c0_15, %c0_16, %c0_17] : memref<1x16x16xbf16, #tpu.memory_space<vmem>>, vector<1x16x16xbf16>
    %34 = vector.shape_cast %33 : vector<1x16x16xbf16> to vector<16x16xbf16>
    %c0_18 = arith.constant 0 : index
    %c0_19 = arith.constant 0 : index
    %35 = vector.load %arg8[%c0_18, %c0_19] : memref<16x16xbf16, #tpu.memory_space<vmem>>, vector<16x16xbf16>
    %cst_20 = arith.constant dense<0.000000e+00> : vector<16x16xf32>
    %36 = tpu.matmul %34, %35, %cst_20 {dimension_numbers = #tpu.dot_dimension_numbers<[1], [0], [0], [1], [0, 0, 1, 1], [], []>} : vector<16x16xbf16>, vector<16x16xbf16>, vector<16x16xf32> -> vector<16x16xf32>
    %37 = arith.addf %32, %36 : vector<16x16xf32>
    %38 = vector.broadcast %2 : vector<1x16xf32> to vector<16x16xf32>
    %39 = arith.addf %37, %38 : vector<16x16xf32>
    %40 = arith.truncf %39 : vector<16x16xf32> to vector<16x16xbf16>
    %c0_21 = arith.constant 0 : index
    %c0_22 = arith.constant 0 : index
    %41 = vector.load %arg9[%c0_21, %c0_22] : memref<16x16xbf16, #tpu.memory_space<vmem>>, vector<16x16xbf16>
    %cst_23 = arith.constant dense<0.000000e+00> : vector<16x16xf32>
    %42 = tpu.matmul %40, %41, %cst_23 {dimension_numbers = #tpu.dot_dimension_numbers<[1], [0], [0], [1], [0, 0, 1, 1], [], []>} : vector<16x16xbf16>, vector<16x16xbf16>, vector<16x16xf32> -> vector<16x16xf32>
    %43 = vector.broadcast %3 : vector<1x16xf32> to vector<16x16xf32>
    %44 = arith.addf %42, %43 : vector<16x16xf32>
    %45 = arith.truncf %44 : vector<16x16xf32> to vector<16x16xbf16>
    %c0_24 = arith.constant 0 : index
    %c0_25 = arith.constant 0 : index
    %c0_26 = arith.constant 0 : index
    %46 = vector.load %arg4[%c0_24, %c0_25, %c0_26] : memref<1x8x16xbf16, #tpu.memory_space<vmem>>, vector<1x8x16xbf16>
    %47 = vector.shape_cast %46 : vector<1x8x16xbf16> to vector<8x16xbf16>
    %cst_27 = arith.constant dense<0.000000e+00> : vector<16x8xf32>
    %48 = tpu.matmul %45, %47, %cst_27 {dimension_numbers = #tpu.dot_dimension_numbers<[1], [1], [0], [0], [0, 0, 1, 0], [], []>} : vector<16x16xbf16>, vector<8x16xbf16>, vector<16x8xf32> -> vector<16x8xf32>
    %c0_28 = arith.constant 0 : index
    %c0_29 = arith.constant 0 : index
    %49 = vector.load %arg11[%c0_28, %c0_29] : memref<1x8xf32, #tpu.memory_space<vmem>>, vector<1x8xf32>
    %50 = vector.broadcast %49 : vector<1x8xf32> to vector<16x8xf32>
    %51 = arith.addf %48, %50 : vector<16x8xf32>
    %cst_30 = arith.constant dense<0xFF800000> : vector<16xf32>
    %52 = vector.multi_reduction <maximumf>, %51, %cst_30 [1] : vector<16x8xf32> to vector<16xf32>
    %53 = vector.shape_cast %52 : vector<16xf32> to vector<16x1xf32>
    %cst_31 = arith.constant 0.000000e+00 : f32
    %54 = vector.broadcast %cst_31 : f32 to vector<16x1xf32>
    %55 = arith.maximumf %53, %54 : vector<16x1xf32>
    %56 = vector.broadcast %55 : vector<16x1xf32> to vector<16x8xf32>
    %57 = arith.subf %51, %56 : vector<16x8xf32>
    %58 = math.exp %57 : vector<16x8xf32>
    %cst_32 = arith.constant dense<0.000000e+00> : vector<16xf32>
    %59 = vector.multi_reduction <add>, %58, %cst_32 [1] : vector<16x8xf32> to vector<16xf32>
    %60 = vector.shape_cast %59 : vector<16xf32> to vector<16x1xf32>
    %cst_33 = arith.constant 0.000000e+00 : f32
    %61 = vector.broadcast %cst_33 : f32 to vector<16x1xf32>
    %62 = arith.subf %61, %55 : vector<16x1xf32>
    %63 = math.exp %62 : vector<16x1xf32>
    %cst_34 = arith.constant 8.000000e+00 : f32
    %64 = vector.broadcast %cst_34 : f32 to vector<16x1xf32>
    %65 = arith.mulf %64, %63 : vector<16x1xf32>
    %66 = arith.addf %60, %65 : vector<16x1xf32>
    %67 = tpu.reciprocal %66 {approx = true} : vector<16x1xf32> -> vector<16x1xf32>
    %68 = vector.broadcast %67 : vector<16x1xf32> to vector<16x8xf32>
    %69 = arith.mulf %58, %68 : vector<16x8xf32>
    %70 = arith.truncf %69 : vector<16x8xf32> to vector<16x8xbf16>
    %c0_35 = arith.constant 0 : index
    %c0_36 = arith.constant 0 : index
    %c0_37 = arith.constant 0 : index
    %71 = vector.load %arg5[%c0_35, %c0_36, %c0_37] : memref<1x8x16xbf16, #tpu.memory_space<vmem>>, vector<1x8x16xbf16>
    %72 = vector.shape_cast %71 : vector<1x8x16xbf16> to vector<8x16xbf16>
    %cst_38 = arith.constant dense<0.000000e+00> : vector<16x16xf32>
    %73 = tpu.matmul %70, %72, %cst_38 {dimension_numbers = #tpu.dot_dimension_numbers<[1], [0], [0], [1], [0, 0, 1, 1], [], []>} : vector<16x8xbf16>, vector<8x16xbf16>, vector<16x16xf32> -> vector<16x16xf32>
    %74 = arith.truncf %73 : vector<16x16xf32> to vector<16x16xbf16>
    %c0_39 = arith.constant 0 : index
    %c0_40 = arith.constant 0 : index
    %75 = vector.load %arg10[%c0_39, %c0_40] : memref<16x16xbf16, #tpu.memory_space<vmem>>, vector<16x16xbf16>
    %cst_41 = arith.constant dense<0.000000e+00> : vector<16x16xf32>
    %76 = tpu.matmul %74, %75, %cst_41 {dimension_numbers = #tpu.dot_dimension_numbers<[1], [0], [0], [1], [0, 0, 1, 1], [], []>} : vector<16x16xbf16>, vector<16x16xbf16>, vector<16x16xf32> -> vector<16x16xf32>
    %77 = vector.broadcast %4 : vector<1x16xf32> to vector<16x16xf32>
    %78 = arith.addf %76, %77 : vector<16x16xf32>
    %79 = arith.truncf %78 : vector<16x16xf32> to vector<16x16xbf16>
    %c0_42 = arith.constant 0 : index
    %c0_43 = arith.constant 0 : index
    %c0_44 = arith.constant 0 : index
    %80 = vector.load %arg12[%c0_42, %c0_43, %c0_44] : memref<1x16x16xbf16, #tpu.memory_space<vmem>>, vector<1x16x16xbf16>
    %81 = vector.shape_cast %80 : vector<1x16x16xbf16> to vector<16x16xbf16>
    %82 = vector.shape_cast %79 : vector<16x16xbf16> to vector<1x16x16xbf16>
    tpu.vector_store %arg12[%c0_42, %c0_43, %c0_44], %82 {strides = array<i32>} : memref<1x16x16xbf16, #tpu.memory_space<vmem>>, vector<1x16x16xbf16>,
    return
  }
  func.func @transform_0(%arg0: i32, %arg1: i32) -> (i32, i32, i32) {
    %c0_i32 = arith.constant 0 : i32
    %c0_i32_0 = arith.constant 0 : i32
    return %arg0, %arg1, %c0_i32 : i32, i32, i32
  }
  func.func @transform_1(%arg0: i32, %arg1: i32) -> (i32, i32, i32) {
    %c0_i32 = arith.constant 0 : i32
    %c0_i32_0 = arith.constant 0 : i32
    return %arg0, %arg1, %c0_i32 : i32, i32, i32
  }
  func.func @transform_2(%arg0: i32, %arg1: i32) -> (i32, i32, i32) {
    %c0_i32 = arith.constant 0 : i32
    %c0_i32_0 = arith.constant 0 : i32
    %c0_i32_1 = arith.constant 0 : i32
    return %arg0, %c0_i32, %c0_i32_0 : i32, i32, i32
  }
  func.func @transform_3(%arg0: i32, %arg1: i32) -> (i32, i32, i32) {
    %c0_i32 = arith.constant 0 : i32
    %c0_i32_0 = arith.constant 0 : i32
    %c0_i32_1 = arith.constant 0 : i32
    return %arg0, %c0_i32, %c0_i32_0 : i32, i32, i32
  }
  func.func @transform_4(%arg0: i32, %arg1: i32) -> (i32, i32) {
    %c0_i32 = arith.constant 0 : i32
    %c0_i32_0 = arith.constant 0 : i32
    %c0_i32_1 = arith.constant 0 : i32
    return %c0_i32, %c0_i32_0 : i32, i32
  }
  func.func @transform_5(%arg0: i32, %arg1: i32) -> (i32, i32) {
    %c0_i32 = arith.constant 0 : i32
    %c0_i32_0 = arith.constant 0 : i32
    %c0_i32_1 = arith.constant 0 : i32
    return %c0_i32, %c0_i32_0 : i32, i32
  }
  func.func @transform_6(%arg0: i32, %arg1: i32) -> (i32, i32) {
    %c0_i32 = arith.constant 0 : i32
    %c0_i32_0 = arith.constant 0 : i32
    %c0_i32_1 = arith.constant 0 : i32
    return %c0_i32, %c0_i32_0 : i32, i32
  }
  func.func @transform_7(%arg0: i32, %arg1: i32) -> (i32, i32) {
    %c0_i32 = arith.constant 0 : i32
    %c0_i32_0 = arith.constant 0 : i32
    %c0_i32_1 = arith.constant 0 : i32
    return %c0_i32, %c0_i32_0 : i32, i32
  }
  func.func @transform_8(%arg0: i32, %arg1: i32) -> (i32, i32) {
    %c0_i32 = arith.constant 0 : i32
    %c0_i32_0 = arith.constant 0 : i32
    %c0_i32_1 = arith.constant 0 : i32
    return %c0_i32, %c0_i32_0 : i32, i32
  }
  func.func @transform_9(%arg0: i32, %arg1: i32) -> (i32, i32) {
    %c0_i32 = arith.constant 0 : i32
    %c0_i32_0 = arith.constant 0 : i32
    %c0_i32_1 = arith.constant 0 : i32
    return %c0_i32, %c0_i32_0 : i32, i32
  }
  func.func @transform_10(%arg0: i32, %arg1: i32) -> (i32, i32, i32) {
    %c0_i32 = arith.constant 0 : i32
    %c0_i32_0 = arith.constant 0 : i32
    return %arg0, %arg1, %c0_i32 : i32, i32, i32
  }
}

module attributes {stable_mosaic.version = 11 : i64} {
  func.func @_expand_shuffle_kernel(%arg0: i32, %arg1: i32, %arg2: memref<1x8x8x8xbf16, #tpu.memory_space<vmem>>, %arg3: memref<8x16xbf16, #tpu.memory_space<vmem>>, %arg4: memref<1x8x2x8x8xbf16, #tpu.memory_space<vmem>>) attributes {dimension_semantics = [#tpu.dimension_semantics<parallel>, #tpu.dimension_semantics<parallel>], iteration_bounds = array<i64: 2, 1>, scalar_prefetch = 0 : i64, scratch_operands = 0 : i64, tpu.core_type = #tpu.core_type<tc>, window_params = [{transform_indices = @transform_0, window_bounds = array<i64: 1, 8, 8, 8>}, {pipeline_mode = #tpu.pipeline_mode<synchronous>, transform_indices = @transform_1, window_bounds = array<i64: 8, 16>}, {transform_indices = @transform_2, window_bounds = array<i64: 1, 8, 2, 8, 8>}]} {
    %c0 = arith.constant 0 : index
    %c0_0 = arith.constant 0 : index
    %c0_1 = arith.constant 0 : index
    %c0_2 = arith.constant 0 : index
    %0 = vector.load %arg2[%c0, %c0_0, %c0_1, %c0_2] : memref<1x8x8x8xbf16, #tpu.memory_space<vmem>>, vector<1x8x8x8xbf16>
    %1 = vector.shape_cast %0 : vector<1x8x8x8xbf16> to vector<8x8x8xbf16>
    %2 = vector.shape_cast %1 : vector<8x8x8xbf16> to vector<64x8xbf16>
    %c0_3 = arith.constant 0 : index
    %c0_4 = arith.constant 0 : index
    %3 = vector.load %arg3[%c0_3, %c0_4] : memref<8x16xbf16, #tpu.memory_space<vmem>>, vector<8x16xbf16>
    %cst = arith.constant dense<0.000000e+00> : vector<64x16xf32>
    %4 = tpu.matmul %2, %3, %cst {dimension_numbers = #tpu.dot_dimension_numbers<[1], [0], [0], [1], [0, 0, 1, 1], [], []>} : vector<64x8xbf16>, vector<8x16xbf16>, vector<64x16xf32> -> vector<64x16xf32>
    %5 = vector.shape_cast %4 : vector<64x16xf32> to vector<8x8x16xf32>
    %6 = vector.extract_strided_slice %5 {offsets = [0, 0, 0], sizes = [8, 8, 8], strides = [1, 1, 1]} : vector<8x8x16xf32> to vector<8x8x8xf32>
    %7 = vector.shape_cast %6 : vector<8x8x8xf32> to vector<8x1x8x8xf32>
    %8 = arith.truncf %7 : vector<8x1x8x8xf32> to vector<8x1x8x8xbf16>
    %c0_5 = arith.constant 0 : index
    %c0_6 = arith.constant 0 : index
    %c0_7 = arith.constant 0 : index
    %c0_8 = arith.constant 0 : index
    %c0_9 = arith.constant 0 : index
    %9 = vector.load %arg4[%c0_5, %c0_6, %c0_7, %c0_8, %c0_9] : memref<1x8x2x8x8xbf16, #tpu.memory_space<vmem>>, vector<1x8x1x8x8xbf16>
    %10 = vector.shape_cast %9 : vector<1x8x1x8x8xbf16> to vector<8x1x8x8xbf16>
    %11 = vector.shape_cast %8 : vector<8x1x8x8xbf16> to vector<1x8x1x8x8xbf16>
    tpu.vector_store %arg4[%c0_5, %c0_6, %c0_7, %c0_8, %c0_9], %11 {strides = array<i32>} : memref<1x8x2x8x8xbf16, #tpu.memory_space<vmem>>, vector<1x8x1x8x8xbf16>,
    %12 = vector.extract_strided_slice %5 {offsets = [0, 0, 8], sizes = [8, 8, 8], strides = [1, 1, 1]} : vector<8x8x16xf32> to vector<8x8x8xf32>
    %13 = vector.shape_cast %12 : vector<8x8x8xf32> to vector<8x1x8x8xf32>
    %14 = arith.truncf %13 : vector<8x1x8x8xf32> to vector<8x1x8x8xbf16>
    %c0_10 = arith.constant 0 : index
    %c0_11 = arith.constant 0 : index
    %c1 = arith.constant 1 : index
    %c0_12 = arith.constant 0 : index
    %c0_13 = arith.constant 0 : index
    %15 = vector.load %arg4[%c0_10, %c0_11, %c1, %c0_12, %c0_13] : memref<1x8x2x8x8xbf16, #tpu.memory_space<vmem>>, vector<1x8x1x8x8xbf16>
    %16 = vector.shape_cast %15 : vector<1x8x1x8x8xbf16> to vector<8x1x8x8xbf16>
    %17 = vector.shape_cast %14 : vector<8x1x8x8xbf16> to vector<1x8x1x8x8xbf16>
    tpu.vector_store %arg4[%c0_10, %c0_11, %c1, %c0_12, %c0_13], %17 {strides = array<i32>} : memref<1x8x2x8x8xbf16, #tpu.memory_space<vmem>>, vector<1x8x1x8x8xbf16>,
    return
  }
  func.func @transform_0(%arg0: i32, %arg1: i32) -> (i32, i32, i32, i32) {
    %c0_i32 = arith.constant 0 : i32
    %c0_i32_0 = arith.constant 0 : i32
    %c0_i32_1 = arith.constant 0 : i32
    return %arg0, %arg1, %c0_i32, %c0_i32_0 : i32, i32, i32, i32
  }
  func.func @transform_1(%arg0: i32, %arg1: i32) -> (i32, i32) {
    %c0_i32 = arith.constant 0 : i32
    %c0_i32_0 = arith.constant 0 : i32
    %c0_i32_1 = arith.constant 0 : i32
    return %c0_i32, %c0_i32_0 : i32, i32
  }
  func.func @transform_2(%arg0: i32, %arg1: i32) -> (i32, i32, i32, i32, i32) {
    %c0_i32 = arith.constant 0 : i32
    %c0_i32_0 = arith.constant 0 : i32
    %c0_i32_1 = arith.constant 0 : i32
    %c0_i32_2 = arith.constant 0 : i32
    return %arg0, %arg1, %c0_i32, %c0_i32_0, %c0_i32_1 : i32, i32, i32, i32, i32
  }
}

module attributes {stable_mosaic.version = 11 : i64} {
  func.func @_fused_skip_na_kernel(%arg0: i32, %arg1: i32, %arg2: memref<1x64x8xbf16, #tpu.memory_space<vmem>>, %arg3: memref<1x64x8xbf16, #tpu.memory_space<vmem>>, %arg4: memref<1x8x8xbf16, #tpu.memory_space<vmem>>, %arg5: memref<1x8x8xbf16, #tpu.memory_space<vmem>>, %arg6: memref<8x8xf32, #tpu.memory_space<vmem>>, %arg7: memref<8x8xbf16, #tpu.memory_space<vmem>>, %arg8: memref<8x8xbf16, #tpu.memory_space<vmem>>, %arg9: memref<8x8xbf16, #tpu.memory_space<vmem>>, %arg10: memref<8x8xbf16, #tpu.memory_space<vmem>>, %arg11: memref<1x8xf32, #tpu.memory_space<vmem>>, %arg12: memref<1x64x8xbf16, #tpu.memory_space<vmem>>) attributes {dimension_semantics = [#tpu.dimension_semantics<parallel>, #tpu.dimension_semantics<parallel>], iteration_bounds = array<i64: 2, 1>, scalar_prefetch = 0 : i64, scratch_operands = 0 : i64, tpu.core_type = #tpu.core_type<tc>, window_params = [{transform_indices = @transform_0, window_bounds = array<i64: 1, 64, 8>}, {transform_indices = @transform_1, window_bounds = array<i64: 1, 64, 8>}, {transform_indices = @transform_2, window_bounds = array<i64: 1, 8, 8>}, {transform_indices = @transform_3, window_bounds = array<i64: 1, 8, 8>}, {pipeline_mode = #tpu.pipeline_mode<synchronous>, transform_indices = @transform_4, window_bounds = array<i64: 8, 8>}, {pipeline_mode = #tpu.pipeline_mode<synchronous>, transform_indices = @transform_5, window_bounds = array<i64: 8, 8>}, {pipeline_mode = #tpu.pipeline_mode<synchronous>, transform_indices = @transform_6, window_bounds = array<i64: 8, 8>}, {pipeline_mode = #tpu.pipeline_mode<synchronous>, transform_indices = @transform_7, window_bounds = array<i64: 8, 8>}, {pipeline_mode = #tpu.pipeline_mode<synchronous>, transform_indices = @transform_8, window_bounds = array<i64: 8, 8>}, {pipeline_mode = #tpu.pipeline_mode<synchronous>, transform_indices = @transform_9, window_bounds = array<i64: 1, 8>}, {transform_indices = @transform_10, window_bounds = array<i64: 1, 64, 8>}]} {
    %c0 = arith.constant 0 : index
    %c0_0 = arith.constant 0 : index
    %0 = vector.load %arg6[%c0, %c0_0] : memref<8x8xf32, #tpu.memory_space<vmem>>, vector<1x8xf32>
    %c1 = arith.constant 1 : index
    %c0_1 = arith.constant 0 : index
    %1 = vector.load %arg6[%c1, %c0_1] : memref<8x8xf32, #tpu.memory_space<vmem>>, vector<1x8xf32>
    %c2 = arith.constant 2 : index
    %c0_2 = arith.constant 0 : index
    %2 = vector.load %arg6[%c2, %c0_2] : memref<8x8xf32, #tpu.memory_space<vmem>>, vector<1x8xf32>
    %c3 = arith.constant 3 : index
    %c0_3 = arith.constant 0 : index
    %3 = vector.load %arg6[%c3, %c0_3] : memref<8x8xf32, #tpu.memory_space<vmem>>, vector<1x8xf32>
    %c4 = arith.constant 4 : index
    %c0_4 = arith.constant 0 : index
    %4 = vector.load %arg6[%c4, %c0_4] : memref<8x8xf32, #tpu.memory_space<vmem>>, vector<1x8xf32>
    %c0_5 = arith.constant 0 : index
    %c0_6 = arith.constant 0 : index
    %c0_7 = arith.constant 0 : index
    %5 = vector.load %arg2[%c0_5, %c0_6, %c0_7] : memref<1x64x8xbf16, #tpu.memory_space<vmem>>, vector<1x64x8xbf16>
    %6 = vector.shape_cast %5 : vector<1x64x8xbf16> to vector<64x8xbf16>
    %7 = arith.extf %6 : vector<64x8xbf16> to vector<64x8xf32>
    %cst = arith.constant dense<0.000000e+00> : vector<64xf32>
    %8 = vector.multi_reduction <add>, %7, %cst [1] : vector<64x8xf32> to vector<64xf32>
    %9 = vector.shape_cast %8 : vector<64xf32> to vector<64x1xf32>
    %cst_8 = arith.constant 8.000000e+00 : f32
    %10 = vector.broadcast %cst_8 : f32 to vector<64x1xf32>
    %11 = arith.divf %9, %10 : vector<64x1xf32>
    %12 = vector.broadcast %11 : vector<64x1xf32> to vector<64x8xf32>
    %13 = arith.subf %7, %12 : vector<64x8xf32>
    %14 = arith.mulf %13, %13 : vector<64x8xf32>
    %cst_9 = arith.constant dense<0.000000e+00> : vector<64xf32>
    %15 = vector.multi_reduction <add>, %14, %cst_9 [1] : vector<64x8xf32> to vector<64xf32>
    %16 = vector.shape_cast %15 : vector<64xf32> to vector<64x1xf32>
    %cst_10 = arith.constant 8.000000e+00 : f32
    %17 = vector.broadcast %cst_10 : f32 to vector<64x1xf32>
    %18 = arith.divf %16, %17 : vector<64x1xf32>
    %19 = vector.broadcast %11 : vector<64x1xf32> to vector<64x8xf32>
    %20 = arith.subf %7, %19 : vector<64x8xf32>
    %cst_11 = arith.constant 9.99999974E-6 : f32
    %21 = vector.broadcast %cst_11 : f32 to vector<64x1xf32>
    %22 = arith.addf %18, %21 : vector<64x1xf32>
    %23 = math.rsqrt %22 : vector<64x1xf32>
    %24 = vector.broadcast %23 : vector<64x1xf32> to vector<64x8xf32>
    %25 = arith.mulf %20, %24 : vector<64x8xf32>
    %26 = vector.broadcast %0 : vector<1x8xf32> to vector<64x8xf32>
    %27 = arith.mulf %25, %26 : vector<64x8xf32>
    %28 = vector.broadcast %1 : vector<1x8xf32> to vector<64x8xf32>
    %29 = arith.addf %27, %28 : vector<64x8xf32>
    %30 = arith.truncf %29 : vector<64x8xf32> to vector<64x8xbf16>
    %c0_12 = arith.constant 0 : index
    %c0_13 = arith.constant 0 : index
    %31 = vector.load %arg7[%c0_12, %c0_13] : memref<8x8xbf16, #tpu.memory_space<vmem>>, vector<8x8xbf16>
    %cst_14 = arith.constant dense<0.000000e+00> : vector<64x8xf32>
    %32 = tpu.matmul %30, %31, %cst_14 {dimension_numbers = #tpu.dot_dimension_numbers<[1], [0], [0], [1], [0, 0, 1, 1], [], []>} : vector<64x8xbf16>, vector<8x8xbf16>, vector<64x8xf32> -> vector<64x8xf32>
    %c0_15 = arith.constant 0 : index
    %c0_16 = arith.constant 0 : index
    %c0_17 = arith.constant 0 : index
    %33 = vector.load %arg3[%c0_15, %c0_16, %c0_17] : memref<1x64x8xbf16, #tpu.memory_space<vmem>>, vector<1x64x8xbf16>
    %34 = vector.shape_cast %33 : vector<1x64x8xbf16> to vector<64x8xbf16>
    %c0_18 = arith.constant 0 : index
    %c0_19 = arith.constant 0 : index
    %35 = vector.load %arg8[%c0_18, %c0_19] : memref<8x8xbf16, #tpu.memory_space<vmem>>, vector<8x8xbf16>
    %cst_20 = arith.constant dense<0.000000e+00> : vector<64x8xf32>
    %36 = tpu.matmul %34, %35, %cst_20 {dimension_numbers = #tpu.dot_dimension_numbers<[1], [0], [0], [1], [0, 0, 1, 1], [], []>} : vector<64x8xbf16>, vector<8x8xbf16>, vector<64x8xf32> -> vector<64x8xf32>
    %37 = arith.addf %32, %36 : vector<64x8xf32>
    %38 = vector.broadcast %2 : vector<1x8xf32> to vector<64x8xf32>
    %39 = arith.addf %37, %38 : vector<64x8xf32>
    %40 = arith.truncf %39 : vector<64x8xf32> to vector<64x8xbf16>
    %c0_21 = arith.constant 0 : index
    %c0_22 = arith.constant 0 : index
    %41 = vector.load %arg9[%c0_21, %c0_22] : memref<8x8xbf16, #tpu.memory_space<vmem>>, vector<8x8xbf16>
    %cst_23 = arith.constant dense<0.000000e+00> : vector<64x8xf32>
    %42 = tpu.matmul %40, %41, %cst_23 {dimension_numbers = #tpu.dot_dimension_numbers<[1], [0], [0], [1], [0, 0, 1, 1], [], []>} : vector<64x8xbf16>, vector<8x8xbf16>, vector<64x8xf32> -> vector<64x8xf32>
    %43 = vector.broadcast %3 : vector<1x8xf32> to vector<64x8xf32>
    %44 = arith.addf %42, %43 : vector<64x8xf32>
    %45 = arith.truncf %44 : vector<64x8xf32> to vector<64x8xbf16>
    %c0_24 = arith.constant 0 : index
    %c0_25 = arith.constant 0 : index
    %c0_26 = arith.constant 0 : index
    %46 = vector.load %arg4[%c0_24, %c0_25, %c0_26] : memref<1x8x8xbf16, #tpu.memory_space<vmem>>, vector<1x8x8xbf16>
    %47 = vector.shape_cast %46 : vector<1x8x8xbf16> to vector<8x8xbf16>
    %cst_27 = arith.constant dense<0.000000e+00> : vector<64x8xf32>
    %48 = tpu.matmul %45, %47, %cst_27 {dimension_numbers = #tpu.dot_dimension_numbers<[1], [1], [0], [0], [0, 0, 1, 0], [], []>} : vector<64x8xbf16>, vector<8x8xbf16>, vector<64x8xf32> -> vector<64x8xf32>
    %c0_28 = arith.constant 0 : index
    %c0_29 = arith.constant 0 : index
    %49 = vector.load %arg11[%c0_28, %c0_29] : memref<1x8xf32, #tpu.memory_space<vmem>>, vector<1x8xf32>
    %50 = vector.broadcast %49 : vector<1x8xf32> to vector<64x8xf32>
    %51 = arith.addf %48, %50 : vector<64x8xf32>
    %cst_30 = arith.constant dense<0xFF800000> : vector<64xf32>
    %52 = vector.multi_reduction <maximumf>, %51, %cst_30 [1] : vector<64x8xf32> to vector<64xf32>
    %53 = vector.shape_cast %52 : vector<64xf32> to vector<64x1xf32>
    %cst_31 = arith.constant 0.000000e+00 : f32
    %54 = vector.broadcast %cst_31 : f32 to vector<64x1xf32>
    %55 = arith.maximumf %53, %54 : vector<64x1xf32>
    %56 = vector.broadcast %55 : vector<64x1xf32> to vector<64x8xf32>
    %57 = arith.subf %51, %56 : vector<64x8xf32>
    %58 = math.exp %57 : vector<64x8xf32>
    %cst_32 = arith.constant dense<0.000000e+00> : vector<64xf32>
    %59 = vector.multi_reduction <add>, %58, %cst_32 [1] : vector<64x8xf32> to vector<64xf32>
    %60 = vector.shape_cast %59 : vector<64xf32> to vector<64x1xf32>
    %cst_33 = arith.constant 0.000000e+00 : f32
    %61 = vector.broadcast %cst_33 : f32 to vector<64x1xf32>
    %62 = arith.subf %61, %55 : vector<64x1xf32>
    %63 = math.exp %62 : vector<64x1xf32>
    %cst_34 = arith.constant 5.600000e+01 : f32
    %64 = vector.broadcast %cst_34 : f32 to vector<64x1xf32>
    %65 = arith.mulf %64, %63 : vector<64x1xf32>
    %66 = arith.addf %60, %65 : vector<64x1xf32>
    %67 = tpu.reciprocal %66 {approx = true} : vector<64x1xf32> -> vector<64x1xf32>
    %68 = vector.broadcast %67 : vector<64x1xf32> to vector<64x8xf32>
    %69 = arith.mulf %58, %68 : vector<64x8xf32>
    %70 = arith.truncf %69 : vector<64x8xf32> to vector<64x8xbf16>
    %c0_35 = arith.constant 0 : index
    %c0_36 = arith.constant 0 : index
    %c0_37 = arith.constant 0 : index
    %71 = vector.load %arg5[%c0_35, %c0_36, %c0_37] : memref<1x8x8xbf16, #tpu.memory_space<vmem>>, vector<1x8x8xbf16>
    %72 = vector.shape_cast %71 : vector<1x8x8xbf16> to vector<8x8xbf16>
    %cst_38 = arith.constant dense<0.000000e+00> : vector<64x8xf32>
    %73 = tpu.matmul %70, %72, %cst_38 {dimension_numbers = #tpu.dot_dimension_numbers<[1], [0], [0], [1], [0, 0, 1, 1], [], []>} : vector<64x8xbf16>, vector<8x8xbf16>, vector<64x8xf32> -> vector<64x8xf32>
    %74 = arith.truncf %73 : vector<64x8xf32> to vector<64x8xbf16>
    %c0_39 = arith.constant 0 : index
    %c0_40 = arith.constant 0 : index
    %75 = vector.load %arg10[%c0_39, %c0_40] : memref<8x8xbf16, #tpu.memory_space<vmem>>, vector<8x8xbf16>
    %cst_41 = arith.constant dense<0.000000e+00> : vector<64x8xf32>
    %76 = tpu.matmul %74, %75, %cst_41 {dimension_numbers = #tpu.dot_dimension_numbers<[1], [0], [0], [1], [0, 0, 1, 1], [], []>} : vector<64x8xbf16>, vector<8x8xbf16>, vector<64x8xf32> -> vector<64x8xf32>
    %77 = vector.broadcast %4 : vector<1x8xf32> to vector<64x8xf32>
    %78 = arith.addf %76, %77 : vector<64x8xf32>
    %79 = arith.truncf %78 : vector<64x8xf32> to vector<64x8xbf16>
    %c0_42 = arith.constant 0 : index
    %c0_43 = arith.constant 0 : index
    %c0_44 = arith.constant 0 : index
    %80 = vector.load %arg12[%c0_42, %c0_43, %c0_44] : memref<1x64x8xbf16, #tpu.memory_space<vmem>>, vector<1x64x8xbf16>
    %81 = vector.shape_cast %80 : vector<1x64x8xbf16> to vector<64x8xbf16>
    %82 = vector.shape_cast %79 : vector<64x8xbf16> to vector<1x64x8xbf16>
    tpu.vector_store %arg12[%c0_42, %c0_43, %c0_44], %82 {strides = array<i32>} : memref<1x64x8xbf16, #tpu.memory_space<vmem>>, vector<1x64x8xbf16>,
    return
  }
  func.func @transform_0(%arg0: i32, %arg1: i32) -> (i32, i32, i32) {
    %c0_i32 = arith.constant 0 : i32
    %c0_i32_0 = arith.constant 0 : i32
    return %arg0, %arg1, %c0_i32 : i32, i32, i32
  }
  func.func @transform_1(%arg0: i32, %arg1: i32) -> (i32, i32, i32) {
    %c0_i32 = arith.constant 0 : i32
    %c0_i32_0 = arith.constant 0 : i32
    return %arg0, %arg1, %c0_i32 : i32, i32, i32
  }
  func.func @transform_2(%arg0: i32, %arg1: i32) -> (i32, i32, i32) {
    %c0_i32 = arith.constant 0 : i32
    %c0_i32_0 = arith.constant 0 : i32
    %c0_i32_1 = arith.constant 0 : i32
    return %arg0, %c0_i32, %c0_i32_0 : i32, i32, i32
  }
  func.func @transform_3(%arg0: i32, %arg1: i32) -> (i32, i32, i32) {
    %c0_i32 = arith.constant 0 : i32
    %c0_i32_0 = arith.constant 0 : i32
    %c0_i32_1 = arith.constant 0 : i32
    return %arg0, %c0_i32, %c0_i32_0 : i32, i32, i32
  }
  func.func @transform_4(%arg0: i32, %arg1: i32) -> (i32, i32) {
    %c0_i32 = arith.constant 0 : i32
    %c0_i32_0 = arith.constant 0 : i32
    %c0_i32_1 = arith.constant 0 : i32
    return %c0_i32, %c0_i32_0 : i32, i32
  }
  func.func @transform_5(%arg0: i32, %arg1: i32) -> (i32, i32) {
    %c0_i32 = arith.constant 0 : i32
    %c0_i32_0 = arith.constant 0 : i32
    %c0_i32_1 = arith.constant 0 : i32
    return %c0_i32, %c0_i32_0 : i32, i32
  }
  func.func @transform_6(%arg0: i32, %arg1: i32) -> (i32, i32) {
    %c0_i32 = arith.constant 0 : i32
    %c0_i32_0 = arith.constant 0 : i32
    %c0_i32_1 = arith.constant 0 : i32
    return %c0_i32, %c0_i32_0 : i32, i32
  }
  func.func @transform_7(%arg0: i32, %arg1: i32) -> (i32, i32) {
    %c0_i32 = arith.constant 0 : i32
    %c0_i32_0 = arith.constant 0 : i32
    %c0_i32_1 = arith.constant 0 : i32
    return %c0_i32, %c0_i32_0 : i32, i32
  }
  func.func @transform_8(%arg0: i32, %arg1: i32) -> (i32, i32) {
    %c0_i32 = arith.constant 0 : i32
    %c0_i32_0 = arith.constant 0 : i32
    %c0_i32_1 = arith.constant 0 : i32
    return %c0_i32, %c0_i32_0 : i32, i32
  }
  func.func @transform_9(%arg0: i32, %arg1: i32) -> (i32, i32) {
    %c0_i32 = arith.constant 0 : i32
    %c0_i32_0 = arith.constant 0 : i32
    %c0_i32_1 = arith.constant 0 : i32
    return %c0_i32, %c0_i32_0 : i32, i32
  }
  func.func @transform_10(%arg0: i32, %arg1: i32) -> (i32, i32, i32) {
    %c0_i32 = arith.constant 0 : i32
    %c0_i32_0 = arith.constant 0 : i32
    return %arg0, %arg1, %c0_i32 : i32, i32, i32
  }
}

module attributes {stable_mosaic.version = 11 : i64} {
  func.func @_fused_skip_na_kernel(%arg0: i32, %arg1: i32, %arg2: memref<1x256x4xbf16, #tpu.memory_space<vmem>>, %arg3: memref<1x256x4xbf16, #tpu.memory_space<vmem>>, %arg4: memref<1x8x4xbf16, #tpu.memory_space<vmem>>, %arg5: memref<1x8x4xbf16, #tpu.memory_space<vmem>>, %arg6: memref<8x4xf32, #tpu.memory_space<vmem>>, %arg7: memref<4x4xbf16, #tpu.memory_space<vmem>>, %arg8: memref<4x4xbf16, #tpu.memory_space<vmem>>, %arg9: memref<4x4xbf16, #tpu.memory_space<vmem>>, %arg10: memref<4x4xbf16, #tpu.memory_space<vmem>>, %arg11: memref<1x8xf32, #tpu.memory_space<vmem>>, %arg12: memref<1x256x4xbf16, #tpu.memory_space<vmem>>) attributes {dimension_semantics = [#tpu.dimension_semantics<parallel>, #tpu.dimension_semantics<parallel>], iteration_bounds = array<i64: 2, 1>, scalar_prefetch = 0 : i64, scratch_operands = 0 : i64, tpu.core_type = #tpu.core_type<tc>, window_params = [{transform_indices = @transform_0, window_bounds = array<i64: 1, 256, 4>}, {transform_indices = @transform_1, window_bounds = array<i64: 1, 256, 4>}, {transform_indices = @transform_2, window_bounds = array<i64: 1, 8, 4>}, {transform_indices = @transform_3, window_bounds = array<i64: 1, 8, 4>}, {pipeline_mode = #tpu.pipeline_mode<synchronous>, transform_indices = @transform_4, window_bounds = array<i64: 8, 4>}, {pipeline_mode = #tpu.pipeline_mode<synchronous>, transform_indices = @transform_5, window_bounds = array<i64: 4, 4>}, {pipeline_mode = #tpu.pipeline_mode<synchronous>, transform_indices = @transform_6, window_bounds = array<i64: 4, 4>}, {pipeline_mode = #tpu.pipeline_mode<synchronous>, transform_indices = @transform_7, window_bounds = array<i64: 4, 4>}, {pipeline_mode = #tpu.pipeline_mode<synchronous>, transform_indices = @transform_8, window_bounds = array<i64: 4, 4>}, {pipeline_mode = #tpu.pipeline_mode<synchronous>, transform_indices = @transform_9, window_bounds = array<i64: 1, 8>}, {transform_indices = @transform_10, window_bounds = array<i64: 1, 256, 4>}]} {
    %c0 = arith.constant 0 : index
    %c0_0 = arith.constant 0 : index
    %0 = vector.load %arg6[%c0, %c0_0] : memref<8x4xf32, #tpu.memory_space<vmem>>, vector<1x4xf32>
    %c1 = arith.constant 1 : index
    %c0_1 = arith.constant 0 : index
    %1 = vector.load %arg6[%c1, %c0_1] : memref<8x4xf32, #tpu.memory_space<vmem>>, vector<1x4xf32>
    %c2 = arith.constant 2 : index
    %c0_2 = arith.constant 0 : index
    %2 = vector.load %arg6[%c2, %c0_2] : memref<8x4xf32, #tpu.memory_space<vmem>>, vector<1x4xf32>
    %c3 = arith.constant 3 : index
    %c0_3 = arith.constant 0 : index
    %3 = vector.load %arg6[%c3, %c0_3] : memref<8x4xf32, #tpu.memory_space<vmem>>, vector<1x4xf32>
    %c4 = arith.constant 4 : index
    %c0_4 = arith.constant 0 : index
    %4 = vector.load %arg6[%c4, %c0_4] : memref<8x4xf32, #tpu.memory_space<vmem>>, vector<1x4xf32>
    %c0_5 = arith.constant 0 : index
    %c0_6 = arith.constant 0 : index
    %c0_7 = arith.constant 0 : index
    %5 = vector.load %arg2[%c0_5, %c0_6, %c0_7] : memref<1x256x4xbf16, #tpu.memory_space<vmem>>, vector<1x256x4xbf16>
    %6 = vector.shape_cast %5 : vector<1x256x4xbf16> to vector<256x4xbf16>
    %7 = arith.extf %6 : vector<256x4xbf16> to vector<256x4xf32>
    %cst = arith.constant dense<0.000000e+00> : vector<256xf32>
    %8 = vector.multi_reduction <add>, %7, %cst [1] : vector<256x4xf32> to vector<256xf32>
    %9 = vector.shape_cast %8 : vector<256xf32> to vector<256x1xf32>
    %cst_8 = arith.constant 4.000000e+00 : f32
    %10 = vector.broadcast %cst_8 : f32 to vector<256x1xf32>
    %11 = arith.divf %9, %10 : vector<256x1xf32>
    %12 = vector.broadcast %11 : vector<256x1xf32> to vector<256x4xf32>
    %13 = arith.subf %7, %12 : vector<256x4xf32>
    %14 = arith.mulf %13, %13 : vector<256x4xf32>
    %cst_9 = arith.constant dense<0.000000e+00> : vector<256xf32>
    %15 = vector.multi_reduction <add>, %14, %cst_9 [1] : vector<256x4xf32> to vector<256xf32>
    %16 = vector.shape_cast %15 : vector<256xf32> to vector<256x1xf32>
    %cst_10 = arith.constant 4.000000e+00 : f32
    %17 = vector.broadcast %cst_10 : f32 to vector<256x1xf32>
    %18 = arith.divf %16, %17 : vector<256x1xf32>
    %19 = vector.broadcast %11 : vector<256x1xf32> to vector<256x4xf32>
    %20 = arith.subf %7, %19 : vector<256x4xf32>
    %cst_11 = arith.constant 9.99999974E-6 : f32
    %21 = vector.broadcast %cst_11 : f32 to vector<256x1xf32>
    %22 = arith.addf %18, %21 : vector<256x1xf32>
    %23 = math.rsqrt %22 : vector<256x1xf32>
    %24 = vector.broadcast %23 : vector<256x1xf32> to vector<256x4xf32>
    %25 = arith.mulf %20, %24 : vector<256x4xf32>
    %26 = vector.broadcast %0 : vector<1x4xf32> to vector<256x4xf32>
    %27 = arith.mulf %25, %26 : vector<256x4xf32>
    %28 = vector.broadcast %1 : vector<1x4xf32> to vector<256x4xf32>
    %29 = arith.addf %27, %28 : vector<256x4xf32>
    %30 = arith.truncf %29 : vector<256x4xf32> to vector<256x4xbf16>
    %c0_12 = arith.constant 0 : index
    %c0_13 = arith.constant 0 : index
    %31 = vector.load %arg7[%c0_12, %c0_13] : memref<4x4xbf16, #tpu.memory_space<vmem>>, vector<4x4xbf16>
    %cst_14 = arith.constant dense<0.000000e+00> : vector<256x4xf32>
    %32 = tpu.matmul %30, %31, %cst_14 {dimension_numbers = #tpu.dot_dimension_numbers<[1], [0], [0], [1], [0, 0, 1, 1], [], []>} : vector<256x4xbf16>, vector<4x4xbf16>, vector<256x4xf32> -> vector<256x4xf32>
    %c0_15 = arith.constant 0 : index
    %c0_16 = arith.constant 0 : index
    %c0_17 = arith.constant 0 : index
    %33 = vector.load %arg3[%c0_15, %c0_16, %c0_17] : memref<1x256x4xbf16, #tpu.memory_space<vmem>>, vector<1x256x4xbf16>
    %34 = vector.shape_cast %33 : vector<1x256x4xbf16> to vector<256x4xbf16>
    %c0_18 = arith.constant 0 : index
    %c0_19 = arith.constant 0 : index
    %35 = vector.load %arg8[%c0_18, %c0_19] : memref<4x4xbf16, #tpu.memory_space<vmem>>, vector<4x4xbf16>
    %cst_20 = arith.constant dense<0.000000e+00> : vector<256x4xf32>
    %36 = tpu.matmul %34, %35, %cst_20 {dimension_numbers = #tpu.dot_dimension_numbers<[1], [0], [0], [1], [0, 0, 1, 1], [], []>} : vector<256x4xbf16>, vector<4x4xbf16>, vector<256x4xf32> -> vector<256x4xf32>
    %37 = arith.addf %32, %36 : vector<256x4xf32>
    %38 = vector.broadcast %2 : vector<1x4xf32> to vector<256x4xf32>
    %39 = arith.addf %37, %38 : vector<256x4xf32>
    %40 = arith.truncf %39 : vector<256x4xf32> to vector<256x4xbf16>
    %c0_21 = arith.constant 0 : index
    %c0_22 = arith.constant 0 : index
    %41 = vector.load %arg9[%c0_21, %c0_22] : memref<4x4xbf16, #tpu.memory_space<vmem>>, vector<4x4xbf16>
    %cst_23 = arith.constant dense<0.000000e+00> : vector<256x4xf32>
    %42 = tpu.matmul %40, %41, %cst_23 {dimension_numbers = #tpu.dot_dimension_numbers<[1], [0], [0], [1], [0, 0, 1, 1], [], []>} : vector<256x4xbf16>, vector<4x4xbf16>, vector<256x4xf32> -> vector<256x4xf32>
    %43 = vector.broadcast %3 : vector<1x4xf32> to vector<256x4xf32>
    %44 = arith.addf %42, %43 : vector<256x4xf32>
    %45 = arith.truncf %44 : vector<256x4xf32> to vector<256x4xbf16>
    %c0_24 = arith.constant 0 : index
    %c0_25 = arith.constant 0 : index
    %c0_26 = arith.constant 0 : index
    %46 = vector.load %arg4[%c0_24, %c0_25, %c0_26] : memref<1x8x4xbf16, #tpu.memory_space<vmem>>, vector<1x8x4xbf16>
    %47 = vector.shape_cast %46 : vector<1x8x4xbf16> to vector<8x4xbf16>
    %cst_27 = arith.constant dense<0.000000e+00> : vector<256x8xf32>
    %48 = tpu.matmul %45, %47, %cst_27 {dimension_numbers = #tpu.dot_dimension_numbers<[1], [1], [0], [0], [0, 0, 1, 0], [], []>} : vector<256x4xbf16>, vector<8x4xbf16>, vector<256x8xf32> -> vector<256x8xf32>
    %c0_28 = arith.constant 0 : index
    %c0_29 = arith.constant 0 : index
    %49 = vector.load %arg11[%c0_28, %c0_29] : memref<1x8xf32, #tpu.memory_space<vmem>>, vector<1x8xf32>
    %50 = vector.broadcast %49 : vector<1x8xf32> to vector<256x8xf32>
    %51 = arith.addf %48, %50 : vector<256x8xf32>
    %cst_30 = arith.constant dense<0xFF800000> : vector<256xf32>
    %52 = vector.multi_reduction <maximumf>, %51, %cst_30 [1] : vector<256x8xf32> to vector<256xf32>
    %53 = vector.shape_cast %52 : vector<256xf32> to vector<256x1xf32>
    %cst_31 = arith.constant 0.000000e+00 : f32
    %54 = vector.broadcast %cst_31 : f32 to vector<256x1xf32>
    %55 = arith.maximumf %53, %54 : vector<256x1xf32>
    %56 = vector.broadcast %55 : vector<256x1xf32> to vector<256x8xf32>
    %57 = arith.subf %51, %56 : vector<256x8xf32>
    %58 = math.exp %57 : vector<256x8xf32>
    %cst_32 = arith.constant dense<0.000000e+00> : vector<256xf32>
    %59 = vector.multi_reduction <add>, %58, %cst_32 [1] : vector<256x8xf32> to vector<256xf32>
    %60 = vector.shape_cast %59 : vector<256xf32> to vector<256x1xf32>
    %cst_33 = arith.constant 0.000000e+00 : f32
    %61 = vector.broadcast %cst_33 : f32 to vector<256x1xf32>
    %62 = arith.subf %61, %55 : vector<256x1xf32>
    %63 = math.exp %62 : vector<256x1xf32>
    %cst_34 = arith.constant 2.480000e+02 : f32
    %64 = vector.broadcast %cst_34 : f32 to vector<256x1xf32>
    %65 = arith.mulf %64, %63 : vector<256x1xf32>
    %66 = arith.addf %60, %65 : vector<256x1xf32>
    %67 = tpu.reciprocal %66 {approx = true} : vector<256x1xf32> -> vector<256x1xf32>
    %68 = vector.broadcast %67 : vector<256x1xf32> to vector<256x8xf32>
    %69 = arith.mulf %58, %68 : vector<256x8xf32>
    %70 = arith.truncf %69 : vector<256x8xf32> to vector<256x8xbf16>
    %c0_35 = arith.constant 0 : index
    %c0_36 = arith.constant 0 : index
    %c0_37 = arith.constant 0 : index
    %71 = vector.load %arg5[%c0_35, %c0_36, %c0_37] : memref<1x8x4xbf16, #tpu.memory_space<vmem>>, vector<1x8x4xbf16>
    %72 = vector.shape_cast %71 : vector<1x8x4xbf16> to vector<8x4xbf16>
    %cst_38 = arith.constant dense<0.000000e+00> : vector<256x4xf32>
    %73 = tpu.matmul %70, %72, %cst_38 {dimension_numbers = #tpu.dot_dimension_numbers<[1], [0], [0], [1], [0, 0, 1, 1], [], []>} : vector<256x8xbf16>, vector<8x4xbf16>, vector<256x4xf32> -> vector<256x4xf32>
    %74 = arith.truncf %73 : vector<256x4xf32> to vector<256x4xbf16>
    %c0_39 = arith.constant 0 : index
    %c0_40 = arith.constant 0 : index
    %75 = vector.load %arg10[%c0_39, %c0_40] : memref<4x4xbf16, #tpu.memory_space<vmem>>, vector<4x4xbf16>
    %cst_41 = arith.constant dense<0.000000e+00> : vector<256x4xf32>
    %76 = tpu.matmul %74, %75, %cst_41 {dimension_numbers = #tpu.dot_dimension_numbers<[1], [0], [0], [1], [0, 0, 1, 1], [], []>} : vector<256x4xbf16>, vector<4x4xbf16>, vector<256x4xf32> -> vector<256x4xf32>
    %77 = vector.broadcast %4 : vector<1x4xf32> to vector<256x4xf32>
    %78 = arith.addf %76, %77 : vector<256x4xf32>
    %79 = arith.truncf %78 : vector<256x4xf32> to vector<256x4xbf16>
    %c0_42 = arith.constant 0 : index
    %c0_43 = arith.constant 0 : index
    %c0_44 = arith.constant 0 : index
    %80 = vector.load %arg12[%c0_42, %c0_43, %c0_44] : memref<1x256x4xbf16, #tpu.memory_space<vmem>>, vector<1x256x4xbf16>
    %81 = vector.shape_cast %80 : vector<1x256x4xbf16> to vector<256x4xbf16>
    %82 = vector.shape_cast %79 : vector<256x4xbf16> to vector<1x256x4xbf16>
    tpu.vector_store %arg12[%c0_42, %c0_43, %c0_44], %82 {strides = array<i32>} : memref<1x256x4xbf16, #tpu.memory_space<vmem>>, vector<1x256x4xbf16>,
    return
  }
  func.func @transform_0(%arg0: i32, %arg1: i32) -> (i32, i32, i32) {
    %c0_i32 = arith.constant 0 : i32
    %c0_i32_0 = arith.constant 0 : i32
    return %arg0, %arg1, %c0_i32 : i32, i32, i32
  }
  func.func @transform_1(%arg0: i32, %arg1: i32) -> (i32, i32, i32) {
    %c0_i32 = arith.constant 0 : i32
    %c0_i32_0 = arith.constant 0 : i32
    return %arg0, %arg1, %c0_i32 : i32, i32, i32
  }
  func.func @transform_2(%arg0: i32, %arg1: i32) -> (i32, i32, i32) {
    %c0_i32 = arith.constant 0 : i32
    %c0_i32_0 = arith.constant 0 : i32
    %c0_i32_1 = arith.constant 0 : i32
    return %arg0, %c0_i32, %c0_i32_0 : i32, i32, i32
  }
  func.func @transform_3(%arg0: i32, %arg1: i32) -> (i32, i32, i32) {
    %c0_i32 = arith.constant 0 : i32
    %c0_i32_0 = arith.constant 0 : i32
    %c0_i32_1 = arith.constant 0 : i32
    return %arg0, %c0_i32, %c0_i32_0 : i32, i32, i32
  }
  func.func @transform_4(%arg0: i32, %arg1: i32) -> (i32, i32) {
    %c0_i32 = arith.constant 0 : i32
    %c0_i32_0 = arith.constant 0 : i32
    %c0_i32_1 = arith.constant 0 : i32
    return %c0_i32, %c0_i32_0 : i32, i32
  }
  func.func @transform_5(%arg0: i32, %arg1: i32) -> (i32, i32) {
    %c0_i32 = arith.constant 0 : i32
    %c0_i32_0 = arith.constant 0 : i32
    %c0_i32_1 = arith.constant 0 : i32
    return %c0_i32, %c0_i32_0 : i32, i32
  }
  func.func @transform_6(%arg0: i32, %arg1: i32) -> (i32, i32) {
    %c0_i32 = arith.constant 0 : i32
    %c0_i32_0 = arith.constant 0 : i32
    %c0_i32_1 = arith.constant 0 : i32
    return %c0_i32, %c0_i32_0 : i32, i32
  }
  func.func @transform_7(%arg0: i32, %arg1: i32) -> (i32, i32) {
    %c0_i32 = arith.constant 0 : i32
    %c0_i32_0 = arith.constant 0 : i32
    %c0_i32_1 = arith.constant 0 : i32
    return %c0_i32, %c0_i32_0 : i32, i32
  }
  func.func @transform_8(%arg0: i32, %arg1: i32) -> (i32, i32) {
    %c0_i32 = arith.constant 0 : i32
    %c0_i32_0 = arith.constant 0 : i32
    %c0_i32_1 = arith.constant 0 : i32
    return %c0_i32, %c0_i32_0 : i32, i32
  }
  func.func @transform_9(%arg0: i32, %arg1: i32) -> (i32, i32) {
    %c0_i32 = arith.constant 0 : i32
    %c0_i32_0 = arith.constant 0 : i32
    %c0_i32_1 = arith.constant 0 : i32
    return %c0_i32, %c0_i32_0 : i32, i32
  }
  func.func @transform_10(%arg0: i32, %arg1: i32) -> (i32, i32, i32) {
    %c0_i32 = arith.constant 0 : i32
    %c0_i32_0 = arith.constant 0 : i32
    return %arg0, %arg1, %c0_i32 : i32, i32, i32
  }
}

</mosaic_0001>

<bundles_post_ra>
// kernel: decoder_forward.6
= control target key start
LH: loop header
LB: loop body
LE: loop exit
PB: predicated region body
PF: predicated region fallthrough
CT: control target
= control target key end

     0   :  { %7 = vsyncpa [#allocation3], 0  ;;  %s743_s0 = inlined_call_operand.hbm [shape: f32[2,2,2,32], index: 0, kind: input, shape index: {}]   ;;  %s744_s1 = inlined_call_operand.hbm [shape: bf16[32,64], index: 1, kind: input, shape index: {}]   ;;  %s745_s2 = inlined_call_operand.vmem [shape: bf16[2,2,2,2,32], index: 2, kind: output, shape index: {}]  }
   0x1   :  { %9 = vsyncpa [#allocation3 + $0x1], 0 }
   0x2   :  { %10 = vsyncpa [#allocation5], 0  ;;  %s626_s9 = smov 0   ;;  %s628_s10 = smov 0  }
   0x3   :  { %s630_s11 = smov 0   ;;  %s632_s12 = smov 0  }
   0x4   :  { %s634_s13 = smov 0   ;;  %s636_s14 = smov 0  }
   0x5 LB: > { %s390_s15 = sadd.s32 4294967295, %s603_s14   ;;  %p50_p0 = scmp.ne.s32.totalorder %s587_s10, %s583_s9  ;;  %s603_s14 = sphi %s636_s14, %s16_s14   ;;  %s599_s13 = sphi %s634_s13, %s754_s13   ;;  %s595_s12 = sphi %s632_s12, %s753_s12   ;;  %s591_s11 = sphi %s630_s11, %s752_s11   ;;  %s587_s10 = sphi %s628_s10, %s751_s10   ;;  %s583_s9 = sphi %s626_s9, %s750_s9  }
   0x6   : > { %p656_p1 = scmp.eq.s32.totalorder %s390_s15, 0  ;;  %p392_p2 = scmp.ge.s32.totalorder %s603_s14, 1 }
   0x7   : > { %p110_p3 = scmp.lt.s32.totalorder %s603_s14, 3  ;;  %s121_s20 = sshll.u32 %s744_s1, 4  ;;  %s122_s20 = int_to_ptr.hbm [resolvable:$true] %s121_s20 }
   0x8   : > { %p664_p4 = por %p656_p1, %p50_p0  ;;  %s605_s22 = smov [#allocation4]  }
   0x9   : > { %p671_p5 = pnand %p392_p2, %p110_p3  ;;  %s123_s23 = sshll.u32 %s605_s22, 4  ;;  %s124_s23 = int_to_ptr.vmem [resolvable:$true] %s123_s23 }
   0xa   : > { %s606_s24 = smov 64   ;;  %s607_s25 = smov 4  }
   0xb   : > { %p424_p6 = pneg %p671_p5  ;;  %s28_s26 = sadd.s32 1, %s599_s13 }
   0xc   : > { %p30_p8 = scmp.ge.s32.totalorder %s28_s26, 2  ;;  %s37_s27 = sadd.s32 1, %s591_s11 }
   0xd   : > { %p425_p7 = pnand %p424_p6, %p656_p1  ;;  %p44_p9 = scmp.ne.s32.totalorder %s591_s11, %s587_s10 }
   0xe   : > { %p45_p10 = scmp.eq.s32.totalorder %s603_s14, 0  ;;  %s756_s26 = smov (%p30_p8, %s28_s26), 0 }
   0xf   : > { %427 = dma.hbm_to_vmem [thread:$0]  (!%p425_p7), %s122_s20, 256, %s124_s23, [#allocation5], %s606_s24, %s606_s24, %s607_s25  }
  0x10   : > { %p686_p11 = por %p45_p10, %p44_p9  ;;  %p433_p12 = scmp.lt.s32.totalorder %s603_s14, 2 }
  0x11   : > { %s32_s29 = ssub.s32 %s599_s13, %s756_s26  ;;  %s137_s30 = sand.u32 1, %s591_s11  }
  0x12   : > { %p35_p13 = scmp.eq.s32.totalorder %s32_s29, 0  ;;  %s395_s3 = sshll.u32 %s137_s30, 2 }
  0x13   : > { %s415_s4 = sshll.u32 %s599_s13, 2  ;;  %s141_s15 = scalar_lea.vmem [#allocation2], %s395_s3 }
  0x14   : > { %s696_s5 = scalar_select %p35_p13, %s591_s11, %s37_s27  }
  0x15   : > { %s148_s8 = scalar_lea.hbm %s743_s0, %s415_s4  ;;  %s151_s18 = sshll.u32 %s141_s15, 4  ;;  %s152_s18 = int_to_ptr.vmem [resolvable:$true] %s151_s18 }
  0x16   : > { %s149_s9 = sshll.u32 %s148_s8, 4  ;;  %p429_p0 = pnand %p433_p12, %p686_p11  ;;  %s150_s9 = int_to_ptr.hbm [resolvable:$true] %s149_s9 }
  0x17   : > { %s138_s19 = scalar_lea.sflag [#allocation3], %s137_s30  ;;  %s608_s20 = smov 32  }
  0x18   : > { %s609_s22 = smov 2   ;;  %163 = sbr.rel (%p671_p5) target bundleno = 299 (0x12b), region = 28 }
  0x19   : > { %431 = dma.hbm_to_vmem [thread:$0]  (!%p429_p0), %s150_s9, 64, %s152_s18, %s138_s19, %s608_s20, %s608_s20, %s609_s22  }
  0x1a   : > { %s165_s23 = sand.u32 (!%p671_p5), 1, %s587_s10  }
  0x1b   : > { %s399_s24 = sshll.u32 (!%p671_p5), %s165_s23, 2  ;;  %s166_s25 = scalar_lea.sflag (!%p671_p5), [#allocation3], %s165_s23 }
  0x1c   : > { %s169_s27 = scalar_lea.vmem (!%p671_p5), [#allocation2], %s399_s24 }
  0x1d   : > { %574 = dma.done.wait (%p664_p4), %s166_s25, 64  }
  0x1e   : > { %576 = vsyncadd (%p664_p4), %s166_s25, 4294967232 }
  0x1f   : > { %578 = dma.done.wait (%p656_p1), [#allocation5], 256  }
  0x20   : > { %580 = vsyncadd (%p656_p1), [#allocation5], 4294967040  ;;  %v417_v0 = vld [vmem:[#allocation4 + $0x8] sm:$0xff]  ;;  %v212_v1 = vld [vmem:[%s169_s27] sm:$0x3]  ;;  %vm238_vm0 = vcmask 261120  }
  0x21   : > { %v213_v2 = vld [vmem:[%s169_s27 + $0x2] sm:$0x3]  ;;  %216 = vst [vmem:[#allocation1] ss:$4 sm:$0xff] %v212_v1  ;;  %248 = vmatpush.bf16.msra.mxu0 %v417_v0  ;;  %v416_v3 = vld [vmem:[#allocation4] sm:$0xff]  ;;  %p202_p2 = scmp.lt.s32.totalorder %s595_s12, 1 }
  0x22   : > { %218 = vst [vmem:[#allocation1 + $0x1] ss:$4 sm:$0xff] %v213_v2  ;;  %vm260_vm1 = vcmask 253952   ;;  %vm267_vm2 = vcmask 1040384   ;;  %s610_s29 = smov 96  }
  0x23   : > { %s758_s12 = smov (!%p202_p2, %s595_s12), 1 }
  0x24   : > { %s401_s17 = sshll.u32 %s758_s12, 2 }
  0x25   : > { %249 = vmatpush.bf16.msra.mxu0 %v416_v3  ;;  %s209_s28 = scalar_lea.vmem %s745_s2, %s401_s17 }
  0x29   : > { %v219_v4 = vld.sshfl [vmem:[#allocation1] sm:$0xff pattern:$0x73625140] }
  0x2a   : > { %v221_v5 = vpack.c.bf16 %v219_v4, %v219_v4 }
  0x2c   : > { %410 = vmatmul.msk.bf16.vlgmr.msra.gmra.mxu0 %vm238_vm0, %v221_v5 }
  0xa9   : > { %v251_v6 = vpop.f32.mrf.mxu0 }
  0xaa   : > { %v256_v7 = vrot.slane %v251_v6, 2  ;;  %v258_v8 = vpack.c.bf16 %v251_v6, %v251_v6 }
  0xac   : > { %v259_v9 = vpack.c.bf16 %v256_v7, %v256_v7  ;;  %v265_v10 = vrot.slane %v258_v8, 3  ;;  %261 = vst.msk [vmem:[%s209_s28] sm:$0x1] %vm260_vm1, %v258_v8 }
  0xae   : > { %v270_v11 = vsel %vm267_vm2, %v258_v8, %v265_v10  ;;  %262 = vst.msk [vmem:[%s209_s28 + $0x2] sm:$0x1] %vm260_vm1, %v259_v9  ;;  %v266_v13 = vrot.slane %v259_v9, 3 }
  0xaf   : > { %276 = vrot.lane.b32.xlu0 %v270_v11, %s610_s29 }
  0xb0   : > { %v274_v14 = vsel %vm267_vm2, %v259_v9, %v266_v13 }
  0xb1   : > { %v253_v12 = vpop.f32.mrf.mxu0 }
  0xb7   : > { %278 = vrot.lane.b32.xlu0 %v274_v14, %s610_s29 }
 0x121   : > { %v277_v15 = vpop.permute.xlu0 %276 }
 0x122   : > { %411 = vst.msk [vmem:[%s209_s28 + $0x1] sm:$0x1] %vm260_vm1, %v277_v15 }
 0x129   : > { %v279_v16 = vpop.permute.xlu0 %278 }
 0x12a   : > { %412 = vst.msk [vmem:[%s209_s28 + $0x3] sm:$0x1] %vm260_vm1, %v279_v16 }
 0x12b PF: > { %s16_s14 = sadd.s32 1, %s603_s14   ;;  %s750_s9 = smov %s587_s10 }
 0x12c   : > { %p13_p1 = scmp.ge.s32.totalorder %s16_s14, 4   ;;  %s751_s10 = smov %s591_s11 }
 0x12d   : > { %s752_s11 = smov %s696_s5  ;;  %s753_s12 = smov %s599_s13 }
 0x12e   : > { %s754_s13 = smov %s756_s26  ;;  %15 = sbr.rel (!%p13_p1) target bundleno = 5 (0x5), region = 74 }
 0x133   :  { %315 = vsyncpa [#allocation3], 1 }
 0x134   :  { %317 = vsyncpa [#allocation3 + $0x1], 1 }
 0x135   :  { %318 = vsyncpa [#allocation5], 1 }

// kernel: decoder_forward.8
= control target key start
LH: loop header
LB: loop body
LE: loop exit
PB: predicated region body
PF: predicated region fallthrough
CT: control target
= control target key end

     0   :  { %s465_s9 = smov 0   ;;  %s467_s10 = smov 0   ;;  %s523_s0 = inlined_call_operand.vmem [shape: bf16[2,4,4,16], index: 0, kind: input, shape index: {}]   ;;  %s524_s1 = inlined_call_operand.vmem [shape: bf16[16,32], index: 1, kind: input, shape index: {}]   ;;  %s525_s2 = inlined_call_operand.vmem [shape: bf16[2,4,2,4,16], index: 2, kind: output, shape index: {}]  }
   0x1   :  { %s469_s11 = smov 0  }
   0x2 LB: > { %s24_s12 = sadd.s32 1, %s443_s10  ;;  %p381_p0 = scmp.ge.s32.totalorder %s447_s11, 1  ;;  %s447_s11 = sphi %s469_s11, %s12_s11   ;;  %s443_s10 = sphi %s467_s10, %s527_s10   ;;  %s439_s9 = sphi %s465_s9, %s526_s9  }
   0x3   : > { %p26_p1 = scmp.ge.s32.totalorder %s24_s12, 2  ;;  %p133_p2 = scmp.lt.s32.totalorder %s447_s11, 3 }
   0x5   : > { %s529_s12 = smov (%p26_p1, %s24_s12), 0  ;;  %p134_p3 = pnand %p381_p0, %p133_p2 }
   0x6   : > { %p165_p4 = scmp.lt.s32.totalorder (!%p134_p3), %s439_s9, 1  ;;  %s449_s23 = smov (!%p134_p3), 112  }
   0x7   : > { %137 = sbr.rel (%p134_p3) target bundleno = 290 (0x122), region = 28 }
   0xc   : > { %v399_v0 = vld [vmem:[%s524_s1] sm:$0xff]  ;;  %s531_s9 = smov (!%p165_p4, %s439_s9), 1  ;;  %vm210_vm0 = vcmask 130048   ;;  %vm237_vm1 = vcmask 123904   ;;  %vm250_vm2 = vcmask 1041408  }
   0xd   : > { %220 = vmatpush.bf16.msra.mxu0 %v399_v0  ;;  %s397_s15 = sshll.u32 %s531_s9, 3  ;;  %s398_s19 = sshll.u32 %s531_s9, 4 }
   0xe   : > { %s172_s18 = scalar_lea.vmem %s523_s0, %s397_s15  ;;  %s492_s22 = scalar_lea.vmem %s525_s2, %s398_s19 }
   0xf   : > { %v186_v1 = vld [vmem:[%s172_s18] sm:$0x3]  ;;  %v187_v2 = vld [vmem:[%s172_s18 + $0x2] sm:$0x3]  ;;  %v188_v3 = vld [vmem:[%s172_s18 + $0x4] sm:$0x3] }
  0x10   : > { %v189_v4 = vld [vmem:[%s172_s18 + $0x6] sm:$0x3]  ;;  %193 = vst [vmem:[#allocation1] ss:$4 sm:$0xff] %v186_v1 }
  0x11   : > { %196 = vst [vmem:[#allocation1 + $0x1] ss:$4 sm:$0xff] %v187_v2 }
  0x12   : > { %199 = vst [vmem:[#allocation1 + $0x2] ss:$4 sm:$0xff] %v188_v3 }
  0x13   : > { %202 = vst [vmem:[#allocation1 + $0x3] ss:$4 sm:$0xff] %v189_v4 }
  0x1a   : > { %v203_v5 = vld.sshfl [vmem:[#allocation1] sm:$0xff pattern:$0x73625140] }
  0x1b   : > { %390 = vmatmul.msk.bf16.vlgmr.msra.gmra.mxu0 %vm210_vm0, %v203_v5 }
  0x98   : > { %v222_v6 = vpop.f32.mrf.mxu0 }
  0x99   : > { %v229_v7 = vrot.slane %v222_v6, 4  ;;  %v233_v8 = vpack.c.bf16 %v222_v6, %v222_v6 }
  0x9b   : > { %v234_v9 = vpack.c.bf16 %v229_v7, %v229_v7  ;;  %238 = vst.msk [vmem:[%s492_s22] sm:$0x3] %vm237_vm1, %v233_v8  ;;  %v246_v10 = vrot.slane %v233_v8, 2 }
  0x9d   : > { %239 = vst.msk [vmem:[%s492_s22 + $0x4] sm:$0x3] %vm237_vm1, %v234_v9  ;;  %v253_v11 = vsel %vm250_vm2, %v233_v8, %v246_v10  ;;  %v247_v15 = vrot.slane %v234_v9, 2 }
  0x9e   : > { %267 = vrot.lane.b32.xlu0 %v253_v11, %s449_s23 }
  0x9f   : > { %v257_v18 = vsel %vm250_vm2, %v234_v9, %v247_v15 }
  0xa0   : > { %v224_v12 = vpop.f32.mrf.mxu0 }
  0xa1   : > { %v230_v13 = vrot.slane %v224_v12, 4  ;;  %v235_v14 = vpack.c.bf16 %v224_v12, %v224_v12 }
  0xa3   : > { %v236_v16 = vpack.c.bf16 %v230_v13, %v230_v13  ;;  %240 = vst.msk [vmem:[%s492_s22 + $0x8] sm:$0x3] %vm237_vm1, %v235_v14  ;;  %v248_v17 = vrot.slane %v235_v14, 2 }
  0xa5   : > { %241 = vst.msk [vmem:[%s492_s22 + $0xc] sm:$0x3] %vm237_vm1, %v236_v16  ;;  %v261_v19 = vsel %vm250_vm2, %v235_v14, %v248_v17  ;;  %v249_v20 = vrot.slane %v236_v16, 2 }
  0xa6   : > { %269 = vrot.lane.b32.xlu0 %v257_v18, %s449_s23  ;;  %271 = vrot.lane.b32.xlu1 %v261_v19, %s449_s23 }
  0xa7   : > { %v265_v21 = vsel %vm250_vm2, %v236_v16, %v249_v20 }
  0xae   : > { %273 = vrot.lane.b32.xlu1 %v265_v21, %s449_s23 }
 0x110   : > { %v268_v22 = vpop.permute.xlu0 %267 }
 0x111   : > { %391 = vst.msk [vmem:[%s492_s22 + $0x2] sm:$0x3] %vm237_vm1, %v268_v22 }
 0x118   : > { %v270_v23 = vpop.permute.xlu0 %269  ;;  %v272_v24 = vpop.permute.xlu1 %271 }
 0x119   : > { %392 = vst.msk [vmem:[%s492_s22 + $0x6] sm:$0x3] %vm237_vm1, %v270_v23 }
 0x11a   : > { %393 = vst.msk [vmem:[%s492_s22 + $0xa] sm:$0x3] %vm237_vm1, %v272_v24 }
 0x120   : > { %v274_v25 = vpop.permute.xlu1 %273 }
 0x121   : > { %394 = vst.msk [vmem:[%s492_s22 + $0xe] sm:$0x3] %vm237_vm1, %v274_v25 }
 0x122 PF: > { %s12_s11 = sadd.s32 1, %s447_s11   ;;  %s526_s9 = smov %s443_s10 }
 0x123   : > { %p9_p5 = scmp.ge.s32.totalorder %s12_s11, 4   ;;  %s527_s10 = smov %s529_s12 }
 0x125   :  { %11 = sbr.rel (!%p9_p5) target bundleno = 2 (0x2), region = 62 }

// kernel: decoder_forward.10
= control target key start
LH: loop header
LB: loop body
LE: loop exit
PB: predicated region body
PF: predicated region fallthrough
CT: control target
= control target key end

     0   :  { %s525_s9 = smov 0   ;;  %s527_s10 = smov 0   ;;  %s595_s0 = inlined_call_operand.vmem [shape: bf16[2,8,8,8], index: 0, kind: input, shape index: {}]   ;;  %s596_s1 = inlined_call_operand.vmem [shape: bf16[8,16], index: 1, kind: input, shape index: {}]   ;;  %s597_s2 = inlined_call_operand.vmem [shape: bf16[2,8,2,8,8], index: 2, kind: output, shape index: {}]  }
   0x1   :  { %s529_s11 = smov 0  }
   0x2 LB: > { %s24_s12 = sadd.s32 1, %s503_s10  ;;  %p416_p0 = scmp.ge.s32.totalorder %s507_s11, 1  ;;  %s507_s11 = sphi %s529_s11, %s12_s11   ;;  %s503_s10 = sphi %s527_s10, %s599_s10   ;;  %s499_s9 = sphi %s525_s9, %s598_s9  }
   0x3   : > { %p26_p1 = scmp.ge.s32.totalorder %s24_s12, 2  ;;  %p133_p2 = scmp.lt.s32.totalorder %s507_s11, 3 }
   0x5   : > { %s601_s12 = smov (%p26_p1, %s24_s12), 0  ;;  %p134_p3 = pnand %p416_p0, %p133_p2 }
   0x6   : > { %p165_p4 = scmp.lt.s32.totalorder (!%p134_p3), %s499_s9, 1  ;;  %s509_s23 = smov (!%p134_p3), 120  }
   0x7   : > { %137 = sbr.rel (%p134_p3) target bundleno = 278 (0x116), region = 28 }
   0xc   : > { %v194_v0 = vld [vmem:[%s596_s1] sm:$0xf]  ;;  %vm228_vm0 = vcmask 1043456   ;;  %s603_s9 = smov (!%p165_p4, %s499_s9), 1  ;;  %vm215_vm1 = vcmask 64512   ;;  %vm269_vm2 = vcmask 60416  }
   0xd   : > { %v230_v1 = vsel %vm228_vm0, %v194_v0, 0  ;;  %s451_s15 = sshll.u32 %s603_s9, 5  ;;  %s452_s19 = sshll.u32 %s603_s9, 6 }
   0xe   : > { %239 = vmatpush.bf16.msra.mxu0 %v230_v1  ;;  %457 = vmatpush.bf16.msra.mxu1 %v230_v1  ;;  %s172_s18 = scalar_lea.vmem %s595_s0, %s451_s15  ;;  %s552_s22 = scalar_lea.vmem %s597_s2, %s452_s19 }
   0xf   : > { %459 = vmatpush.bf16.msra.mxu3 %v230_v1  ;;  %458 = vmatpush.bf16.msra.mxu2 %v230_v1  ;;  %v453_v2 = vld [vmem:[%s172_s18] sm:$0xff]  ;;  %v454_v3 = vld [vmem:[%s172_s18 + $0x8] sm:$0xff]  ;;  %v456_v4 = vld [vmem:[%s172_s18 + $0x18] sm:$0xff] }
  0x10   : > { %v455_v5 = vld [vmem:[%s172_s18 + $0x10] sm:$0xff] }
  0x11   : > { %437 = vmatmul.msk.bf16.vlgmr.msra.gmra.mxu0 %vm215_vm1, %v453_v2  ;;  %438 = vmatmul.msk.bf16.vlgmr.msra.gmra.mxu1 %vm215_vm1, %v454_v3 }
  0x12   : > { %440 = vmatmul.msk.bf16.vlgmr.msra.gmra.mxu3 %vm215_vm1, %v456_v4  ;;  %439 = vmatmul.msk.bf16.vlgmr.msra.gmra.mxu2 %vm215_vm1, %v455_v5 }
  0x8e   : > { %v241_v6 = vpop.f32.mrf.mxu0  ;;  %v246_v7 = vpop.f32.mrf.mxu1 }
  0x8f   : > { %v261_v8 = vpack.c.bf16 %v241_v6, %v241_v6  ;;  %v263_v9 = vpack.c.bf16 %v246_v7, %v246_v7 }
  0x91   : > { %270 = vst.msk [vmem:[%s552_s22] sm:$0xf] %vm269_vm2, %v261_v8  ;;  %290 = vrot.lane.b32.xlu1 %v263_v9, %s509_s23  ;;  %286 = vrot.lane.b32.xlu0 %v261_v8, %s509_s23 }
  0x92   : > { %272 = vst.msk [vmem:[%s552_s22 + $0x10] sm:$0xf] %vm269_vm2, %v263_v9 }
  0x95   : > { %v256_v10 = vpop.f32.mrf.mxu3  ;;  %v251_v11 = vpop.f32.mrf.mxu2 }
  0x96   : > { %v267_v12 = vpack.c.bf16 %v256_v10, %v256_v10  ;;  %v243_v13 = vpop.f32.mrf.mxu0  ;;  %v248_v14 = vpop.f32.mrf.mxu1  ;;  %v265_v15 = vpack.c.bf16 %v251_v11, %v251_v11 }
  0x97   : > { %v262_v16 = vpack.c.bf16 %v243_v13, %v243_v13  ;;  %v264_v17 = vpack.c.bf16 %v248_v14, %v248_v14 }
  0x98   : > { %276 = vst.msk [vmem:[%s552_s22 + $0x30] sm:$0xf] %vm269_vm2, %v267_v12  ;;  %294 = vrot.lane.b32.xlu2 %v265_v15, %s509_s23 }
  0x99   : > { %271 = vst.msk [vmem:[%s552_s22 + $0x8] sm:$0xf] %vm269_vm2, %v262_v16  ;;  %292 = vrot.lane.b32.xlu1 %v264_v17, %s509_s23  ;;  %288 = vrot.lane.b32.xlu0 %v262_v16, %s509_s23 }
  0x9a   : > { %273 = vst.msk [vmem:[%s552_s22 + $0x18] sm:$0xf] %vm269_vm2, %v264_v17 }
  0x9b   : > { %274 = vst.msk [vmem:[%s552_s22 + $0x20] sm:$0xf] %vm269_vm2, %v265_v15 }
  0x9d   : > { %v258_v18 = vpop.f32.mrf.mxu3  ;;  %v253_v19 = vpop.f32.mrf.mxu2 }
  0x9e   : > { %v268_v20 = vpack.c.bf16 %v258_v18, %v258_v18  ;;  %v266_v21 = vpack.c.bf16 %v253_v19, %v253_v19 }
  0xa0   : > { %277 = vst.msk [vmem:[%s552_s22 + $0x38] sm:$0xf] %vm269_vm2, %v268_v20  ;;  %296 = vrot.lane.b32.xlu2 %v266_v21, %s509_s23 }
  0xa1   : > { %300 = vrot.lane.b32.xlu1 %v268_v20, %s509_s23  ;;  %298 = vrot.lane.b32.xlu0 %v267_v12, %s509_s23  ;;  %275 = vst.msk [vmem:[%s552_s22 + $0x28] sm:$0xf] %vm269_vm2, %v266_v21 }
  0xf2   : > { %v295_v22 = vpop.permute.xlu2 %294 }
  0xf3   : > { %445 = vst.msk [vmem:[%s552_s22 + $0x24] sm:$0xf] %vm269_vm2, %v295_v22 }
  0xfa   : > { %v297_v23 = vpop.permute.xlu2 %296 }
  0xfb   : > { %446 = vst.msk [vmem:[%s552_s22 + $0x2c] sm:$0xf] %vm269_vm2, %v297_v23 }
 0x103   : > { %v291_v24 = vpop.permute.xlu1 %290  ;;  %v287_v25 = vpop.permute.xlu0 %286 }
 0x104   : > { %443 = vst.msk [vmem:[%s552_s22 + $0x14] sm:$0xf] %vm269_vm2, %v291_v24 }
 0x105   : > { %441 = vst.msk [vmem:[%s552_s22 + $0x4] sm:$0xf] %vm269_vm2, %v287_v25 }
 0x10b   : > { %v293_v26 = vpop.permute.xlu1 %292  ;;  %v289_v27 = vpop.permute.xlu0 %288 }
 0x10c   : > { %444 = vst.msk [vmem:[%s552_s22 + $0x1c] sm:$0xf] %vm269_vm2, %v293_v26 }
 0x10d   : > { %442 = vst.msk [vmem:[%s552_s22 + $0xc] sm:$0xf] %vm269_vm2, %v289_v27 }
 0x113   : > { %v301_v28 = vpop.permute.xlu1 %300  ;;  %v299_v29 = vpop.permute.xlu0 %298 }
 0x114   : > { %448 = vst.msk [vmem:[%s552_s22 + $0x3c] sm:$0xf] %vm269_vm2, %v301_v28 }
 0x115   : > { %447 = vst.msk [vmem:[%s552_s22 + $0x34] sm:$0xf] %vm269_vm2, %v299_v29 }
 0x116 PF: > { %s12_s11 = sadd.s32 1, %s507_s11   ;;  %s598_s9 = smov %s503_s10 }
 0x117   : > { %p9_p5 = scmp.ge.s32.totalorder %s12_s11, 4   ;;  %s599_s10 = smov %s601_s12 }
 0x119   :  { %11 = sbr.rel (!%p9_p5) target bundleno = 2 (0x2), region = 59 }

// kernel: decoder_forward.7
= control target key start
LH: loop header
LB: loop body
LE: loop exit
PB: predicated region body
PF: predicated region fallthrough
CT: control target
= control target key end

     0   :  { %s1052_s13 = smov 0   ;;  %s1054_s14 = smov 0   ;;  %s1152_s0 = inlined_call_operand.vmem [shape: bf16[2,16,16], index: 0, kind: input, shape index: {}]   ;;  %s1153_s1 = inlined_call_operand.vmem [shape: bf16[2,16,16], index: 1, kind: input, shape index: {}]   ;;  %s1154_s2 = inlined_call_operand.vmem [shape: bf16[2,8,16], index: 2, kind: input, shape index: {}]   ;;  %s1155_s3 = inlined_call_operand.vmem [shape: bf16[2,8,16], index: 3, kind: input, shape index: {}]   ;;  %s1156_s4 = inlined_call_operand.vmem [shape: f32[8,16], index: 4, kind: input, shape index: {}]   ;;  %s1157_s5 = inlined_call_operand.vmem [shape: bf16[16,16], index: 5, kind: input, shape index: {}]   ;;  %s1158_s6 = inlined_call_operand.vmem [shape: bf16[16,16], index: 6, kind: input, shape index: {}]   ;;  %s1159_s7 = inlined_call_operand.vmem [shape: bf16[16,16], index: 7, kind: input, shape index: {}]   ;;  %s1160_s8 = inlined_call_operand.vmem [shape: bf16[16,16], index: 8, kind: input, shape index: {}]   ;;  %s1161_s9 = inlined_call_operand.vmem [shape: f32[1,8], index: 9, kind: input, shape index: {}]   ;;  %s1162_s10 = inlined_call_operand.vmem [shape: bf16[2,16,16], index: 10, kind: output, shape index: {}]  }
   0x1   :  { %s1056_s15 = smov 0  }
   0x2 LB: > { %s32_s16 = sadd.s32 1, %s990_s14  ;;  %p874_p0 = scmp.ge.s32.totalorder %s994_s15, 1  ;;  %s994_s15 = sphi %s1056_s15, %s20_s15   ;;  %s990_s14 = sphi %s1054_s14, %s1164_s14   ;;  %s986_s13 = sphi %s1052_s13, %s1163_s13  }
   0x3   : > { %p34_p1 = scmp.ge.s32.totalorder %s32_s16, 2  ;;  %p368_p2 = scmp.lt.s32.totalorder %s994_s15, 3 }
   0x5   : > { %s1166_s16 = smov (%p34_p1, %s32_s16), 0  ;;  %p369_p3 = pnand %p874_p0, %p368_p2 }
   0x6   : > { %p432_p4 = scmp.lt.s32.totalorder (!%p369_p3), %s986_s13, 1 }
   0x7   : > { %372 = sbr.rel (%p369_p3) target bundleno = 1257 (0x4e9), region = 60 }
   0xc   : > { %s1168_s13 = smov (!%p432_p4, %s986_s13), 1  ;;  %vm479_vm0 = vcmask 130048   ;;  %v996_v5 = vmov 16.0   ;;  %v916_v22 = vld [vmem:[%s1158_s6] sm:$0xff]  ;;  %vm651_vm8 = vcmask 64512   ;;  %vm691_vm9 = vcmask 1043456  }
   0xd   : > { %s1073_s17 = sshll.u32 %s1168_s13, 3  ;;  %954 = vrcp.f32 %v996_v5  ;;  %565 = vmatpush.bf16.msra.mxu0 %v916_v22  ;;  %v914_v24 = vld [vmem:[%s1157_s5] sm:$0xff]  ;;  %s879_s21 = sshll.u32 %s1168_s13, 2  ;;  %vm738_vm10 = vcmask 125952  }
   0xe   : > { %s439_s20 = scalar_lea.vmem %s1152_s0, %s1073_s17  ;;  %s449_s25 = scalar_lea.vmem %s1153_s1, %s1073_s17  ;;  %588 = vmatpush.bf16.msra.mxu1 %v914_v24  ;;  %v948_v44 = vld [vmem:[%s1156_s4] ss:$0 sm:$0xff]  ;;  %v949_v49 = vld [vmem:[%s1156_s4 + $0x1] ss:$0 sm:$0xff]  ;;  %v950_v58 = vld [vmem:[%s1156_s4 + $0x2] ss:$0 sm:$0xff] }
   0xf   : > { %v920_v0 = vld [vmem:[%s439_s20] sm:$0xff]   ;;  %s454_s24 = scalar_lea.vmem %s1154_s2, %s879_s21  ;;  %s458_s11 = scalar_lea.vmem %s1155_s3, %s879_s21 }
  0x10   : > { %v921_v1 = vunpack.c.l.bf16 %v920_v0  ;;  %v922_v3 = vunpack.c.h.bf16 %v920_v0  ;;  %v915_v23 = vld [vmem:[%s449_s25] sm:$0xff]  ;;  %s467_s22 = scalar_lea.vmem %s1162_s10, %s1073_s17 }
  0x11   : > { %891 = vmatmul.msk.bf16.vlgmr.msra.gmra.mxu0 %vm479_vm0, %v915_v23  ;;  %v917_v54 = vld [vmem:[%s1159_s7] sm:$0xff] }
  0x12   : > { %v480_v2 = vsel %vm479_vm0, %v921_v1, 0.0  ;;  %v483_v4 = vsel %vm479_vm0, %v922_v3, 0.0  ;;  %618 = vmatpush.bf16.msra.mxu2 %v917_v54 }
  0x13   : > { %481 = vadd.xlane.f32.xlu0 %v480_v2  ;;  %v955_v6 = vpop.eup %954 }
  0x14   : > { %v487_v7 = vmul.f32 16.0, %v955_v6  ;;  %vm491_vm1 = vweird.f32 %v955_v6 }
  0x16   : > { %v488_v8 = vsub.f32 1.0, %v487_v7 }
  0x18   : > { %v489_v9 = vmul.f32 %v955_v6, %v488_v8 }
  0x1a   : > { %v490_v10 = vadd.f32 %v955_v6, %v489_v9  ;;  %v952_v9 = vld [vmem:[%s1161_s9] ss:$0 sm:$0xff] }
  0x1b   : > { %484 = vadd.xlane.f32.xlu0 %v483_v4  ;;  %v951_v4 = vld [vmem:[%s1156_s4 + $0x3] ss:$0 sm:$0xff] }
  0x1c   : > { %v492_v11 = vsel %vm491_vm1, %v955_v6, %v490_v10 }
  0x86   : > { %v482_v12 = vpop.xlane.xlu0 %481 }
  0x87   : > { %v493_v13 = vmul.f32 %v492_v11, %v482_v12 }
  0x89   : > { %v495_v14 = vsub.f32 %v921_v1, %v493_v13  ;;  %v626_v1 = vld [vmem:[%s454_s24] sm:$0xf] }
  0x8a   : > { %v635_v2 = vsel %vm479_vm0, %v626_v1, 0 }
  0x8b   : > { %v497_v15 = vmul.f32 %v495_v14, %v495_v14  ;;  %644 = vmatpush.bf16.xpose.msra.mxu3 %v635_v2 }
  0x8d   : > { %v499_v16 = vsel %vm479_vm0, %v497_v15, 0.0 }
  0x8e   : > { %500 = vadd.xlane.f32.xlu1 %v499_v16  ;;  %v485_v17 = vpop.xlane.xlu0 %484  ;;  %v567_v55 = vpop.f32.mrf.mxu0 }
  0x8f   : > { %v494_v18 = vmul.f32 %v492_v11, %v485_v17 }
  0x91   : > { %v496_v19 = vsub.f32 %v922_v3, %v494_v18 }
  0x93   : > { %v498_v20 = vmul.f32 %v496_v19, %v496_v19 }
  0x95   : > { %v502_v21 = vsel %vm479_vm0, %v498_v20, 0.0 }
  0x96   : > { %503 = vadd.xlane.f32.xlu1 %v502_v21  ;;  %v569_v59 = vpop.f32.mrf.mxu0 }
 0x101   : > { %v501_v25 = vpop.xlane.xlu1 %500 }
 0x102   : > { %v505_v26 = vmul.f32 %v501_v25, %v492_v11 }
 0x104   : > { %v507_v27 = vadd.f32 1e-05, %v505_v26 }
 0x106   : > { %956 = vrsqrt.f32 %v507_v27  ;;  %vm515_vm3 = vweird.f32 %v507_v27 }
 0x109   : > { %v504_v28 = vpop.xlane.xlu1 %503 }
 0x10a   : > { %v506_v29 = vmul.f32 %v504_v28, %v492_v11  ;;  %v687_v28 = vld [vmem:[%s458_s11] sm:$0xf] }
 0x10c   : > { %v957_v30 = vpop.eup %956  ;;  %v508_v31 = vadd.f32 1e-05, %v506_v29  ;;  %v693_v29 = vsel %vm691_vm9, %v687_v28, 0 }
 0x10d   : > { %v510_v32 = vmul.f32 %v957_v30, %v507_v27  ;;  %vm516_vm2 = vweird.f32 %v957_v30  ;;  %702 = vmatpush.bf16.msrb.mxu0 %v693_v29 }
 0x10e   : > { %958 = vrsqrt.f32 %v508_v31  ;;  %vm517_vm4 = vmor %vm515_vm3, %vm516_vm2  ;;  %vm525_vm6 = vweird.f32 %v508_v31 }
 0x10f   : > { %v511_v33 = vmul.f32 %v957_v30, %v510_v32 }
 0x111   : > { %v512_v34 = vmul.f32 0.5, %v511_v33  ;;  %v918_v33 = vld [vmem:[%s1160_s8] sm:$0xff] }
 0x112   : > { %729 = vmatpush.bf16.msrb.mxu1 %v918_v33 }
 0x113   : > { %v513_v35 = vsub.f32 1.5, %v512_v34 }
 0x114   : > { %v959_v36 = vpop.eup %958 }
 0x115   : > { %v514_v37 = vmul.f32 %v957_v30, %v513_v35  ;;  %v520_v38 = vmul.f32 %v959_v36, %v508_v31  ;;  %vm526_vm5 = vweird.f32 %v959_v36 }
 0x116   : > { %vm527_vm7 = vmor %vm525_vm6, %vm526_vm5 }
 0x117   : > { %v521_v39 = vmul.f32 %v959_v36, %v520_v38  ;;  %v518_v40 = vsel %vm517_vm4, %v957_v30, %v514_v37 }
 0x118   : > { %v529_v43 = vmul.f32 %v518_v40, %v495_v14 }
 0x119   : > { %v522_v41 = vmul.f32 0.5, %v521_v39 }
 0x11a   : > { %v532_v48 = vmul.f32 %v948_v44, %v529_v43 }
 0x11b   : > { %v523_v42 = vsub.f32 1.5, %v522_v41 }
 0x11c   : > { %v535_v51 = vadd.f32 %v949_v49, %v532_v48 }
 0x11d   : > { %v524_v45 = vmul.f32 %v959_v36, %v523_v42 }
 0x11f   : > { %v528_v46 = vsel %vm527_vm7, %v959_v36, %v524_v45 }
 0x120   : > { %v530_v47 = vmul.f32 %v528_v46, %v496_v19 }
 0x122   : > { %v533_v50 = vmul.f32 %v948_v44, %v530_v47 }
 0x124   : > { %v536_v52 = vadd.f32 %v949_v49, %v533_v50 }
 0x126   : > { %v537_v53 = vpack.c.bf16 %v536_v52, %v535_v51  ;;  %v953_v51 = vld [vmem:[%s1156_s4 + $0x4] ss:$0 sm:$0xff] }
 0x128   : > { %896 = vmatmul.msk.bf16.vlgmr.msra.gmra.mxu1 %vm479_vm0, %v537_v53 }
 0x1a5   : > { %v590_v56 = vpop.f32.mrf.mxu1 }
 0x1a6   : > { %v591_v57 = vadd.f32 %v590_v56, %v567_v55 }
 0x1a8   : > { %v596_v62 = vadd.f32 %v950_v58, %v591_v57 }
 0x1ad   : > { %v592_v60 = vpop.f32.mrf.mxu1 }
 0x1ae   : > { %v593_v61 = vadd.f32 %v592_v60, %v569_v59 }
 0x1b0   : > { %v597_v63 = vadd.f32 %v950_v58, %v593_v61 }
 0x1b2   : > { %v598_v0 = vpack.c.bf16 %v597_v63, %v596_v62 }
 0x1b4   : > { %901 = vmatmul.msk.bf16.vlgmr.msra.gmra.mxu2 %vm479_vm0, %v598_v0 }
 0x237   : > { %v620_v3 = vpop.f32.mrf.mxu2 }
 0x238   : > { %v621_v6 = vadd.f32 %v951_v4, %v620_v3 }
 0x23f   : > { %v622_v5 = vpop.f32.mrf.mxu2 }
 0x240   : > { %v623_v7 = vadd.f32 %v951_v4, %v622_v5 }
 0x242   : > { %v625_v8 = vpack.c.bf16 %v623_v7, %v621_v6 }
 0x244   : > { %902 = vmatmul.msk.bf16.vlgmr.msra.gmra.mxu3 %vm479_vm0, %v625_v8 }
 0x2c7   : > { %v646_v10 = vpop.f32.mrf.mxu3 }
 0x2c8   : > { %v647_v11 = vadd.f32 %v952_v9, %v646_v10 }
 0x2ca   : > { %v652_v12 = vsel %vm651_vm8, %v647_v11, -inf }
 0x2cb   : > { %653 = vmax.xlane.f32.xlu2 %v652_v12 }
 0x2cf   : > { %v648_v13 = vpop.f32.mrf.mxu3 }
 0x2d0   : > { %v649_v14 = vadd.f32 %v952_v9, %v648_v13 }
 0x2d2   : > { %v655_v15 = vsel %vm651_vm8, %v649_v14, -inf }
 0x2d3   : > { %656 = vmax.xlane.f32.xlu2 %v655_v15 }
 0x33e   : > { %v654_v16 = vpop.xlane.xlu2 %653 }
 0x33f   : > { %v658_v17 = vmax.f32 %v654_v16, 0.0 }
 0x341   : > { %v660_v18 = vsub.f32 %v647_v11, %v658_v17  ;;  %v672_v30 = vsub.f32 0.0, %v658_v17 }
 0x343   : > { %v662_v19 = vmul.f32 1.442695, %v660_v18  ;;  %v674_v31 = vmul.f32 1.442695, %v672_v30 }
 0x345   : > { %960 = vpow2.f32 %v662_v19 }
 0x346   : > { %v657_v20 = vpop.xlane.xlu2 %656 }
 0x347   : > { %v659_v21 = vmax.f32 %v657_v20, 0.0 }
 0x349   : > { %v661_v22 = vsub.f32 %v649_v14, %v659_v21  ;;  %v673_v32 = vsub.f32 0.0, %v659_v21 }
 0x34b   : > { %v961_v23 = vpop.eup %960  ;;  %v664_v24 = vmul.f32 1.442695, %v661_v22  ;;  %v676_v34 = vmul.f32 1.442695, %v673_v32 }
 0x34c   : > { %v666_v25 = vsel %vm651_vm8, %v961_v23, 0.0 }
 0x34d   : > { %962 = vpow2.f32 %v664_v24  ;;  %667 = vadd.xlane.f32.xlu0 %v666_v25 }
 0x34e   : > { %964 = vpow2.f32 %v674_v31 }
 0x34f   : > { %966 = vpow2.f32 %v676_v34 }
 0x353   : > { %v963_v26 = vpop.eup %962 }
 0x354   : > { %v669_v27 = vsel %vm651_vm8, %v963_v26, 0.0  ;;  %v965_v35 = vpop.eup %964 }
 0x355   : > { %670 = vadd.xlane.f32.xlu1 %v669_v27  ;;  %v678_v37 = vmul.f32 8.0, %v965_v35  ;;  %v967_v38 = vpop.eup %966 }
 0x356   : > { %v679_v40 = vmul.f32 8.0, %v967_v38 }
 0x3c0   : > { %v668_v36 = vpop.xlane.xlu0 %667 }
 0x3c1   : > { %v680_v39 = vadd.f32 %v678_v37, %v668_v36 }
 0x3c3   : > { %968 = vrcp.f32 %v680_v39 }
 0x3c8   : > { %v671_v41 = vpop.xlane.xlu1 %670 }
 0x3c9   : > { %v681_v42 = vadd.f32 %v679_v40, %v671_v41  ;;  %v969_v43 = vpop.eup %968 }
 0x3ca   : > { %v684_v45 = vmul.f32 %v969_v43, %v961_v23 }
 0x3cb   : > { %970 = vrcp.f32 %v681_v42 }
 0x3d1   : > { %v971_v44 = vpop.eup %970 }
 0x3d2   : > { %v685_v46 = vmul.f32 %v971_v44, %v963_v26 }
 0x3d4   : > { %v686_v47 = vpack.c.bf16 %v685_v46, %v684_v45 }
 0x3d6   : > { %903 = vmatmul.msk.bf16.vlgmr.msrb.gmra.mxu0 %vm651_vm8, %v686_v47 }
 0x453   : > { %v704_v48 = vpop.f32.mrf.mxu0 }
 0x45b   : > { %v706_v49 = vpop.f32.mrf.mxu0 }
 0x45c   : > { %v709_v50 = vpack.c.bf16 %v706_v49, %v704_v48 }
 0x45e   : > { %908 = vmatmul.msk.bf16.vlgmr.msrb.gmra.mxu1 %vm479_vm0, %v709_v50 }
 0x4db   : > { %v731_v52 = vpop.f32.mrf.mxu1 }
 0x4dc   : > { %v732_v53 = vadd.f32 %v953_v51, %v731_v52 }
 0x4de   : > { %v736_v54 = vpack.c.bf16 %v732_v53, %v732_v53 }
 0x4e0   : > { %739 = vst.msk [vmem:[%s467_s22] sm:$0xf] %vm738_vm10, %v736_v54 }
 0x4e3   : > { %v733_v55 = vpop.f32.mrf.mxu1 }
 0x4e4   : > { %v734_v56 = vadd.f32 %v953_v51, %v733_v55 }
 0x4e6   : > { %v737_v57 = vpack.c.bf16 %v734_v56, %v734_v56 }
 0x4e8   : > { %740 = vst.msk [vmem:[%s467_s22 + $0x4] sm:$0xf] %vm738_vm10, %v737_v57 }
 0x4e9 PF: > { %s20_s15 = sadd.s32 1, %s994_s15   ;;  %s1163_s13 = smov %s990_s14 }
 0x4ea   : > { %p17_p5 = scmp.ge.s32.totalorder %s20_s15, 4   ;;  %s1164_s14 = smov %s1166_s16 }
 0x4ec   :  { %19 = sbr.rel (!%p17_p5) target bundleno = 2 (0x2), region = 99 }

// kernel: decoder_forward.9
= control target key start
LH: loop header
LB: loop body
LE: loop exit
PB: predicated region body
PF: predicated region fallthrough
CT: control target
= control target key end

     0   :  { %s1569_s13 = smov 0   ;;  %s1571_s14 = smov 0   ;;  %s1970_s0 = inlined_call_operand.vmem [shape: bf16[2,64,8], index: 0, kind: input, shape index: {}]   ;;  %s1971_s1 = inlined_call_operand.vmem [shape: bf16[2,64,8], index: 1, kind: input, shape index: {}]   ;;  %s1972_s2 = inlined_call_operand.vmem [shape: bf16[2,8,8], index: 2, kind: input, shape index: {}]   ;;  %s1973_s3 = inlined_call_operand.vmem [shape: bf16[2,8,8], index: 3, kind: input, shape index: {}]   ;;  %s1974_s4 = inlined_call_operand.vmem [shape: f32[8,8], index: 4, kind: input, shape index: {}]   ;;  %s1975_s5 = inlined_call_operand.vmem [shape: bf16[8,8], index: 5, kind: input, shape index: {}]   ;;  %s1976_s6 = inlined_call_operand.vmem [shape: bf16[8,8], index: 6, kind: input, shape index: {}]   ;;  %s1977_s7 = inlined_call_operand.vmem [shape: bf16[8,8], index: 7, kind: input, shape index: {}]   ;;  %s1978_s8 = inlined_call_operand.vmem [shape: bf16[8,8], index: 8, kind: input, shape index: {}]   ;;  %s1979_s9 = inlined_call_operand.vmem [shape: f32[1,8], index: 9, kind: input, shape index: {}]   ;;  %s1980_s10 = inlined_call_operand.vmem [shape: bf16[2,64,8], index: 10, kind: output, shape index: {}]  }
   0x1   :  { %s1573_s15 = smov 0  }
   0x2 LB: > { %s32_s16 = sadd.s32 1, %s1507_s14  ;;  %p1313_p0 = scmp.ge.s32.totalorder %s1511_s15, 1  ;;  %s1511_s15 = sphi %s1573_s15, %s20_s15   ;;  %s1507_s14 = sphi %s1571_s14, %s1988_s14   ;;  %s1503_s13 = sphi %s1569_s13, %s1987_s13  }
   0x3   : > { %p34_p1 = scmp.ge.s32.totalorder %s32_s16, 2  ;;  %p368_p2 = scmp.lt.s32.totalorder %s1511_s15, 3 }
   0x5   : > { %s1990_s16 = smov (%p34_p1, %s32_s16), 0  ;;  %p369_p3 = pnand %p1313_p0, %p368_p2 }
   0x6   : > { %p432_p4 = scmp.lt.s32.totalorder (!%p369_p3), %s1503_s13, 1 }
   0x7   : > { %372 = sbr.rel (%p369_p3) target bundleno = 1307 (0x51b), region = 60 }
   0xc   : > { %s1992_s13 = smov (!%p432_p4, %s1503_s13), 1  ;;  %vm491_vm0 = vcmask 64512   ;;  %v1513_v20 = vmov 8.0   ;;  %vm739_vm2 = vcmask 1043456  }
   0xd   : > { %s1590_s17 = sshll.u32 %s1992_s13, 5  ;;  %1423 = vrcp.f32 %v1513_v20  ;;  %s1318_s21 = sshll.u32 %s1992_s13, 2 }
   0xe   : > { %s439_s20 = scalar_lea.vmem %s1970_s0, %s1590_s17  ;;  %s1662_s23 = scalar_lea.vmem %s1971_s1, %s1590_s17 }
   0xf   : > { %v1596_v0 = vld [vmem:[%s439_s20 + $0x10] sm:$0xff]   ;;  %v1387_v1 = vld [vmem:[%s439_s20 + $0x8] sm:$0xff]   ;;  %v1372_v2 = vld [vmem:[%s439_s20] sm:$0xff]   ;;  %s454_s24 = scalar_lea.vmem %s1972_s2, %s1318_s21  ;;  %s458_s11 = scalar_lea.vmem %s1973_s3, %s1318_s21 }
  0x10   : > { %v1381_v3 = vunpack.c.l.bf16 %v1596_v0  ;;  %v1377_v4 = vunpack.c.l.bf16 %v1387_v1  ;;  %v1373_v5 = vunpack.c.l.bf16 %v1372_v2  ;;  %v1382_v9 = vunpack.c.h.bf16 %v1596_v0  ;;  %v1389_v15 = vld [vmem:[%s439_s20 + $0x18] sm:$0xff]   ;;  %s1943_s22 = scalar_lea.vmem %s1980_s10, %s1590_s17 }
  0x11   : > { %v1378_v10 = vunpack.c.h.bf16 %v1387_v1  ;;  %v1374_v11 = vunpack.c.h.bf16 %v1372_v2  ;;  %v1386_v16 = vunpack.c.h.bf16 %v1389_v15  ;;  %v1385_v17 = vunpack.c.l.bf16 %v1389_v15 }
  0x12   : > { %v504_v6 = vsel %vm491_vm0, %v1381_v3, 0.0  ;;  %v498_v7 = vsel %vm491_vm0, %v1377_v4, 0.0  ;;  %v492_v8 = vsel %vm491_vm0, %v1373_v5, 0.0  ;;  %v507_v12 = vsel %vm491_vm0, %v1382_v9, 0.0 }
  0x13   : > { %505 = vadd.xlane.f32.xlu2 %v504_v6  ;;  %499 = vadd.xlane.f32.xlu1 %v498_v7  ;;  %v501_v13 = vsel %vm491_vm0, %v1378_v10, 0.0  ;;  %v495_v14 = vsel %vm491_vm0, %v1374_v11, 0.0  ;;  %v513_v18 = vsel %vm491_vm0, %v1386_v16, 0.0  ;;  %v510_v19 = vsel %vm491_vm0, %v1385_v17, 0.0  ;;  %v1424_v21 = vpop.eup %1423  ;;  %v1367_v7 = vld [vmem:[%s1662_s23] sm:$0xff] }
  0x14   : > { %493 = vadd.xlane.f32.xlu0 %v492_v8  ;;  %v517_v22 = vmul.f32 8.0, %v1424_v21  ;;  %vm521_vm1 = vweird.f32 %v1424_v21 }
  0x16   : > { %v518_v23 = vsub.f32 1.0, %v517_v22 }
  0x18   : > { %v519_v24 = vmul.f32 %v1424_v21, %v518_v23 }
  0x1a   : > { %v520_v25 = vadd.f32 %v1424_v21, %v519_v24 }
  0x1b   : > { %508 = vadd.xlane.f32.xlu2 %v507_v12  ;;  %502 = vadd.xlane.f32.xlu1 %v501_v13 }
  0x1c   : > { %496 = vadd.xlane.f32.xlu0 %v495_v14  ;;  %v1608_v26 = vsel %vm521_vm1, %v1424_v21, %v520_v25 }
  0x23   : > { %514 = vadd.xlane.f32.xlu1 %v513_v18 }
  0x24   : > { %511 = vadd.xlane.f32.xlu0 %v510_v19 }
  0x86   : > { %v506_v27 = vpop.xlane.xlu2 %505  ;;  %v500_v28 = vpop.xlane.xlu1 %499 }
  0x87   : > { %v525_v29 = vmul.f32 %v1608_v26, %v500_v28  ;;  %v494_v30 = vpop.xlane.xlu0 %493  ;;  %v527_v43 = vmul.f32 %v1608_v26, %v506_v27 }
  0x88   : > { %v523_v31 = vmul.f32 %v1608_v26, %v494_v30  ;;  %v1368_v30 = vld [vmem:[%s1662_s23 + $0x8] sm:$0xff] }
  0x89   : > { %v1612_v32 = vsub.f32 %v1377_v4, %v525_v29  ;;  %v1636_v50 = vsub.f32 %v1381_v3, %v527_v43  ;;  %v706_v3 = vld [vmem:[%s1976_s6] sm:$0xf] }
  0x8a   : > { %v1614_v33 = vsub.f32 %v1373_v5, %v523_v31  ;;  %v741_v4 = vsel %vm739_vm2, %v706_v3, 0  ;;  %v1369_v31 = vld [vmem:[%s1662_s23 + $0x10] sm:$0xff] }
  0x8b   : > { %v541_v34 = vmul.f32 %v1612_v32, %v1612_v32  ;;  %v543_v59 = vmul.f32 %v1636_v50, %v1636_v50  ;;  %750 = vmatpush.bf16.msra.mxu0 %v741_v4  ;;  %1390 = vmatpush.bf16.msra.mxu2 %v741_v4 }
  0x8c   : > { %v539_v35 = vmul.f32 %v1614_v33, %v1614_v33 }
  0x8d   : > { %v553_v36 = vsel %vm491_vm0, %v541_v34, 0.0  ;;  %v559_v62 = vsel %vm491_vm0, %v543_v59, 0.0 }
  0x8e   : > { %v509_v37 = vpop.xlane.xlu2 %508  ;;  %554 = vadd.xlane.f32.xlu1 %v553_v36  ;;  %v503_v38 = vpop.xlane.xlu1 %502  ;;  %v547_v39 = vsel %vm491_vm0, %v539_v35, 0.0  ;;  %1338 = vmatmul.msk.bf16.vlgmr.msra.gmra.mxu0 %vm491_vm0, %v1367_v7 }
  0x8f   : > { %v528_v40 = vmul.f32 %v1608_v26, %v509_v37  ;;  %v526_v41 = vmul.f32 %v1608_v26, %v503_v38  ;;  %548 = vadd.xlane.f32.xlu2 %v547_v39  ;;  %v497_v42 = vpop.xlane.xlu0 %496  ;;  %1340 = vmatmul.msk.bf16.vlgmr.msra.gmra.mxu2 %vm491_vm0, %v1369_v31 }
  0x90   : > { %v524_v44 = vmul.f32 %v1608_v26, %v497_v42 }
  0x91   : > { %v1626_v45 = vsub.f32 %v1382_v9, %v528_v40  ;;  %v1628_v46 = vsub.f32 %v1378_v10, %v526_v41 }
  0x92   : > { %v1630_v47 = vsub.f32 %v1374_v11, %v524_v44  ;;  %v697_v11 = vld [vmem:[%s1975_s5] sm:$0xf] }
  0x93   : > { %v544_v48 = vmul.f32 %v1626_v45, %v1626_v45  ;;  %v542_v49 = vmul.f32 %v1628_v46, %v1628_v46  ;;  %v785_v12 = vsel %vm739_vm2, %v697_v11, 0 }
  0x94   : > { %v540_v51 = vmul.f32 %v1630_v47, %v1630_v47  ;;  %794 = vmatpush.bf16.msra.mxu1 %v785_v12  ;;  %1391 = vmatpush.bf16.msra.mxu3 %v785_v12 }
  0x95   : > { %v562_v52 = vsel %vm491_vm0, %v544_v48, 0.0  ;;  %v556_v53 = vsel %vm491_vm0, %v542_v49, 0.0 }
  0x96   : > { %563 = vadd.xlane.f32.xlu1 %v562_v52  ;;  %v550_v54 = vsel %vm491_vm0, %v540_v51, 0.0  ;;  %v515_v55 = vpop.xlane.xlu1 %514 }
  0x97   : > { %557 = vadd.xlane.f32.xlu2 %v556_v53  ;;  %551 = vadd.xlane.f32.xlu0 %v550_v54  ;;  %v512_v56 = vpop.xlane.xlu0 %511  ;;  %v530_v58 = vmul.f32 %v1608_v26, %v515_v55 }
  0x98   : > { %v529_v57 = vmul.f32 %v1608_v26, %v512_v56 }
  0x99   : > { %v1649_v61 = vsub.f32 %v1386_v16, %v530_v58 }
  0x9a   : > { %v1647_v60 = vsub.f32 %v1385_v17, %v529_v57 }
  0x9b   : > { %v546_v1 = vmul.f32 %v1649_v61, %v1649_v61 }
  0x9c   : > { %v545_v63 = vmul.f32 %v1647_v60, %v1647_v60 }
  0x9d   : > { %v568_v2 = vsel %vm491_vm0, %v546_v1, 0.0 }
  0x9e   : > { %v565_v0 = vsel %vm491_vm0, %v545_v63, 0.0  ;;  %1339 = vmatmul.msk.bf16.gmra.mxu0 %vm491_vm0, %v1368_v30  ;;  %v879_v30 = vld [vmem:[%s454_s24] sm:$0xf] }
  0x9f   : > { %560 = vadd.xlane.f32.xlu0 %v559_v62  ;;  %566 = vadd.xlane.f32.xlu2 %v565_v0 }
  0xa7   : > { %569 = vadd.xlane.f32.xlu0 %v568_v2 }
 0x101   : > { %v555_v5 = vpop.xlane.xlu1 %554 }
 0x102   : > { %v549_v6 = vpop.xlane.xlu2 %548  ;;  %v573_v9 = vmul.f32 %v555_v5, %v1608_v26 }
 0x103   : > { %v571_v8 = vmul.f32 %v549_v6, %v1608_v26  ;;  %v1724_v6 = vld [vmem:[%s1974_s4] ss:$0 sm:$0xff] }
 0x104   : > { %v1676_v13 = vadd.f32 1e-05, %v573_v9  ;;  %v1370_v9 = vld [vmem:[%s1662_s23 + $0x18] sm:$0xff] }
 0x105   : > { %v579_v10 = vadd.f32 1e-05, %v571_v8  ;;  %1341 = vmatmul.msk.bf16.gmra.mxu2 %vm491_vm0, %v1370_v9 }
 0x106   : > { %vm613_vm14 = vweird.f32 %v1676_v13 }
 0x107   : > { %1425 = vrsqrt.f32 %v579_v10  ;;  %vm593_vm4 = vweird.f32 %v579_v10 }
 0x108   : > { %1427 = vrsqrt.f32 %v1676_v13 }
 0x109   : > { %v564_v14 = vpop.xlane.xlu1 %563 }
 0x10a   : > { %v576_v15 = vmul.f32 %v564_v14, %v1608_v26  ;;  %v558_v16 = vpop.xlane.xlu2 %557  ;;  %v552_v17 = vpop.xlane.xlu0 %551 }
 0x10b   : > { %v574_v18 = vmul.f32 %v558_v16, %v1608_v26  ;;  %v572_v19 = vmul.f32 %v552_v17, %v1608_v26 }
 0x10c   : > { %v1681_v20 = vadd.f32 1e-05, %v576_v15 }
 0x10d   : > { %v1426_v21 = vpop.eup %1425  ;;  %v1684_v22 = vadd.f32 1e-05, %v574_v18  ;;  %v580_v23 = vadd.f32 1e-05, %v572_v19  ;;  %v1743_v18 = vld [vmem:[%s1974_s4 + $0x1] ss:$0 sm:$0xff] }
 0x10e   : > { %v588_v24 = vmul.f32 %v1426_v21, %v579_v10  ;;  %1429 = vrsqrt.f32 %v1681_v20  ;;  %v1690_v34 = vpop.eup %1427  ;;  %vm594_vm3 = vweird.f32 %v1426_v21  ;;  %vm643_vm7 = vweird.f32 %v1681_v20 }
 0x10f   : > { %1431 = vrsqrt.f32 %v1684_v22  ;;  %v608_v43 = vmul.f32 %v1690_v34, %v1676_v13  ;;  %vm595_vm5 = vmor %vm593_vm4, %vm594_vm3  ;;  %vm603_vm9 = vweird.f32 %v580_v23  ;;  %vm623_vm12 = vweird.f32 %v1684_v22 }
 0x110   : > { %v589_v25 = vmul.f32 %v1426_v21, %v588_v24  ;;  %1433 = vrsqrt.f32 %v580_v23  ;;  %vm614_vm15 = vweird.f32 %v1690_v34 }
 0x111   : > { %v609_v56 = vmul.f32 %v1690_v34, %v608_v43 }
 0x112   : > { %v590_v27 = vmul.f32 0.5, %v589_v25  ;;  %v567_v28 = vpop.xlane.xlu2 %566  ;;  %v561_v29 = vpop.xlane.xlu0 %560 }
 0x113   : > { %v577_v35 = vmul.f32 %v567_v28, %v1608_v26  ;;  %v575_v36 = vmul.f32 %v561_v29, %v1608_v26  ;;  %v610_v4 = vmul.f32 0.5, %v609_v56 }
 0x114   : > { %v1694_v37 = vpop.eup %1429  ;;  %v591_v38 = vsub.f32 1.5, %v590_v27 }
 0x115   : > { %v1698_v39 = vpop.eup %1431  ;;  %v638_v40 = vmul.f32 %v1694_v37, %v1681_v20  ;;  %v1702_v41 = vadd.f32 1e-05, %v577_v35  ;;  %v1708_v48 = vadd.f32 1e-05, %v575_v36  ;;  %vm644_vm8 = vweird.f32 %v1694_v37 }
 0x116   : > { %v1434_v42 = vpop.eup %1433  ;;  %v618_v44 = vmul.f32 %v1698_v39, %v1684_v22  ;;  %v592_v49 = vmul.f32 %v1426_v21, %v591_v38  ;;  %v611_v14 = vsub.f32 1.5, %v610_v4  ;;  %vm1734_vm11 = vmor %vm643_vm7, %vm644_vm8  ;;  %vm624_vm13 = vweird.f32 %v1698_v39 }
 0x117   : > { %v639_v51 = vmul.f32 %v1694_v37, %v638_v40  ;;  %v598_v52 = vmul.f32 %v1434_v42, %v580_v23  ;;  %1435 = vrsqrt.f32 %v1702_v41  ;;  %vm604_vm6 = vweird.f32 %v1434_v42  ;;  %vm1763_vm1 = vmor %vm623_vm12, %vm624_vm13 }
 0x118   : > { %v619_v53 = vmul.f32 %v1698_v39, %v618_v44  ;;  %1437 = vrsqrt.f32 %v1708_v48  ;;  %v596_v58 = vsel %vm595_vm5, %v1426_v21, %v592_v49  ;;  %vm605_vm10 = vmor %vm603_vm9, %vm604_vm6  ;;  %v829_v21 = vld [vmem:[%s1977_s7] sm:$0xf]  ;;  %v612_v29 = vmul.f32 %v1690_v34, %v611_v14 }
 0x119   : > { %v640_v54 = vmul.f32 0.5, %v639_v51  ;;  %v599_v55 = vmul.f32 %v1434_v42, %v598_v52  ;;  %v667_v5 = vmul.f32 %v596_v58, %v1614_v33  ;;  %v844_v27 = vsel %vm739_vm2, %v829_v21, 0  ;;  %vm1775_vm5 = vmor %vm613_vm14, %vm614_vm15 }
 0x11a   : > { %v570_v57 = vpop.xlane.xlu0 %569  ;;  %v620_v63 = vmul.f32 0.5, %v619_v53  ;;  %853 = vmatpush.bf16.msrb.mxu2 %v844_v27  ;;  %vm633_vm3 = vweird.f32 %v1708_v48  ;;  %v616_v13 = vsel %vm1775_vm5, %v1690_v34, %v612_v29  ;;  %vm653_vm9 = vweird.f32 %v1702_v41 }
 0x11b   : > { %v600_v59 = vmul.f32 0.5, %v599_v55  ;;  %v578_v62 = vmul.f32 %v570_v57, %v1608_v26  ;;  %v641_v0 = vsub.f32 1.5, %v640_v54  ;;  %v676_v17 = vmul.f32 %v1724_v6, %v667_v5 }
 0x11c   : > { %v621_v8 = vsub.f32 1.5, %v620_v63  ;;  %v669_v55 = vmul.f32 %v616_v13, %v1612_v32 }
 0x11d   : > { %v601_v1 = vsub.f32 1.5, %v600_v59  ;;  %v1716_v2 = vadd.f32 1e-05, %v578_v62  ;;  %v1718_v3 = vpop.eup %1435  ;;  %v642_v10 = vmul.f32 %v1694_v37, %v641_v0  ;;  %v685_v31 = vadd.f32 %v1743_v18, %v676_v17 }
 0x11e   : > { %v1438_v7 = vpop.eup %1437  ;;  %v648_v11 = vmul.f32 %v1718_v3, %v1702_v41  ;;  %v622_v20 = vmul.f32 %v1698_v39, %v621_v8  ;;  %v678_v32 = vmul.f32 %v1724_v6, %v669_v55 }
 0x11f   : > { %v602_v26 = vmul.f32 %v1434_v42, %v601_v1  ;;  %1439 = vrsqrt.f32 %v1716_v2  ;;  %v628_v12 = vmul.f32 %v1438_v7, %v1708_v48  ;;  %v646_v23 = vsel %vm1734_vm11, %v1694_v37, %v642_v10 }
 0x120   : > { %v649_v24 = vmul.f32 %v1718_v3, %v648_v11  ;;  %vm634_vm4 = vweird.f32 %v1438_v7  ;;  %v672_v38 = vmul.f32 %v646_v23, %v1626_v45  ;;  %vm663_vm7 = vweird.f32 %v1716_v2 }
 0x121   : > { %v606_v33 = vsel %vm605_vm10, %v1434_v42, %v602_v26  ;;  %v629_v19 = vmul.f32 %v1438_v7, %v628_v12  ;;  %v626_v42 = vsel %vm1763_vm1, %v1698_v39, %v622_v20  ;;  %vm635_vm6 = vmor %vm633_vm3, %vm634_vm4  ;;  %vm654_vm10 = vweird.f32 %v1718_v3 }
 0x122   : > { %v668_v16 = vmul.f32 %v606_v33, %v1630_v47  ;;  %v650_v43 = vmul.f32 0.5, %v649_v24  ;;  %v670_v52 = vmul.f32 %v626_v42, %v1628_v46  ;;  %v681_v53 = vmul.f32 %v1724_v6, %v672_v38  ;;  %vm655_vm12 = vmor %vm653_vm9, %vm654_vm10 }
 0x123   : > { %v630_v25 = vmul.f32 0.5, %v629_v19  ;;  %v687_v1 = vadd.f32 %v1743_v18, %v678_v32 }
 0x124   : > { %v677_v47 = vmul.f32 %v1724_v6, %v668_v16  ;;  %v651_v54 = vsub.f32 1.5, %v650_v43  ;;  %v679_v57 = vmul.f32 %v1724_v6, %v670_v52 }
 0x125   : > { %v1440_v28 = vpop.eup %1439  ;;  %v631_v36 = vsub.f32 1.5, %v630_v25 }
 0x126   : > { %v686_v35 = vadd.f32 %v1743_v18, %v677_v47  ;;  %v658_v37 = vmul.f32 %v1440_v28, %v1716_v2  ;;  %vm664_vm8 = vweird.f32 %v1440_v28  ;;  %v652_v58 = vmul.f32 %v1718_v3, %v651_v54 }
 0x127   : > { %v632_v44 = vmul.f32 %v1438_v7, %v631_v36  ;;  %vm665_vm11 = vmor %vm663_vm7, %vm664_vm8  ;;  %v688_v41 = vadd.f32 %v1743_v18, %v679_v57 }
 0x128   : > { %v693_v40 = vpack.c.bf16 %v686_v35, %v685_v31  ;;  %v659_v48 = vmul.f32 %v1440_v28, %v658_v37  ;;  %v656_v63 = vsel %vm655_vm12, %v1718_v3, %v652_v58  ;;  %v752_v3 = vpop.f32.mrf.mxu0  ;;  %v897_v31 = vsel %vm491_vm0, %v879_v30, 0 }
 0x129   : > { %v636_v49 = vsel %vm635_vm6, %v1438_v7, %v632_v44  ;;  %v673_v2 = vmul.f32 %v656_v63, %v1647_v60  ;;  %v694_v4 = vpack.c.bf16 %v688_v41, %v687_v1  ;;  %v1419_v60 = vld [vmem:[%s1974_s4 + $0x2] ss:$0 sm:$0xff]  ;;  %906 = vmatpush.bf16.xpose.msrb.mxu3 %v897_v31 }
 0x12a   : > { %1342 = vmatmul.msk.bf16.vlgmr.msra.gmra.mxu1 %vm491_vm0, %v693_v40  ;;  %v660_v51 = vmul.f32 0.5, %v659_v48  ;;  %v671_v45 = vmul.f32 %v636_v49, %v1636_v50  ;;  %v690_v50 = vadd.f32 %v1743_v18, %v681_v53  ;;  %v1420_v53 = vld [vmem:[%s1974_s4 + $0x3] ss:$0 sm:$0xff] }
 0x12b   : > { %v682_v26 = vmul.f32 %v1724_v6, %v673_v2 }
 0x12c   : > { %v661_v39 = vsub.f32 1.5, %v660_v51  ;;  %v680_v56 = vmul.f32 %v1724_v6, %v671_v45 }
 0x12d   : > { %v691_v8 = vadd.f32 %v1743_v18, %v682_v26  ;;  %v1421_v26 = vld [vmem:[%s1979_s9] ss:$0 sm:$0xff] }
 0x12e   : > { %v662_v34 = vmul.f32 %v1440_v28, %v661_v39  ;;  %v689_v46 = vadd.f32 %v1743_v18, %v680_v56 }
 0x130   : > { %v695_v59 = vpack.c.bf16 %v690_v50, %v689_v46  ;;  %v666_v62 = vsel %vm665_vm11, %v1440_v28, %v662_v34  ;;  %v754_v10 = vpop.f32.mrf.mxu0 }
 0x131   : > { %v674_v0 = vmul.f32 %v666_v62, %v1649_v61 }
 0x132   : > { %1344 = vmatmul.msk.bf16.vlgmr.msra.gmra.mxu3 %vm491_vm0, %v695_v59 }
 0x133   : > { %v683_v5 = vmul.f32 %v1724_v6, %v674_v0 }
 0x135   : > { %v692_v7 = vadd.f32 %v1743_v18, %v683_v5  ;;  %v762_v18 = vpop.f32.mrf.mxu2 }
 0x137   : > { %v696_v9 = vpack.c.bf16 %v692_v7, %v691_v8 }
 0x138   : > { %v757_v16 = vpop.f32.mrf.mxu0 }
 0x13a   : > { %1343 = vmatmul.msk.bf16.gmra.mxu1 %vm491_vm0, %v694_v4 }
 0x13d   : > { %v764_v28 = vpop.f32.mrf.mxu2 }
 0x140   : > { %v759_v47 = vpop.f32.mrf.mxu0 }
 0x142   : > { %1345 = vmatmul.msk.bf16.gmra.mxu3 %vm491_vm0, %v696_v9 }
 0x188   : > { %v767_v37 = vpop.f32.mrf.mxu2 }
 0x190   : > { %v769_v43 = vpop.f32.mrf.mxu2 }
 0x1a7   : > { %v796_v61 = vpop.f32.mrf.mxu1 }
 0x1a8   : > { %v797_v33 = vadd.f32 %v796_v61, %v752_v3 }
 0x1aa   : > { %v817_v6 = vadd.f32 %v1419_v60, %v797_v33 }
 0x1af   : > { %v798_v11 = vpop.f32.mrf.mxu1 }
 0x1b0   : > { %v799_v12 = vadd.f32 %v798_v11, %v754_v10 }
 0x1b2   : > { %v818_v14 = vadd.f32 %v1419_v60, %v799_v12 }
 0x1b4   : > { %v825_v15 = vpack.c.bf16 %v818_v14, %v817_v6 }
 0x1b5   : > { %v806_v19 = vpop.f32.mrf.mxu3 }
 0x1b6   : > { %1346 = vmatmul.msk.bf16.vlgmr.msrb.gmra.mxu2 %vm491_vm0, %v825_v15  ;;  %v807_v36 = vadd.f32 %v806_v19, %v762_v18 }
 0x1b7   : > { %v801_v17 = vpop.f32.mrf.mxu1 }
 0x1b8   : > { %v802_v20 = vadd.f32 %v801_v17, %v757_v16  ;;  %v821_v40 = vadd.f32 %v1419_v60, %v807_v36 }
 0x1ba   : > { %v819_v24 = vadd.f32 %v1419_v60, %v802_v20 }
 0x1bd   : > { %v808_v29 = vpop.f32.mrf.mxu3 }
 0x1be   : > { %v809_v35 = vadd.f32 %v808_v29, %v764_v28 }
 0x1bf   : > { %v803_v21 = vpop.f32.mrf.mxu1 }
 0x1c0   : > { %v804_v23 = vadd.f32 %v803_v21, %v759_v47  ;;  %v822_v38 = vadd.f32 %v1419_v60, %v809_v35 }
 0x1c2   : > { %v820_v25 = vadd.f32 %v1419_v60, %v804_v23  ;;  %v827_v42 = vpack.c.bf16 %v822_v38, %v821_v40 }
 0x1c4   : > { %v826_v27 = vpack.c.bf16 %v820_v25, %v819_v24 }
 0x1c5   : > { %v811_v22 = vpop.f32.mrf.mxu3 }
 0x1c6   : > { %1347 = vmatmul.msk.bf16.gmra.mxu2 %vm491_vm0, %v826_v27  ;;  %v812_v13 = vadd.f32 %v811_v22, %v767_v37 }
 0x1c8   : > { %v823_v51 = vadd.f32 %v1419_v60, %v812_v13 }
 0x1cd   : > { %v813_v44 = vpop.f32.mrf.mxu3 }
 0x1ce   : > { %v814_v48 = vadd.f32 %v813_v44, %v769_v43 }
 0x1d0   : > { %v824_v49 = vadd.f32 %v1419_v60, %v814_v48 }
 0x1d2   : > { %v828_v52 = vpack.c.bf16 %v824_v49, %v823_v51 }
 0x1d6   : > { %1348 = vmatmul.msk.bf16.gmra.mxu2 %vm491_vm0, %v827_v42 }
 0x1e6   : > { %1349 = vmatmul.msk.bf16.gmra.mxu2 %vm491_vm0, %v828_v52 }
 0x239   : > { %v855_v45 = vpop.f32.mrf.mxu2 }
 0x23a   : > { %v856_v39 = vadd.f32 %v1420_v53, %v855_v45 }
 0x241   : > { %v857_v54 = vpop.f32.mrf.mxu2 }
 0x242   : > { %v858_v55 = vadd.f32 %v1420_v53, %v857_v54 }
 0x244   : > { %v875_v56 = vpack.c.bf16 %v858_v55, %v856_v39 }
 0x246   : > { %1350 = vmatmul.msk.bf16.vlgmr.msrb.gmra.mxu3 %vm491_vm0, %v875_v56 }
 0x249   : > { %v860_v34 = vpop.f32.mrf.mxu2 }
 0x24a   : > { %v861_v50 = vadd.f32 %v1420_v53, %v860_v34 }
 0x251   : > { %v862_v46 = vpop.f32.mrf.mxu2 }
 0x252   : > { %v863_v57 = vadd.f32 %v1420_v53, %v862_v46 }
 0x254   : > { %v876_v58 = vpack.c.bf16 %v863_v57, %v861_v50 }
 0x256   : > { %1351 = vmatmul.msk.bf16.gmra.mxu3 %vm491_vm0, %v876_v58  ;;  %v1068_v58 = vld [vmem:[%s458_s11] sm:$0xf] }
 0x259   : > { %v865_v59 = vpop.f32.mrf.mxu2 }
 0x25a   : > { %v866_v62 = vadd.f32 %v1420_v53, %v865_v59 }
 0x261   : > { %v867_v32 = vpop.f32.mrf.mxu2 }
 0x262   : > { %v868_v41 = vadd.f32 %v1420_v53, %v867_v32  ;;  %v1082_v32 = vsel %vm739_vm2, %v1068_v58, 0 }
 0x263   : > { %1091 = vmatpush.bf16.msrb.mxu0 %v1082_v32 }
 0x264   : > { %v877_v63 = vpack.c.bf16 %v868_v41, %v866_v62 }
 0x266   : > { %1352 = vmatmul.msk.bf16.gmra.mxu3 %vm491_vm0, %v877_v63 }
 0x269   : > { %v870_v0 = vpop.f32.mrf.mxu2 }
 0x26a   : > { %v871_v2 = vadd.f32 %v1420_v53, %v870_v0 }
 0x271   : > { %v872_v1 = vpop.f32.mrf.mxu2 }
 0x272   : > { %v873_v4 = vadd.f32 %v1420_v53, %v872_v1 }
 0x274   : > { %v878_v5 = vpack.c.bf16 %v873_v4, %v871_v2 }
 0x276   : > { %1353 = vmatmul.msk.bf16.gmra.mxu3 %vm491_vm0, %v878_v5 }
 0x2c9   : > { %v908_v7 = vpop.f32.mrf.mxu3 }
 0x2ca   : > { %v909_v8 = vadd.f32 %v1421_v26, %v908_v7 }
 0x2cc   : > { %v928_v9 = vsel %vm491_vm0, %v909_v8, -inf }
 0x2cd   : > { %929 = vmax.xlane.f32.xlu1 %v928_v9 }
 0x2d1   : > { %v910_v3 = vpop.f32.mrf.mxu3 }
 0x2d2   : > { %v911_v61 = vadd.f32 %v1421_v26, %v910_v3 }
 0x2d4   : > { %v931_v10 = vsel %vm491_vm0, %v911_v61, -inf }
 0x2d5   : > { %932 = vmax.xlane.f32.xlu2 %v931_v10 }
 0x2d9   : > { %v913_v33 = vpop.f32.mrf.mxu3 }
 0x2da   : > { %v914_v60 = vadd.f32 %v1421_v26, %v913_v33 }
 0x2dc   : > { %v934_v11 = vsel %vm491_vm0, %v914_v60, -inf }
 0x2dd   : > { %935 = vmax.xlane.f32.xlu0 %v934_v11 }
 0x2e1   : > { %v915_v12 = vpop.f32.mrf.mxu3 }
 0x2e2   : > { %v916_v6 = vadd.f32 %v1421_v26, %v915_v12 }
 0x2e4   : > { %v937_v14 = vsel %vm491_vm0, %v916_v6, -inf }
 0x2e5   : > { %938 = vmax.xlane.f32.xlu1 %v937_v14 }
 0x2e9   : > { %v918_v15 = vpop.f32.mrf.mxu3 }
 0x2ea   : > { %v919_v16 = vadd.f32 %v1421_v26, %v918_v15 }
 0x2ec   : > { %v940_v17 = vsel %vm491_vm0, %v919_v16, -inf }
 0x2ed   : > { %941 = vmax.xlane.f32.xlu2 %v940_v17 }
 0x2f1   : > { %v920_v18 = vpop.f32.mrf.mxu3 }
 0x2f2   : > { %v921_v19 = vadd.f32 %v1421_v26, %v920_v18 }
 0x2f4   : > { %v943_v20 = vsel %vm491_vm0, %v921_v19, -inf }
 0x2f5   : > { %944 = vmax.xlane.f32.xlu0 %v943_v20 }
 0x2f9   : > { %v923_v47 = vpop.f32.mrf.mxu3 }
 0x2fa   : > { %v924_v21 = vadd.f32 %v1421_v26, %v923_v47 }
 0x2fc   : > { %v946_v23 = vsel %vm491_vm0, %v924_v21, -inf }
 0x2fd   : > { %947 = vmax.xlane.f32.xlu1 %v946_v23 }
 0x301   : > { %v925_v24 = vpop.f32.mrf.mxu3 }
 0x302   : > { %v926_v25 = vadd.f32 %v1421_v26, %v925_v24 }
 0x304   : > { %v949_v27 = vsel %vm491_vm0, %v926_v25, -inf }
 0x305   : > { %950 = vmax.xlane.f32.xlu2 %v949_v27 }
 0x340   : > { %v1844_v28 = vpop.xlane.xlu1 %929 }
 0x341   : > { %v952_v29 = vmax.f32 %v1844_v28, 0.0 }
 0x343   : > { %v960_v30 = vsub.f32 %v909_v8, %v952_v29 }
 0x345   : > { %v968_v31 = vmul.f32 1.442695, %v960_v30 }
 0x347   : > { %1441 = vpow2.f32 %v968_v31 }
 0x348   : > { %v1849_v35 = vpop.xlane.xlu2 %932 }
 0x349   : > { %v953_v36 = vmax.f32 %v1849_v35, 0.0 }
 0x34b   : > { %v961_v37 = vsub.f32 %v911_v61, %v953_v36  ;;  %v1009_v15 = vsub.f32 0.0, %v953_v36 }
 0x34d   : > { %v1854_v22 = vpop.eup %1441  ;;  %v970_v38 = vmul.f32 1.442695, %v961_v37 }
 0x34e   : > { %v984_v40 = vsel %vm491_vm0, %v1854_v22, 0.0 }
 0x34f   : > { %1443 = vpow2.f32 %v970_v38  ;;  %985 = vadd.xlane.f32.xlu0 %v984_v40 }
 0x350   : > { %v936_v42 = vpop.xlane.xlu0 %935 }
 0x351   : > { %v954_v43 = vmax.f32 %v936_v42, 0.0 }
 0x353   : > { %v962_v44 = vsub.f32 %v914_v60, %v954_v43  ;;  %v1010_v18 = vsub.f32 0.0, %v954_v43 }
 0x355   : > { %v1858_v48 = vpop.eup %1443  ;;  %v972_v13 = vmul.f32 1.442695, %v962_v44  ;;  %v1020_v23 = vmul.f32 1.442695, %v1010_v18 }
 0x356   : > { %v987_v49 = vsel %vm491_vm0, %v1858_v48, 0.0 }
 0x357   : > { %1445 = vpow2.f32 %v972_v13  ;;  %988 = vadd.xlane.f32.xlu1 %v987_v49 }
 0x358   : > { %v939_v51 = vpop.xlane.xlu1 %938 }
 0x359   : > { %v955_v52 = vmax.f32 %v939_v51, 0.0 }
 0x35b   : > { %v963_v45 = vsub.f32 %v916_v6, %v955_v52  ;;  %v1008_v6 = vsub.f32 0.0, %v952_v29  ;;  %v1011_v24 = vsub.f32 0.0, %v955_v52 }
 0x35d   : > { %v1862_v53 = vpop.eup %1445  ;;  %v974_v54 = vmul.f32 1.442695, %v963_v45  ;;  %v1016_v14 = vmul.f32 1.442695, %v1008_v6  ;;  %v1022_v29 = vmul.f32 1.442695, %v1011_v24 }
 0x35e   : > { %v990_v39 = vsel %vm491_vm0, %v1862_v53, 0.0 }
 0x35f   : > { %1447 = vpow2.f32 %v974_v54  ;;  %991 = vadd.xlane.f32.xlu2 %v990_v39 }
 0x360   : > { %v1866_v55 = vpop.xlane.xlu2 %941 }
 0x361   : > { %v956_v56 = vmax.f32 %v1866_v55, 0.0 }
 0x363   : > { %v964_v34 = vsub.f32 %v919_v16, %v956_v56  ;;  %v1018_v16 = vmul.f32 1.442695, %v1009_v15  ;;  %v1012_v36 = vsub.f32 0.0, %v956_v56 }
 0x365   : > { %v1874_v46 = vpop.eup %1447  ;;  %v976_v50 = vmul.f32 1.442695, %v964_v34  ;;  %v1024_v49 = vmul.f32 1.442695, %v1012_v36 }
 0x366   : > { %v993_v57 = vsel %vm491_vm0, %v1874_v46, 0.0 }
 0x367   : > { %1449 = vpow2.f32 %v976_v50  ;;  %994 = vadd.xlane.f32.xlu0 %v993_v57 }
 0x368   : > { %v1878_v59 = vpop.xlane.xlu0 %944 }
 0x369   : > { %v957_v62 = vmax.f32 %v1878_v59, 0.0 }
 0x36b   : > { %v965_v41 = vsub.f32 %v921_v19, %v957_v62  ;;  %v1013_v51 = vsub.f32 0.0, %v957_v62 }
 0x36d   : > { %v1882_v63 = vpop.eup %1449  ;;  %v978_v0 = vmul.f32 1.442695, %v965_v41  ;;  %v1026_v39 = vmul.f32 1.442695, %v1013_v51 }
 0x36e   : > { %v996_v1 = vsel %vm491_vm0, %v1882_v63, 0.0 }
 0x36f   : > { %1451 = vpow2.f32 %v978_v0  ;;  %997 = vadd.xlane.f32.xlu1 %v996_v1  ;;  %v1117_v1 = vld [vmem:[%s1978_s8] sm:$0xf] }
 0x370   : > { %v1886_v2 = vpop.xlane.xlu1 %947 }
 0x371   : > { %v958_v4 = vmax.f32 %v1886_v2, 0.0 }
 0x373   : > { %v966_v5 = vsub.f32 %v924_v21, %v958_v4  ;;  %v1014_v56 = vsub.f32 0.0, %v958_v4  ;;  %v1132_v4 = vsel %vm739_vm2, %v1117_v1, 0  ;;  %vm1171_vm2 = vcmask 60416  }
 0x374   : > { %1141 = vmatpush.bf16.msrb.mxu1 %v1132_v4 }
 0x375   : > { %v1891_v26 = vpop.eup %1451  ;;  %v980_v7 = vmul.f32 1.442695, %v966_v5  ;;  %v1028_v41 = vmul.f32 1.442695, %v1014_v56 }
 0x376   : > { %v999_v8 = vsel %vm491_vm0, %v1891_v26, 0.0 }
 0x377   : > { %1453 = vpow2.f32 %v980_v7  ;;  %1000 = vadd.xlane.f32.xlu2 %v999_v8 }
 0x378   : > { %v1895_v9 = vpop.xlane.xlu2 %950 }
 0x379   : > { %v959_v3 = vmax.f32 %v1895_v9, 0.0 }
 0x37b   : > { %v967_v61 = vsub.f32 %v926_v25, %v959_v3  ;;  %v1015_v0 = vsub.f32 0.0, %v959_v3 }
 0x37d   : > { %v1900_v10 = vpop.eup %1453  ;;  %v982_v33 = vmul.f32 1.442695, %v967_v61  ;;  %v1030_v5 = vmul.f32 1.442695, %v1015_v0 }
 0x37e   : > { %v1002_v60 = vsel %vm491_vm0, %v1900_v10, 0.0 }
 0x37f   : > { %1455 = vpow2.f32 %v982_v33  ;;  %1003 = vadd.xlane.f32.xlu0 %v1002_v60 }
 0x380   : > { %1457 = vpow2.f32 %v1016_v14 }
 0x381   : > { %1459 = vpow2.f32 %v1018_v16 }
 0x385   : > { %v1904_v11 = vpop.eup %1455 }
 0x386   : > { %v1005_v12 = vsel %vm491_vm0, %v1904_v11, 0.0  ;;  %v1458_v17 = vpop.eup %1457 }
 0x387   : > { %1006 = vadd.xlane.f32.xlu1 %v1005_v12  ;;  %v1032_v20 = vmul.f32 56.0, %v1458_v17  ;;  %v1460_v47 = vpop.eup %1459 }
 0x388   : > { %v1033_v25 = vmul.f32 56.0, %v1460_v47 }
 0x3c2   : > { %v986_v19 = vpop.xlane.xlu0 %985 }
 0x3c3   : > { %v1040_v21 = vadd.f32 %v1032_v20, %v986_v19 }
 0x3c5   : > { %1461 = vrcp.f32 %v1040_v21 }
 0x3c6   : > { %1463 = vpow2.f32 %v1020_v23 }
 0x3ca   : > { %v989_v27 = vpop.xlane.xlu1 %988 }
 0x3cb   : > { %v1041_v28 = vadd.f32 %v1033_v25, %v989_v27  ;;  %v1462_v30 = vpop.eup %1461 }
 0x3cc   : > { %v1464_v31 = vpop.eup %1463  ;;  %v1056_v37 = vmul.f32 %v1462_v30, %v1854_v22 }
 0x3cd   : > { %1465 = vrcp.f32 %v1041_v28  ;;  %v1034_v42 = vmul.f32 56.0, %v1464_v31 }
 0x3ce   : > { %1467 = vpow2.f32 %v1022_v29 }
 0x3d2   : > { %v992_v40 = vpop.xlane.xlu2 %991 }
 0x3d3   : > { %v1466_v35 = vpop.eup %1465  ;;  %v1042_v13 = vadd.f32 %v1034_v42, %v992_v40 }
 0x3d4   : > { %v1057_v38 = vmul.f32 %v1466_v35, %v1858_v48  ;;  %v1468_v43 = vpop.eup %1467  ;;  %v1422_v35 = vld [vmem:[%s1974_s4 + $0x4] ss:$0 sm:$0xff] }
 0x3d5   : > { %v1035_v52 = vmul.f32 56.0, %v1468_v43  ;;  %1469 = vrcp.f32 %v1042_v13 }
 0x3d6   : > { %v1064_v44 = vpack.c.bf16 %v1057_v38, %v1056_v37  ;;  %1471 = vpow2.f32 %v1024_v49 }
 0x3d8   : > { %1354 = vmatmul.msk.bf16.vlgmr.msrb.gmra.mxu0 %vm491_vm0, %v1064_v44 }
 0x3da   : > { %v995_v45 = vpop.xlane.xlu0 %994 }
 0x3db   : > { %v1043_v54 = vadd.f32 %v1035_v52, %v995_v45  ;;  %v1470_v22 = vpop.eup %1469 }
 0x3dc   : > { %v1472_v55 = vpop.eup %1471  ;;  %v1058_v50 = vmul.f32 %v1470_v22, %v1862_v53 }
 0x3dd   : > { %1473 = vrcp.f32 %v1043_v54  ;;  %v1036_v58 = vmul.f32 56.0, %v1472_v55 }
 0x3de   : > { %1475 = vpow2.f32 %v1026_v39 }
 0x3e2   : > { %v998_v34 = vpop.xlane.xlu1 %997 }
 0x3e3   : > { %v1474_v48 = vpop.eup %1473  ;;  %v1044_v62 = vadd.f32 %v1036_v58, %v998_v34 }
 0x3e4   : > { %v1059_v57 = vmul.f32 %v1474_v48, %v1874_v46  ;;  %v1476_v59 = vpop.eup %1475 }
 0x3e5   : > { %v1037_v2 = vmul.f32 56.0, %v1476_v59  ;;  %1477 = vrcp.f32 %v1044_v62 }
 0x3e6   : > { %v1065_v32 = vpack.c.bf16 %v1059_v57, %v1058_v50  ;;  %1479 = vpow2.f32 %v1028_v41 }
 0x3e8   : > { %1355 = vmatmul.msk.bf16.gmra.mxu0 %vm491_vm0, %v1065_v32 }
 0x3ea   : > { %v1001_v53 = vpop.xlane.xlu2 %1000 }
 0x3eb   : > { %v1045_v46 = vadd.f32 %v1037_v2, %v1001_v53  ;;  %v1478_v7 = vpop.eup %1477 }
 0x3ec   : > { %v1480_v8 = vpop.eup %1479  ;;  %v1060_v61 = vmul.f32 %v1478_v7, %v1882_v63 }
 0x3ed   : > { %1481 = vrcp.f32 %v1045_v46  ;;  %v1038_v60 = vmul.f32 56.0, %v1480_v8 }
 0x3ee   : > { %1483 = vpow2.f32 %v1030_v5 }
 0x3f2   : > { %v1004_v3 = vpop.xlane.xlu0 %1003 }
 0x3f3   : > { %v1482_v9 = vpop.eup %1481  ;;  %v1046_v14 = vadd.f32 %v1038_v60, %v1004_v3 }
 0x3f4   : > { %v1061_v33 = vmul.f32 %v1482_v9, %v1891_v26  ;;  %v1484_v12 = vpop.eup %1483 }
 0x3f5   : > { %v1039_v15 = vmul.f32 56.0, %v1484_v12  ;;  %1485 = vrcp.f32 %v1046_v14 }
 0x3f6   : > { %v1066_v6 = vpack.c.bf16 %v1061_v33, %v1060_v61 }
 0x3f8   : > { %1356 = vmatmul.msk.bf16.gmra.mxu0 %vm491_vm0, %v1066_v6 }
 0x3fa   : > { %v1007_v16 = vpop.xlane.xlu1 %1006 }
 0x3fb   : > { %v1047_v17 = vadd.f32 %v1039_v15, %v1007_v16  ;;  %v1486_v18 = vpop.eup %1485 }
 0x3fc   : > { %v1062_v20 = vmul.f32 %v1486_v18, %v1900_v10 }
 0x3fd   : > { %1487 = vrcp.f32 %v1047_v17 }
 0x403   : > { %v1488_v19 = vpop.eup %1487 }
 0x404   : > { %v1063_v47 = vmul.f32 %v1488_v19, %v1904_v11 }
 0x406   : > { %v1067_v63 = vpack.c.bf16 %v1063_v47, %v1062_v20 }
 0x408   : > { %1357 = vmatmul.msk.bf16.gmra.mxu0 %vm491_vm0, %v1067_v63 }
 0x455   : > { %v1093_v26 = vpop.f32.mrf.mxu0 }
 0x45d   : > { %v1095_v21 = vpop.f32.mrf.mxu0 }
 0x45e   : > { %v1113_v23 = vpack.c.bf16 %v1095_v21, %v1093_v26 }
 0x460   : > { %1358 = vmatmul.msk.bf16.vlgmr.msrb.gmra.mxu1 %vm491_vm0, %v1113_v23 }
 0x465   : > { %v1098_v24 = vpop.f32.mrf.mxu0 }
 0x46d   : > { %v1100_v25 = vpop.f32.mrf.mxu0 }
 0x46e   : > { %v1114_v27 = vpack.c.bf16 %v1100_v25, %v1098_v24 }
 0x470   : > { %1359 = vmatmul.msk.bf16.gmra.mxu1 %vm491_vm0, %v1114_v27 }
 0x475   : > { %v1103_v28 = vpop.f32.mrf.mxu0 }
 0x47d   : > { %v1105_v29 = vpop.f32.mrf.mxu0 }
 0x47e   : > { %v1115_v30 = vpack.c.bf16 %v1105_v29, %v1103_v28 }
 0x480   : > { %1360 = vmatmul.msk.bf16.gmra.mxu1 %vm491_vm0, %v1115_v30 }
 0x485   : > { %v1108_v10 = vpop.f32.mrf.mxu0 }
 0x48d   : > { %v1110_v11 = vpop.f32.mrf.mxu0 }
 0x48e   : > { %v1116_v31 = vpack.c.bf16 %v1110_v11, %v1108_v10 }
 0x490   : > { %1361 = vmatmul.msk.bf16.gmra.mxu1 %vm491_vm0, %v1116_v31 }
 0x4dd   : > { %v1143_v36 = vpop.f32.mrf.mxu1 }
 0x4de   : > { %v1144_v37 = vadd.f32 %v1422_v35, %v1143_v36 }
 0x4e0   : > { %v1163_v38 = vpack.c.bf16 %v1144_v37, %v1144_v37 }
 0x4e2   : > { %1172 = vst.msk [vmem:[%s1943_s22] sm:$0xf] %vm1171_vm2, %v1163_v38 }
 0x4e5   : > { %v1145_v40 = vpop.f32.mrf.mxu1 }
 0x4e6   : > { %v1146_v42 = vadd.f32 %v1422_v35, %v1145_v40 }
 0x4e8   : > { %v1164_v43 = vpack.c.bf16 %v1146_v42, %v1146_v42 }
 0x4ea   : > { %1173 = vst.msk [vmem:[%s1943_s22 + $0x4] sm:$0xf] %vm1171_vm2, %v1164_v43 }
 0x4ed   : > { %v1148_v44 = vpop.f32.mrf.mxu1 }
 0x4ee   : > { %v1149_v13 = vadd.f32 %v1422_v35, %v1148_v44 }
 0x4f0   : > { %v1165_v49 = vpack.c.bf16 %v1149_v13, %v1149_v13 }
 0x4f2   : > { %1174 = vst.msk [vmem:[%s1943_s22 + $0x8] sm:$0xf] %vm1171_vm2, %v1165_v49 }
 0x4f5   : > { %v1150_v51 = vpop.f32.mrf.mxu1 }
 0x4f6   : > { %v1151_v52 = vadd.f32 %v1422_v35, %v1150_v51 }
 0x4f8   : > { %v1166_v45 = vpack.c.bf16 %v1151_v52, %v1151_v52 }
 0x4fa   : > { %1175 = vst.msk [vmem:[%s1943_s22 + $0xc] sm:$0xf] %vm1171_vm2, %v1166_v45 }
 0x4fd   : > { %v1153_v54 = vpop.f32.mrf.mxu1 }
 0x4fe   : > { %v1154_v39 = vadd.f32 %v1422_v35, %v1153_v54 }
 0x500   : > { %v1167_v22 = vpack.c.bf16 %v1154_v39, %v1154_v39 }
 0x502   : > { %1176 = vst.msk [vmem:[%s1943_s22 + $0x10] sm:$0xf] %vm1171_vm2, %v1167_v22 }
 0x505   : > { %v1155_v55 = vpop.f32.mrf.mxu1 }
 0x506   : > { %v1156_v48 = vadd.f32 %v1422_v35, %v1155_v55 }
 0x508   : > { %v1168_v56 = vpack.c.bf16 %v1156_v48, %v1156_v48 }
 0x50a   : > { %1177 = vst.msk [vmem:[%s1943_s22 + $0x14] sm:$0xf] %vm1171_vm2, %v1168_v56 }
 0x50d   : > { %v1158_v34 = vpop.f32.mrf.mxu1 }
 0x50e   : > { %v1159_v50 = vadd.f32 %v1422_v35, %v1158_v34 }
 0x510   : > { %v1169_v57 = vpack.c.bf16 %v1159_v50, %v1159_v50 }
 0x512   : > { %1178 = vst.msk [vmem:[%s1943_s22 + $0x18] sm:$0xf] %vm1171_vm2, %v1169_v57 }
 0x515   : > { %v1160_v58 = vpop.f32.mrf.mxu1 }
 0x516   : > { %v1161_v59 = vadd.f32 %v1422_v35, %v1160_v58 }
 0x518   : > { %v1170_v32 = vpack.c.bf16 %v1161_v59, %v1161_v59 }
 0x51a   : > { %1179 = vst.msk [vmem:[%s1943_s22 + $0x1c] sm:$0xf] %vm1171_vm2, %v1170_v32 }
 0x51b PF: > { %s20_s15 = sadd.s32 1, %s1511_s15   ;;  %s1987_s13 = smov %s1507_s14 }
 0x51c   : > { %p17_p5 = scmp.ge.s32.totalorder %s20_s15, 4   ;;  %s1988_s14 = smov %s1990_s16 }
 0x51e   :  { %19 = sbr.rel (!%p17_p5) target bundleno = 2 (0x2), region = 99 }

// kernel: decoder_forward.11
= control target key start
LH: loop header
LB: loop body
LE: loop exit
PB: predicated region body
PF: predicated region fallthrough
CT: control target
= control target key end

     0   :  { %s3783_s13 = smov 0   ;;  %s3785_s14 = smov 0   ;;  %s5616_s0 = inlined_call_operand.vmem [shape: bf16[2,256,4], index: 0, kind: input, shape index: {}]   ;;  %s5617_s1 = inlined_call_operand.vmem [shape: bf16[2,256,4], index: 1, kind: input, shape index: {}]   ;;  %s5618_s2 = inlined_call_operand.vmem [shape: bf16[2,8,4], index: 2, kind: input, shape index: {}]   ;;  %s5619_s3 = inlined_call_operand.vmem [shape: bf16[2,8,4], index: 3, kind: input, shape index: {}]   ;;  %s5620_s4 = inlined_call_operand.vmem [shape: f32[8,4], index: 4, kind: input, shape index: {}]   ;;  %s5621_s5 = inlined_call_operand.vmem [shape: bf16[4,4], index: 5, kind: input, shape index: {}]   ;;  %s5622_s6 = inlined_call_operand.vmem [shape: bf16[4,4], index: 6, kind: input, shape index: {}]   ;;  %s5623_s7 = inlined_call_operand.vmem [shape: bf16[4,4], index: 7, kind: input, shape index: {}]   ;;  %s5624_s8 = inlined_call_operand.vmem [shape: bf16[4,4], index: 8, kind: input, shape index: {}]   ;;  %s5625_s9 = inlined_call_operand.vmem [shape: f32[1,8], index: 9, kind: input, shape index: {}]   ;;  %s5626_s10 = inlined_call_operand.vmem [shape: bf16[2,256,4], index: 10, kind: output, shape index: {}]  }
   0x1   :  { %s3787_s15 = smov 0  }
   0x2 LB: > { %s32_s16 = sadd.s32 1, %s3721_s14  ;;  %p3139_p0 = scmp.ge.s32.totalorder %s3725_s15, 1  ;;  %s3725_s15 = sphi %s3787_s15, %s20_s15   ;;  %s3721_s14 = sphi %s3785_s14, %s5656_s14   ;;  %s3717_s13 = sphi %s3783_s13, %s5655_s13  }
   0x3   : > { %p34_p1 = scmp.ge.s32.totalorder %s32_s16, 2  ;;  %p368_p2 = scmp.lt.s32.totalorder %s3725_s15, 3 }
   0x5   : > { %s5658_s16 = smov (%p34_p1, %s32_s16), 0  ;;  %p369_p3 = pnand %p3139_p0, %p368_p2 }
   0x6   : > { %p432_p4 = scmp.lt.s32.totalorder (!%p369_p3), %s3717_s13, 1 }
   0x7   : > { %372 = sbr.rel (%p369_p3) target bundleno = 1968 (0x7b0), region = 60 }
   0xc   : > { %s5660_s13 = smov (!%p432_p4, %s3717_s13), 1  ;;  %vm539_vm0 = vcmask 31744   ;;  %v3727_v18 = vmov 4.0   ;;  %vm1495_vm2 = vcmask 1041408  }
   0xd   : > { %s3804_s17 = sshll.u32 %s5660_s13, 7  ;;  %3441 = vrcp.f32 %v3727_v18  ;;  %s3144_s25 = sshll.u32 %s5660_s13, 2 }
   0xe   : > { %s3810_s20 = scalar_lea.vmem %s5616_s0, %s3804_s17  ;;  %s3937_s23 = scalar_lea.vmem %s5617_s1, %s3804_s17 }
   0xf   : > { %v3393_v0 = vld [vmem:[%s3810_s20 + $0x8] sm:$0xff]   ;;  %v3330_v1 = vld [vmem:[%s3810_s20] sm:$0xff]   ;;  %v3815_v2 = vld [vmem:[%s3810_s20 + $0x10] sm:$0xff]   ;;  %s454_s28 = scalar_lea.vmem %s5618_s2, %s3144_s25  ;;  %s458_s22 = scalar_lea.vmem %s5619_s3, %s3144_s25 }
  0x10   : > { %v3335_v3 = vunpack.c.l.bf16 %v3393_v0  ;;  %v3331_v4 = vunpack.c.l.bf16 %v3330_v1  ;;  %v3339_v5 = vunpack.c.l.bf16 %v3815_v2  ;;  %v3336_v9 = vunpack.c.h.bf16 %v3393_v0  ;;  %v3826_v15 = vld [vmem:[%s3810_s20 + $0x18] sm:$0xff]   ;;  %v3859_v47 = vld [vmem:[%s3810_s20 + $0x20] sm:$0xff]   ;;  %v3877_v59 = vld [vmem:[%s3810_s20 + $0x28] sm:$0xff]   ;;  %s5427_s30 = scalar_lea.vmem %s5626_s10, %s3804_s17 }
  0x11   : > { %v3332_v10 = vunpack.c.h.bf16 %v3330_v1  ;;  %v3340_v11 = vunpack.c.h.bf16 %v3815_v2  ;;  %v3343_v16 = vunpack.c.l.bf16 %v3826_v15  ;;  %v3344_v37 = vunpack.c.h.bf16 %v3826_v15 }
  0x12   : > { %v546_v6 = vsel %vm539_vm0, %v3335_v3, 0.0  ;;  %v540_v7 = vsel %vm539_vm0, %v3331_v4, 0.0  ;;  %v552_v8 = vsel %vm539_vm0, %v3339_v5, 0.0  ;;  %v549_v12 = vsel %vm539_vm0, %v3336_v9, 0.0 }
  0x13   : > { %547 = vadd.xlane.f32.xlu1 %v546_v6  ;;  %541 = vadd.xlane.f32.xlu0 %v540_v7  ;;  %v543_v13 = vsel %vm539_vm0, %v3332_v10, 0.0  ;;  %v555_v14 = vsel %vm539_vm0, %v3340_v11, 0.0  ;;  %v558_v17 = vsel %vm539_vm0, %v3343_v16, 0.0  ;;  %v3442_v19 = vpop.eup %3441  ;;  %v561_v43 = vsel %vm539_vm0, %v3344_v37, 0.0 }
  0x14   : > { %553 = vadd.xlane.f32.xlu2 %v552_v8  ;;  %v637_v20 = vmul.f32 4.0, %v3442_v19  ;;  %vm641_vm1 = vweird.f32 %v3442_v19  ;;  %v3347_v52 = vunpack.c.l.bf16 %v3859_v47  ;;  %v3352_v62 = vunpack.c.h.bf16 %v3877_v59 }
  0x15   : > { %v3348_v63 = vunpack.c.h.bf16 %v3859_v47  ;;  %v3351_v7 = vunpack.c.l.bf16 %v3877_v59 }
  0x16   : > { %v638_v21 = vsub.f32 1.0, %v637_v20  ;;  %v564_v56 = vsel %vm539_vm0, %v3347_v52, 0.0  ;;  %v573_v2 = vsel %vm539_vm0, %v3352_v62, 0.0  ;;  %v3926_v20 = vld [vmem:[%s3810_s20 + $0x48] sm:$0xff]  }
  0x18   : > { %v639_v22 = vmul.f32 %v3442_v19, %v638_v21  ;;  %v3367_v21 = vunpack.c.l.bf16 %v3926_v20 }
  0x1a   : > { %v640_v23 = vadd.f32 %v3442_v19, %v639_v22  ;;  %v594_v22 = vsel %vm539_vm0, %v3367_v21, 0.0 }
  0x1b   : > { %550 = vadd.xlane.f32.xlu1 %v549_v12  ;;  %544 = vadd.xlane.f32.xlu0 %v543_v13  ;;  %v3912_v13 = vld [vmem:[%s3810_s20 + $0x38] sm:$0xff]  }
  0x1c   : > { %556 = vadd.xlane.f32.xlu2 %v555_v14  ;;  %v3830_v24 = vsel %vm641_vm1, %v3442_v19, %v640_v23  ;;  %v3359_v14 = vunpack.c.l.bf16 %v3912_v13 }
  0x24   : > { %559 = vadd.xlane.f32.xlu2 %v558_v17  ;;  %v3919_v17 = vld [vmem:[%s3810_s20 + $0x40] sm:$0xff]  }
  0x25   : > { %v3364_v18 = vunpack.c.h.bf16 %v3919_v17 }
  0x27   : > { %v591_v19 = vsel %vm539_vm0, %v3364_v18, 0.0 }
  0x86   : > { %v548_v25 = vpop.xlane.xlu1 %547  ;;  %v542_v26 = vpop.xlane.xlu0 %541 }
  0x87   : > { %v643_v27 = vmul.f32 %v3830_v24, %v542_v26  ;;  %v554_v29 = vpop.xlane.xlu2 %553  ;;  %v645_v38 = vmul.f32 %v3830_v24, %v548_v25 }
  0x88   : > { %v647_v36 = vmul.f32 %v3830_v24, %v554_v29  ;;  %v1333_v29 = vld [vmem:[%s5621_s5] sm:$0x3] }
  0x89   : > { %v3833_v28 = vsub.f32 %v3331_v4, %v643_v27  ;;  %v3856_v45 = vsub.f32 %v3335_v3, %v645_v38  ;;  %v567_v3 = vsel %vm539_vm0, %v3348_v63, 0.0  ;;  %v3894_v4 = vld [vmem:[%s3810_s20 + $0x30] sm:$0xff]   ;;  %v1366_v27 = vld [vmem:[%s5622_s6] sm:$0x3] }
  0x8a   : > { %v3847_v41 = vsub.f32 %v3339_v5, %v647_v36  ;;  %v3355_v6 = vunpack.c.l.bf16 %v3894_v4 }
  0x8b   : > { %v707_v30 = vmul.f32 %v3833_v28, %v3833_v28  ;;  %v709_v53 = vmul.f32 %v3856_v45, %v3856_v45 }
  0x8c   : > { %v711_v51 = vmul.f32 %v3847_v41, %v3847_v41 }
  0x8d   : > { %v739_v31 = vsel %vm539_vm0, %v707_v30, 0.0  ;;  %v745_v57 = vsel %vm539_vm0, %v709_v53, 0.0  ;;  %v1497_v30 = vsel %vm1495_vm2, %v1366_v27, 0 }
  0x8e   : > { %v551_v32 = vpop.xlane.xlu1 %550  ;;  %740 = vadd.xlane.f32.xlu0 %v739_v31  ;;  %v545_v33 = vpop.xlane.xlu0 %544  ;;  %v751_v55 = vsel %vm539_vm0, %v711_v51, 0.0  ;;  %v1637_v31 = vsel %vm1495_vm2, %v1333_v29, 0  ;;  %1506 = vmatpush.bf16.msra.mxu0 %v1497_v30 }
  0x8f   : > { %v646_v34 = vmul.f32 %v3830_v24, %v551_v32  ;;  %v644_v35 = vmul.f32 %v3830_v24, %v545_v33  ;;  %v557_v46 = vpop.xlane.xlu2 %556  ;;  %1646 = vmatpush.bf16.msra.mxu1 %v1637_v31  ;;  %v3313_v32 = vld [vmem:[%s3937_s23] sm:$0xff]  ;;  %3408 = vmatpush.bf16.msra.mxu2 %v1497_v30 }
  0x90   : > { %v648_v50 = vmul.f32 %v3830_v24, %v557_v46  ;;  %3409 = vmatpush.bf16.msra.mxu3 %v1637_v31 }
  0x91   : > { %v3843_v39 = vsub.f32 %v3336_v9, %v646_v34  ;;  %v3845_v40 = vsub.f32 %v3332_v10, %v644_v35  ;;  %v576_v9 = vsel %vm539_vm0, %v3355_v6, 0.0  ;;  %v570_v10 = vsel %vm539_vm0, %v3351_v7, 0.0  ;;  %3212 = vmatmul.msk.bf16.vlgmr.msra.gmra.mxu0 %vm539_vm0, %v3313_v32 }
  0x92   : > { %v3869_v54 = vsub.f32 %v3340_v11, %v648_v50  ;;  %v3356_v11 = vunpack.c.h.bf16 %v3894_v4 }
  0x93   : > { %v710_v42 = vmul.f32 %v3843_v39, %v3843_v39  ;;  %v708_v44 = vmul.f32 %v3845_v40, %v3845_v40 }
  0x94   : > { %v712_v60 = vmul.f32 %v3869_v54, %v3869_v54  ;;  %v579_v12 = vsel %vm539_vm0, %v3356_v11, 0.0 }
  0x95   : > { %v748_v48 = vsel %vm539_vm0, %v710_v42, 0.0  ;;  %v742_v49 = vsel %vm539_vm0, %v708_v44, 0.0 }
  0x96   : > { %749 = vadd.xlane.f32.xlu2 %v748_v48  ;;  %562 = vadd.xlane.f32.xlu0 %v561_v43  ;;  %v754_v0 = vsel %vm539_vm0, %v712_v60, 0.0 }
  0x97   : > { %743 = vadd.xlane.f32.xlu1 %v742_v49  ;;  %v560_v58 = vpop.xlane.xlu2 %559 }
  0x98   : > { %v649_v61 = vmul.f32 %v3830_v24, %v560_v58 }
  0x9a   : > { %v3885_v1 = vsub.f32 %v3343_v16, %v649_v61  ;;  %v582_v16 = vsel %vm539_vm0, %v3359_v14, 0.0 }
  0x9c   : > { %v713_v5 = vmul.f32 %v3885_v1, %v3885_v1 }
  0x9e   : > { %752 = vadd.xlane.f32.xlu2 %v751_v55  ;;  %565 = vadd.xlane.f32.xlu0 %v564_v56  ;;  %v757_v8 = vsel %vm539_vm0, %v713_v5, 0.0 }
  0x9f   : > { %746 = vadd.xlane.f32.xlu1 %v745_v57 }
  0xa6   : > { %755 = vadd.xlane.f32.xlu0 %v754_v0  ;;  %574 = vadd.xlane.f32.xlu2 %v573_v2  ;;  %v3321_v2 = vld [vmem:[%s3937_s23 + $0x40] sm:$0xff] }
  0xa7   : > { %568 = vadd.xlane.f32.xlu1 %v567_v3  ;;  %3220 = vmatmul.msk.bf16.vlgmr.msra.gmra.mxu2 %vm539_vm0, %v3321_v2 }
  0xae   : > { %758 = vadd.xlane.f32.xlu0 %v757_v8  ;;  %577 = vadd.xlane.f32.xlu2 %v576_v9 }
  0xaf   : > { %571 = vadd.xlane.f32.xlu1 %v570_v10 }
  0xb6   : > { %580 = vadd.xlane.f32.xlu0 %v579_v12 }
  0xbe   : > { %583 = vadd.xlane.f32.xlu0 %v582_v16 }
  0xc6   : > { %592 = vadd.xlane.f32.xlu0 %v591_v19 }
  0xce   : > { %595 = vadd.xlane.f32.xlu0 %v594_v22  ;;  %v3314_v22 = vld [vmem:[%s3937_s23 + $0x8] sm:$0xff] }
  0xcf   : > { %3213 = vmatmul.msk.bf16.gmra.mxu0 %vm539_vm0, %v3314_v22 }
 0x101   : > { %v741_v23 = vpop.xlane.xlu0 %740 }
 0x102   : > { %v835_v25 = vmul.f32 %v741_v23, %v3830_v24 }
 0x104   : > { %v867_v26 = vadd.f32 1e-05, %v835_v25 }
 0x106   : > { %3443 = vrsqrt.f32 %v867_v26  ;;  %vm905_vm4 = vweird.f32 %v867_v26 }
 0x109   : > { %v750_v33 = vpop.xlane.xlu2 %749  ;;  %v563_v34 = vpop.xlane.xlu0 %562 }
 0x10a   : > { %v838_v35 = vmul.f32 %v750_v33, %v3830_v24  ;;  %v744_v36 = vpop.xlane.xlu1 %743  ;;  %v650_v38 = vmul.f32 %v3830_v24, %v563_v34 }
 0x10b   : > { %v836_v42 = vmul.f32 %v744_v36, %v3830_v24  ;;  %v3360_v36 = vunpack.c.h.bf16 %v3912_v13 }
 0x10c   : > { %v3444_v43 = vpop.eup %3443  ;;  %v3952_v44 = vadd.f32 1e-05, %v838_v35  ;;  %v3956_v46 = vsub.f32 %v3344_v37, %v650_v38 }
 0x10d   : > { %v900_v48 = vmul.f32 %v3444_v43, %v867_v26  ;;  %v868_v49 = vadd.f32 1e-05, %v836_v42  ;;  %vm906_vm3 = vweird.f32 %v3444_v43 }
 0x10e   : > { %3445 = vrsqrt.f32 %v3952_v44  ;;  %v714_v50 = vmul.f32 %v3956_v46, %v3956_v46  ;;  %vm3978_vm5 = vmor %vm905_vm4, %vm906_vm3  ;;  %vm935_vm9 = vweird.f32 %v3952_v44 }
 0x10f   : > { %v901_v51 = vmul.f32 %v3444_v43, %v900_v48  ;;  %3447 = vrsqrt.f32 %v868_v49  ;;  %vm915_vm7 = vweird.f32 %v868_v49 }
 0x110   : > { %v760_v53 = vsel %vm539_vm0, %v714_v50, 0.0 }
 0x111   : > { %v902_v55 = vmul.f32 0.5, %v901_v51  ;;  %761 = vadd.xlane.f32.xlu1 %v760_v53  ;;  %v566_v56 = vpop.xlane.xlu0 %565  ;;  %v753_v57 = vpop.xlane.xlu2 %752  ;;  %v4011_v53 = vld [vmem:[%s5620_s4] ss:$0 sm:$0xff] }
 0x112   : > { %v747_v58 = vpop.xlane.xlu1 %746  ;;  %v651_v15 = vmul.f32 %v3830_v24, %v566_v56  ;;  %v839_v8 = vmul.f32 %v753_v57, %v3830_v24 }
 0x113   : > { %v903_v37 = vsub.f32 1.5, %v902_v55  ;;  %v837_v60 = vmul.f32 %v747_v58, %v3830_v24  ;;  %v585_v55 = vsel %vm539_vm0, %v3360_v36, 0.0  ;;  %v3363_v58 = vunpack.c.l.bf16 %v3919_v17 }
 0x114   : > { %v3964_v61 = vpop.eup %3445  ;;  %v3968_v0 = vsub.f32 %v3347_v52, %v651_v15  ;;  %v3987_v25 = vadd.f32 1e-05, %v839_v8  ;;  %v3322_v8 = vld [vmem:[%s3937_s23 + $0x48] sm:$0xff] }
 0x115   : > { %v3448_v3 = vpop.eup %3447  ;;  %v904_v5 = vmul.f32 %v3444_v43, %v903_v37  ;;  %v3972_v9 = vadd.f32 1e-05, %v837_v60  ;;  %v930_v10 = vmul.f32 %v3964_v61, %v3952_v44  ;;  %vm936_vm10 = vweird.f32 %v3964_v61  ;;  %3221 = vmatmul.msk.bf16.gmra.mxu2 %vm539_vm0, %v3322_v8 }
 0x116   : > { %v910_v12 = vmul.f32 %v3448_v3, %v868_v49  ;;  %v715_v19 = vmul.f32 %v3968_v0, %v3968_v0  ;;  %vm916_vm6 = vweird.f32 %v3448_v3  ;;  %vm4055_vm12 = vmor %vm935_vm9, %vm936_vm10  ;;  %vm945_vm3 = vweird.f32 %v3987_v25 }
 0x117   : > { %3449 = vrsqrt.f32 %v3972_v9  ;;  %v908_v23 = vsel %vm3978_vm5, %v3444_v43, %v904_v5  ;;  %v931_v29 = vmul.f32 %v3964_v61, %v930_v10  ;;  %vm917_vm8 = vmor %vm915_vm7, %vm916_vm6  ;;  %v4028_v5 = vld [vmem:[%s5620_s4 + $0x1] ss:$0 sm:$0xff]  ;;  %vm925_vm13 = vweird.f32 %v3972_v9 }
 0x118   : > { %v911_v16 = vmul.f32 %v3448_v3, %v910_v12  ;;  %v763_v31 = vsel %vm539_vm0, %v715_v19, 0.0  ;;  %v1219_v42 = vmul.f32 %v908_v23, %v3833_v28  ;;  %3451 = vrsqrt.f32 %v3987_v25 }
 0x119   : > { %v756_v27 = vpop.xlane.xlu0 %755  ;;  %764 = vadd.xlane.f32.xlu1 %v763_v31  ;;  %v932_v48 = vmul.f32 0.5, %v931_v29  ;;  %v575_v28 = vpop.xlane.xlu2 %574 }
 0x11a   : > { %v912_v26 = vmul.f32 0.5, %v911_v16  ;;  %v569_v30 = vpop.xlane.xlu1 %568  ;;  %v840_v32 = vmul.f32 %v756_v27, %v3830_v24  ;;  %v654_v52 = vmul.f32 %v3830_v24, %v575_v28  ;;  %v588_v27 = vsel %vm539_vm0, %v3363_v58, 0.0 }
 0x11b   : > { %v652_v33 = vmul.f32 %v3830_v24, %v569_v30  ;;  %v933_v37 = vsub.f32 1.5, %v932_v48 }
 0x11c   : > { %v913_v34 = vsub.f32 1.5, %v912_v26  ;;  %v3994_v35 = vadd.f32 1e-05, %v840_v32  ;;  %v4064_v32 = vsub.f32 %v3352_v62, %v654_v52 }
 0x11d   : > { %v3997_v38 = vpop.eup %3449  ;;  %v4003_v43 = vsub.f32 %v3348_v63, %v652_v33  ;;  %v934_v29 = vmul.f32 %v3964_v61, %v933_v37 }
 0x11e   : > { %v914_v50 = vmul.f32 %v3448_v3, %v913_v34  ;;  %v920_v51 = vmul.f32 %v3997_v38, %v3972_v9  ;;  %3453 = vrsqrt.f32 %v3994_v35  ;;  %v4031_v10 = vpop.eup %3451  ;;  %vm926_vm11 = vweird.f32 %v3997_v38  ;;  %v3315_v34 = vld [vmem:[%s3937_s23 + $0x10] sm:$0xff] }
 0x11f   : > { %v716_v47 = vmul.f32 %v4003_v43, %v4003_v43  ;;  %vm4071_vm14 = vmor %vm925_vm13, %vm926_vm11  ;;  %v938_v28 = vsel %vm4055_vm12, %v3964_v61, %v934_v29  ;;  %3214 = vmatmul.msk.bf16.gmra.mxu0 %vm539_vm0, %v3315_v34  ;;  %v3368_v61 = vunpack.c.h.bf16 %v3926_v20  ;;  %vm955_vm15 = vweird.f32 %v3994_v35 }
 0x120   : > { %v918_v63 = vsel %vm917_vm8, %v3448_v3, %v914_v50  ;;  %v921_v49 = vmul.f32 %v3997_v38, %v920_v51  ;;  %v1252_v3 = vmul.f32 %v4011_v53, %v1219_v42  ;;  %v1222_v37 = vmul.f32 %v938_v28, %v3843_v39  ;;  %v4110_v39 = vld [vmem:[%s3810_s20 + $0x50] sm:$0xff]  }
 0x121   : > { %v1220_v56 = vmul.f32 %v918_v63, %v3845_v40  ;;  %v766_v57 = vsel %vm539_vm0, %v716_v47, 0.0  ;;  %v4022_v15 = vpop.xlane.xlu0 %758  ;;  %586 = vadd.xlane.f32.xlu1 %v585_v55  ;;  %v578_v50 = vpop.xlane.xlu2 %577  ;;  %v597_v8 = vsel %vm539_vm0, %v3368_v61, 0.0  ;;  %vm946_vm4 = vweird.f32 %v4031_v10 }
 0x122   : > { %v922_v60 = vmul.f32 0.5, %v921_v49  ;;  %767 = vadd.xlane.f32.xlu2 %v766_v57  ;;  %v572_v2 = vpop.xlane.xlu1 %571  ;;  %v1285_v26 = vadd.f32 %v4028_v5, %v1252_v3  ;;  %v655_v49 = vmul.f32 %v3830_v24, %v578_v50  ;;  %v1255_v4 = vmul.f32 %v4011_v53, %v1222_v37  ;;  %vm947_vm6 = vmor %vm945_vm3, %vm946_vm4 }
 0x123   : > { %v653_v40 = vmul.f32 %v3830_v24, %v572_v2  ;;  %v1253_v12 = vmul.f32 %v4011_v53, %v1220_v56 }
 0x124   : > { %v4036_v16 = vpop.eup %3453  ;;  %v923_v19 = vsub.f32 1.5, %v922_v60  ;;  %v4101_v3 = vsub.f32 %v3355_v6, %v655_v49  ;;  %v3323_v6 = vld [vmem:[%s3937_s23 + $0x50] sm:$0xff]  ;;  %v1288_v31 = vadd.f32 %v4028_v5, %v1255_v4 }
 0x125   : > { %v950_v22 = vmul.f32 %v4036_v16, %v3994_v35  ;;  %v4045_v23 = vsub.f32 %v3351_v7, %v653_v40  ;;  %v1286_v30 = vadd.f32 %v4028_v5, %v1253_v12  ;;  %v940_v7 = vmul.f32 %v4031_v10, %v3987_v25  ;;  %3222 = vmatmul.msk.bf16.gmra.mxu2 %vm539_vm0, %v3323_v6 }
 0x126   : > { %v924_v44 = vmul.f32 %v3997_v38, %v923_v19  ;;  %vm956_vm1 = vweird.f32 %v4036_v16 }
 0x127   : > { %v717_v33 = vmul.f32 %v4045_v23, %v4045_v23  ;;  %v1317_v48 = vpack.c.bf16 %v1286_v30, %v1285_v26  ;;  %v951_v59 = vmul.f32 %v4036_v16, %v950_v22  ;;  %v941_v63 = vmul.f32 %v4031_v10, %v940_v7  ;;  %vm4128_vm5 = vmor %vm955_vm15, %vm956_vm1 }
 0x128   : > { %v928_v9 = vsel %vm4071_vm14, %v3997_v38, %v924_v44  ;;  %v718_v38 = vmul.f32 %v4064_v32, %v4064_v32  ;;  %v3371_v44 = vunpack.c.l.bf16 %v4110_v39 }
 0x129   : > { %v769_v62 = vsel %vm539_vm0, %v717_v33, 0.0  ;;  %v581_v51 = vpop.xlane.xlu0 %580  ;;  %3228 = vmatmul.msk.bf16.vlgmr.msra.gmra.mxu1 %vm539_vm0, %v1317_v48  ;;  %v1221_v55 = vmul.f32 %v928_v9, %v3856_v45  ;;  %v952_v57 = vmul.f32 0.5, %v951_v59  ;;  %v942_v2 = vmul.f32 0.5, %v941_v63 }
 0x12a   : > { %589 = vadd.xlane.f32.xlu2 %v588_v27  ;;  %v656_v47 = vmul.f32 %v3830_v24, %v581_v51  ;;  %770 = vadd.xlane.f32.xlu1 %v769_v62  ;;  %v772_v45 = vsel %vm539_vm0, %v718_v38, 0.0  ;;  %v719_v27 = vmul.f32 %v4101_v3, %v4101_v3  ;;  %v600_v34 = vsel %vm539_vm0, %v3371_v44, 0.0  ;;  %v3324_v38 = vld [vmem:[%s3937_s23 + $0x58] sm:$0xff] }
 0x12b   : > { %v953_v12 = vsub.f32 1.5, %v952_v57  ;;  %v943_v22 = vsub.f32 1.5, %v942_v2  ;;  %v3372_v62 = vunpack.c.h.bf16 %v4110_v39  ;;  %v4175_v2 = vld [vmem:[%s3810_s20 + $0x60] sm:$0xff]  }
 0x12c   : > { %v4094_v56 = vsub.f32 %v3356_v11, %v656_v47  ;;  %v1254_v11 = vmul.f32 %v4011_v53, %v1221_v55  ;;  %v775_v33 = vsel %vm539_vm0, %v719_v27, 0.0  ;;  %v3327_v27 = vld [vmem:[%s3937_s23 + $0x70] sm:$0xff] }
 0x12d   : > { %v954_v35 = vmul.f32 %v4036_v16, %v953_v12  ;;  %v603_v63 = vsel %vm539_vm0, %v3372_v62, 0.0  ;;  %v3326_v12 = vld [vmem:[%s3937_s23 + $0x68] sm:$0xff] }
 0x12e   : > { %v720_v60 = vmul.f32 %v4094_v56, %v4094_v56  ;;  %v1287_v29 = vadd.f32 %v4028_v5, %v1254_v11 }
 0x12f   : > { %v958_v48 = vsel %vm4128_vm5, %v4036_v16, %v954_v35 }
 0x130   : > { %v778_v40 = vsel %vm539_vm0, %v720_v60, 0.0  ;;  %v1318_v25 = vpack.c.bf16 %v1288_v31, %v1287_v29  ;;  %v1224_v51 = vmul.f32 %v958_v48, %v3869_v54 }
 0x131   : > { %779 = vadd.xlane.f32.xlu0 %v778_v40  ;;  %v584_v52 = vpop.xlane.xlu0 %583  ;;  %v3325_v40 = vld [vmem:[%s3937_s23 + $0x60] sm:$0xff] }
 0x132   : > { %773 = vadd.xlane.f32.xlu2 %v772_v45  ;;  %v657_v19 = vmul.f32 %v3830_v24, %v584_v52  ;;  %598 = vadd.xlane.f32.xlu1 %v597_v8  ;;  %v4188_v52 = vld [vmem:[%s3810_s20 + $0x68] sm:$0xff]  }
 0x133   : > { %v3383_v4 = vunpack.c.l.bf16 %v4188_v52 }
 0x134   : > { %v4123_v26 = vsub.f32 %v3359_v14, %v657_v19  ;;  %v944_v14 = vmul.f32 %v4031_v10, %v943_v22  ;;  %v841_v19 = vmul.f32 %v4022_v15, %v3830_v24 }
 0x135   : > { %3223 = vmatmul.msk.bf16.gmra.mxu2 %vm539_vm0, %v3324_v38  ;;  %v618_v6 = vsel %vm539_vm0, %v3383_v4, 0.0 }
 0x136   : > { %v721_v7 = vmul.f32 %v4123_v26, %v4123_v26  ;;  %v948_v59 = vsel %vm947_vm6, %v4031_v10, %v944_v14  ;;  %v1257_v10 = vmul.f32 %v4011_v53, %v1224_v51  ;;  %v873_v22 = vadd.f32 1e-05, %v841_v19 }
 0x137   : > { %v1223_v16 = vmul.f32 %v948_v59, %v3847_v41 }
 0x138   : > { %v781_v42 = vsel %vm539_vm0, %v721_v7, 0.0  ;;  %v1290_v55 = vadd.f32 %v4028_v5, %v1257_v10  ;;  %3455 = vrsqrt.f32 %v873_v22  ;;  %v3316_v7 = vld [vmem:[%s3937_s23 + $0x18] sm:$0xff]  ;;  %vm965_vm7 = vweird.f32 %v873_v22 }
 0x139   : > { %782 = vadd.xlane.f32.xlu0 %v781_v42  ;;  %v593_v50 = vpop.xlane.xlu0 %592  ;;  %3229 = vmatmul.msk.bf16.gmra.mxu1 %vm539_vm0, %v1318_v25 }
 0x13a   : > { %776 = vadd.xlane.f32.xlu2 %v775_v33  ;;  %v660_v9 = vmul.f32 %v3830_v24, %v593_v50  ;;  %601 = vadd.xlane.f32.xlu1 %v600_v34  ;;  %v3328_v33 = vld [vmem:[%s3937_s23 + $0x78] sm:$0xff] }
 0x13b   : > { %3215 = vmatmul.msk.bf16.gmra.mxu0 %vm539_vm0, %v3316_v7 }
 0x13c   : > { %v4152_v28 = vsub.f32 %v3364_v18, %v660_v9  ;;  %v1256_v18 = vmul.f32 %v4011_v53, %v1223_v16 }
 0x13e   : > { %v724_v47 = vmul.f32 %v4152_v28, %v4152_v28  ;;  %v1289_v37 = vadd.f32 %v4028_v5, %v1256_v18  ;;  %v3456_v29 = vpop.eup %3455  ;;  %v3317_v18 = vld [vmem:[%s3937_s23 + $0x20] sm:$0xff] }
 0x13f   : > { %v960_v35 = vmul.f32 %v3456_v29, %v873_v22  ;;  %vm966_vm8 = vweird.f32 %v3456_v29 }
 0x140   : > { %v790_v49 = vsel %vm539_vm0, %v724_v47, 0.0  ;;  %v1319_v45 = vpack.c.bf16 %v1290_v55, %v1289_v37  ;;  %vm4204_vm9 = vmor %vm965_vm7, %vm966_vm8 }
 0x141   : > { %791 = vadd.xlane.f32.xlu0 %v790_v49  ;;  %v596_v54 = vpop.xlane.xlu0 %595  ;;  %v961_v30 = vmul.f32 %v3456_v29, %v960_v35  ;;  %v4240_v35 = vpop.f32.mrf.mxu0 }
 0x142   : > { %604 = vadd.xlane.f32.xlu2 %v603_v63  ;;  %v661_v41 = vmul.f32 %v3830_v24, %v596_v54  ;;  %v1777_v63 = vld [vmem:[%s5623_s7] sm:$0x3] }
 0x143   : > { %v962_v34 = vmul.f32 0.5, %v961_v30  ;;  %v1828_v10 = vsel %vm1495_vm2, %v1777_v63, 0 }
 0x144   : > { %v4168_v57 = vsub.f32 %v3367_v21, %v661_v41  ;;  %v3380_v21 = vunpack.c.h.bf16 %v4175_v2  ;;  %1837 = vmatpush.bf16.msrb.mxu2 %v1828_v10 }
 0x145   : > { %3224 = vmatmul.msk.bf16.gmra.mxu2 %vm539_vm0, %v3325_v40  ;;  %v963_v15 = vsub.f32 1.5, %v962_v34 }
 0x146   : > { %v725_v60 = vmul.f32 %v4168_v57, %v4168_v57  ;;  %v615_v11 = vsel %vm539_vm0, %v3380_v21, 0.0 }
 0x147   : > { %v964_v9 = vmul.f32 %v3456_v29, %v963_v15 }
 0x148   : > { %v793_v8 = vsel %vm539_vm0, %v725_v60, 0.0 }
 0x149   : > { %794 = vadd.xlane.f32.xlu0 %v793_v8  ;;  %3230 = vmatmul.msk.bf16.gmra.mxu1 %vm539_vm0, %v1319_v45  ;;  %v968_v49 = vsel %vm4204_vm9, %v3456_v29, %v964_v9  ;;  %v4238_v29 = vld [vmem:[%s3810_s20 + $0x58] sm:$0xff]  }
 0x14a   : > { %v1225_v60 = vmul.f32 %v968_v49, %v3885_v1 }
 0x14b   : > { %3216 = vmatmul.msk.bf16.gmra.mxu0 %vm539_vm0, %v3317_v18 }
 0x151   : > { %616 = vadd.xlane.f32.xlu0 %v615_v11 }
 0x155   : > { %3225 = vmatmul.msk.bf16.gmra.mxu2 %vm539_vm0, %v3326_v12 }
 0x159   : > { %619 = vadd.xlane.f32.xlu0 %v618_v6 }
 0x165   : > { %3226 = vmatmul.msk.bf16.gmra.mxu2 %vm539_vm0, %v3327_v27  ;;  %v1258_v27 = vmul.f32 %v4011_v53, %v1225_v60 }
 0x167   : > { %v1291_v34 = vadd.f32 %v4028_v5, %v1258_v27 }
 0x175   : > { %3227 = vmatmul.msk.bf16.gmra.mxu2 %vm539_vm0, %v3328_v33  ;;  %v3375_v33 = vunpack.c.l.bf16 %v4238_v29 }
 0x177   : > { %v606_v63 = vsel %vm539_vm0, %v3375_v33, 0.0 }
 0x184   : > { %v762_v31 = vpop.xlane.xlu1 %761 }
 0x185   : > { %v842_v14 = vmul.f32 %v762_v31, %v3830_v24 }
 0x187   : > { %v874_v25 = vadd.f32 1e-05, %v842_v14 }
 0x189   : > { %3457 = vrsqrt.f32 %v874_v25  ;;  %vm975_vm11 = vweird.f32 %v874_v25 }
 0x18c   : > { %v765_v42 = vpop.xlane.xlu1 %764 }
 0x18d   : > { %v843_v50 = vmul.f32 %v765_v42, %v3830_v24 }
 0x18f   : > { %v3458_v48 = vpop.eup %3457  ;;  %v4208_v16 = vadd.f32 1e-05, %v843_v50 }
 0x190   : > { %v970_v59 = vmul.f32 %v3458_v48, %v874_v25  ;;  %vm976_vm10 = vweird.f32 %v3458_v48 }
 0x191   : > { %3459 = vrsqrt.f32 %v4208_v16  ;;  %vm977_vm12 = vmor %vm975_vm11, %vm976_vm10  ;;  %vm985_vm14 = vweird.f32 %v4208_v16 }
 0x192   : > { %v971_v47 = vmul.f32 %v3458_v48, %v970_v59 }
 0x194   : > { %v972_v54 = vmul.f32 0.5, %v971_v47  ;;  %v587_v37 = vpop.xlane.xlu1 %586 }
 0x195   : > { %v768_v38 = vpop.xlane.xlu2 %767  ;;  %v658_v45 = vmul.f32 %v3830_v24, %v587_v37 }
 0x196   : > { %v973_v41 = vsub.f32 1.5, %v972_v54  ;;  %v844_v55 = vmul.f32 %v768_v38, %v3830_v24  ;;  %v3318_v54 = vld [vmem:[%s3937_s23 + $0x28] sm:$0xff] }
 0x197   : > { %v4224_v40 = vpop.eup %3459  ;;  %v4228_v12 = vsub.f32 %v3360_v36, %v658_v45  ;;  %3217 = vmatmul.msk.bf16.gmra.mxu0 %vm539_vm0, %v3318_v54 }
 0x198   : > { %v974_v8 = vmul.f32 %v3458_v48, %v973_v41  ;;  %v4222_v11 = vadd.f32 1e-05, %v844_v55  ;;  %v980_v19 = vmul.f32 %v4224_v40, %v4208_v16  ;;  %vm986_vm13 = vweird.f32 %v4224_v40  ;;  %v1510_v55 = vpop.f32.mrf.mxu0 }
 0x199   : > { %v722_v22 = vmul.f32 %v4228_v12, %v4228_v12  ;;  %vm4270_vm15 = vmor %vm985_vm14, %vm986_vm13 }
 0x19a   : > { %v978_v6 = vsel %vm977_vm12, %v3458_v48, %v974_v8  ;;  %3461 = vrsqrt.f32 %v4222_v11  ;;  %v981_v13 = vmul.f32 %v4224_v40, %v980_v19  ;;  %v3376_v8 = vunpack.c.h.bf16 %v4238_v29 }
 0x19b   : > { %v1226_v1 = vmul.f32 %v978_v6, %v3956_v46  ;;  %v784_v30 = vsel %vm539_vm0, %v722_v22, 0.0  ;;  %vm995_vm3 = vweird.f32 %v4222_v11 }
 0x19c   : > { %v982_v7 = vmul.f32 0.5, %v981_v13  ;;  %785 = vadd.xlane.f32.xlu1 %v784_v30 }
 0x19d   : > { %v590_v36 = vpop.xlane.xlu2 %589  ;;  %v1259_v31 = vmul.f32 %v4011_v53, %v1226_v1  ;;  %v771_v46 = vpop.xlane.xlu1 %770 }
 0x19e   : > { %v659_v14 = vmul.f32 %v3830_v24, %v590_v36  ;;  %v845_v25 = vmul.f32 %v771_v46, %v3830_v24  ;;  %v983_v48 = vsub.f32 1.5, %v982_v7  ;;  %v609_v7 = vsel %vm539_vm0, %v3376_v8, 0.0 }
 0x19f   : > { %v1292_v15 = vadd.f32 %v4028_v5, %v1259_v31 }
 0x1a0   : > { %v3462_v42 = vpop.eup %3461  ;;  %v4252_v50 = vsub.f32 %v3363_v58, %v659_v14  ;;  %v4255_v59 = vadd.f32 1e-05, %v845_v25  ;;  %v984_v10 = vmul.f32 %v4224_v40, %v983_v48  ;;  %v4310_v25 = vld [vmem:[%s5620_s4 + $0x2] ss:$0 sm:$0xff] }
 0x1a1   : > { %v990_v9 = vmul.f32 %v3462_v42, %v4222_v11  ;;  %v1320_v51 = vpack.c.bf16 %v1292_v15, %v1291_v34  ;;  %vm996_vm1 = vweird.f32 %v3462_v42 }
 0x1a2   : > { %v723_v47 = vmul.f32 %v4252_v50, %v4252_v50  ;;  %3463 = vrsqrt.f32 %v4255_v59  ;;  %v988_v16 = vsel %vm4270_vm15, %v4224_v40, %v984_v10  ;;  %vm997_vm4 = vmor %vm995_vm3, %vm996_vm1  ;;  %vm1005_vm5 = vweird.f32 %v4255_v59 }
 0x1a3   : > { %v991_v49 = vmul.f32 %v3462_v42, %v990_v9  ;;  %3231 = vmatmul.msk.bf16.gmra.mxu1 %vm539_vm0, %v1320_v51  ;;  %v1227_v40 = vmul.f32 %v988_v16, %v3968_v0  ;;  %v3319_v16 = vld [vmem:[%s3937_s23 + $0x30] sm:$0xff] }
 0x1a4   : > { %v787_v17 = vsel %vm539_vm0, %v723_v47, 0.0  ;;  %v780_v58 = vpop.xlane.xlu0 %779  ;;  %607 = vadd.xlane.f32.xlu1 %v606_v63 }
 0x1a5   : > { %v992_v18 = vmul.f32 0.5, %v991_v49  ;;  %788 = vadd.xlane.f32.xlu2 %v787_v17  ;;  %v774_v38 = vpop.xlane.xlu2 %773  ;;  %v848_v41 = vmul.f32 %v780_v58, %v3830_v24  ;;  %v599_v45 = vpop.xlane.xlu1 %598 }
 0x1a6   : > { %v846_v60 = vmul.f32 %v774_v38, %v3830_v24  ;;  %v662_v19 = vmul.f32 %v3830_v24, %v599_v45  ;;  %v1648_v1 = vpop.f32.mrf.mxu1  ;;  %v1513_v49 = vpop.f32.mrf.mxu0 }
 0x1a7   : > { %v993_v6 = vsub.f32 1.5, %v992_v18  ;;  %v4281_v22 = vadd.f32 1e-05, %v848_v41  ;;  %v1649_v46 = vadd.f32 %v1648_v1, %v4240_v35  ;;  %3218 = vmatmul.msk.bf16.gmra.mxu0 %vm539_vm0, %v3319_v16 }
 0x1a8   : > { %v4283_v27 = vadd.f32 1e-05, %v846_v60  ;;  %v4285_v13 = vpop.eup %3463  ;;  %v4290_v30 = vsub.f32 %v3368_v61, %v662_v19  ;;  %v3379_v61 = vunpack.c.l.bf16 %v4175_v2 }
 0x1a9   : > { %v994_v36 = vmul.f32 %v3462_v42, %v993_v6  ;;  %3465 = vrsqrt.f32 %v4281_v22  ;;  %v1000_v31 = vmul.f32 %v4285_v13, %v4255_v59  ;;  %vm1006_vm6 = vweird.f32 %v4285_v13 }
 0x1aa   : > { %3467 = vrsqrt.f32 %v4283_v27  ;;  %v726_v20 = vmul.f32 %v4290_v30, %v4290_v30  ;;  %v612_v10 = vsel %vm539_vm0, %v3379_v61, 0.0  ;;  %v1729_v38 = vadd.f32 %v4310_v25, %v1649_v46  ;;  %vm4338_vm7 = vmor %vm1005_vm5, %vm1006_vm6 }
 0x1ab   : > { %v998_v11 = vsel %vm997_vm4, %v3462_v42, %v994_v36  ;;  %v1001_v0 = vmul.f32 %v4285_v13, %v1000_v31  ;;  %vm1015_vm8 = vweird.f32 %v4283_v27  ;;  %vm1035_vm11 = vweird.f32 %v4281_v22 }
 0x1ac   : > { %v1228_v14 = vmul.f32 %v998_v11, %v4003_v43  ;;  %v796_v15 = vsel %vm539_vm0, %v726_v20, 0.0  ;;  %v1260_v43 = vmul.f32 %v4011_v53, %v1227_v40 }
 0x1ad   : > { %610 = vadd.xlane.f32.xlu2 %v609_v7  ;;  %v777_v34 = vpop.xlane.xlu2 %776  ;;  %v1002_v42 = vmul.f32 0.5, %v1001_v0  ;;  %797 = vadd.xlane.f32.xlu1 %v796_v15  ;;  %v602_v9 = vpop.xlane.xlu1 %601 }
 0x1ae   : > { %v847_v48 = vmul.f32 %v777_v34, %v3830_v24  ;;  %v663_v35 = vmul.f32 %v3830_v24, %v602_v9  ;;  %v1650_v47 = vpop.f32.mrf.mxu1  ;;  %v1261_v63 = vmul.f32 %v4011_v53, %v1228_v14  ;;  %v1293_v45 = vadd.f32 %v4028_v5, %v1260_v43  ;;  %v4356_v15 = vpop.xlane.xlu0 %782 }
 0x1af   : > { %v4315_v51 = vpop.eup %3465  ;;  %v1003_v58 = vsub.f32 1.5, %v1002_v42  ;;  %v1651_v37 = vadd.f32 %v1650_v47, %v1510_v55  ;;  %v1515_v47 = vpop.f32.mrf.mxu0 }
 0x1b0   : > { %v3468_v17 = vpop.eup %3467  ;;  %v4324_v54 = vadd.f32 1e-05, %v847_v48  ;;  %v4330_v41 = vsub.f32 %v3371_v44, %v663_v35  ;;  %v1030_v59 = vmul.f32 %v4315_v51, %v4281_v22  ;;  %v1294_v44 = vadd.f32 %v4028_v5, %v1261_v63 }
 0x1b1   : > { %v1010_v18 = vmul.f32 %v3468_v17, %v4283_v27  ;;  %v1004_v60 = vmul.f32 %v4285_v13, %v1003_v58  ;;  %v1730_v1 = vadd.f32 %v4310_v25, %v1651_v37  ;;  %vm1016_vm9 = vweird.f32 %v3468_v17 }
 0x1b2   : > { %3469 = vrsqrt.f32 %v4324_v54  ;;  %v727_v55 = vmul.f32 %v4330_v41, %v4330_v41  ;;  %v1321_v31 = vpack.c.bf16 %v1294_v44, %v1293_v45  ;;  %v1031_v20 = vmul.f32 %v4315_v51, %v1030_v59  ;;  %vm1017_vm10 = vmor %vm1015_vm8, %vm1016_vm9  ;;  %v4378_v45 = vld [vmem:[%s3810_s20 + $0x70] sm:$0xff]  }
 0x1b3   : > { %v1011_v19 = vmul.f32 %v3468_v17, %v1010_v18  ;;  %v1761_v40 = vpack.c.bf16 %v1730_v1, %v1729_v38  ;;  %v1008_v11 = vsel %vm4338_vm7, %v4285_v13, %v1004_v60  ;;  %v3384_v35 = vunpack.c.h.bf16 %v4188_v52 }
 0x1b4   : > { %v799_v0 = vsel %vm539_vm0, %v727_v55, 0.0  ;;  %3232 = vmatmul.msk.bf16.gmra.mxu1 %vm539_vm0, %v1321_v31  ;;  %v1229_v48 = vmul.f32 %v1008_v11, %v4045_v23  ;;  %v1032_v63 = vmul.f32 0.5, %v1031_v20  ;;  %vm1036_vm12 = vweird.f32 %v4315_v51 }
 0x1b5   : > { %v1012_v36 = vmul.f32 0.5, %v1011_v19  ;;  %613 = vadd.xlane.f32.xlu2 %v612_v10  ;;  %v605_v7 = vpop.xlane.xlu2 %604  ;;  %3244 = vmatmul.msk.bf16.vlgmr.msrb.gmra.mxu2 %vm539_vm0, %v1761_v40  ;;  %v621_v23 = vsel %vm539_vm0, %v3384_v35, 0.0  ;;  %vm1025_vm13 = vweird.f32 %v4324_v54  ;;  %v3387_v1 = vunpack.c.l.bf16 %v4378_v45  ;;  %vm4387_vm15 = vmor %vm1035_vm11, %vm1036_vm12 }
 0x1b6   : > { %v664_v14 = vmul.f32 %v3830_v24, %v605_v7  ;;  %v1653_v34 = vpop.f32.mrf.mxu1  ;;  %800 = vadd.xlane.f32.xlu1 %v799_v0  ;;  %v1262_v38 = vmul.f32 %v4011_v53, %v1229_v48  ;;  %v1033_v37 = vsub.f32 1.5, %v1032_v63  ;;  %v792_v16 = vpop.xlane.xlu0 %791 }
 0x1b7   : > { %v1013_v46 = vsub.f32 1.5, %v1012_v36  ;;  %v1654_v60 = vadd.f32 %v1653_v34, %v1513_v49  ;;  %v1518_v31 = vpop.f32.mrf.mxu0  ;;  %v624_v11 = vsel %vm539_vm0, %v3387_v1, 0.0 }
 0x1b8   : > { %v3470_v42 = vpop.eup %3469  ;;  %v4363_v13 = vsub.f32 %v3372_v62, %v664_v14  ;;  %v1295_v49 = vadd.f32 %v4028_v5, %v1262_v38  ;;  %v1034_v55 = vmul.f32 %v4315_v51, %v1033_v37 }
 0x1b9   : > { %v1014_v9 = vmul.f32 %v3468_v17, %v1013_v46  ;;  %v1020_v43 = vmul.f32 %v3470_v42, %v4324_v54  ;;  %vm1026_vm14 = vweird.f32 %v3470_v42  ;;  %v1731_v36 = vadd.f32 %v4310_v25, %v1654_v60 }
 0x1ba   : > { %v728_v10 = vmul.f32 %v4363_v13, %v4363_v13  ;;  %vm1027_vm1 = vmor %vm1025_vm13, %vm1026_vm14  ;;  %v1038_v14 = vsel %vm4387_vm15, %v4315_v51, %v1034_v55 }
 0x1bb   : > { %v1018_v27 = vsel %vm1017_vm10, %v3468_v17, %v1014_v9  ;;  %v1021_v58 = vmul.f32 %v3470_v42, %v1020_v43  ;;  %v1232_v48 = vmul.f32 %v1038_v14, %v4094_v56 }
 0x1bc   : > { %v1230_v39 = vmul.f32 %v1018_v27, %v4064_v32  ;;  %v802_v62 = vsel %vm539_vm0, %v728_v10, 0.0 }
 0x1bd   : > { %v1022_v18 = vmul.f32 0.5, %v1021_v58  ;;  %803 = vadd.xlane.f32.xlu2 %v802_v62 }
 0x1be   : > { %v1263_v59 = vmul.f32 %v4011_v53, %v1230_v39  ;;  %v1655_v32 = vpop.f32.mrf.mxu1  ;;  %622 = vadd.xlane.f32.xlu1 %v621_v23  ;;  %v795_v46 = vpop.xlane.xlu0 %794 }
 0x1bf   : > { %v1023_v17 = vsub.f32 1.5, %v1022_v18  ;;  %v1656_v6 = vadd.f32 %v1655_v32, %v1515_v47  ;;  %v1520_v9 = vpop.f32.mrf.mxu0 }
 0x1c0   : > { %v1296_v19 = vadd.f32 %v4028_v5, %v1263_v59 }
 0x1c1   : > { %v1024_v44 = vmul.f32 %v3470_v42, %v1023_v17  ;;  %v1732_v54 = vadd.f32 %v4310_v25, %v1656_v6  ;;  %v849_v6 = vmul.f32 %v4356_v15, %v3830_v24 }
 0x1c2   : > { %v1322_v40 = vpack.c.bf16 %v1296_v19, %v1295_v49  ;;  %v852_v49 = vmul.f32 %v792_v16, %v3830_v24 }
 0x1c3   : > { %v1762_v7 = vpack.c.bf16 %v1732_v54, %v1731_v36  ;;  %v1028_v20 = vsel %vm1027_vm1, %v3470_v42, %v1024_v44  ;;  %v1265_v42 = vmul.f32 %v4011_v53, %v1232_v48  ;;  %v881_v19 = vadd.f32 1e-05, %v849_v6  ;;  %v3320_v54 = vld [vmem:[%s3937_s23 + $0x38] sm:$0xff] }
 0x1c4   : > { %3233 = vmatmul.msk.bf16.gmra.mxu1 %vm539_vm0, %v1322_v40  ;;  %v1231_v34 = vmul.f32 %v1028_v20, %v4101_v3  ;;  %v884_v44 = vadd.f32 1e-05, %v852_v49  ;;  %3219 = vmatmul.msk.bf16.gmra.mxu0 %vm539_vm0, %v3320_v54 }
 0x1c5   : > { %3245 = vmatmul.msk.bf16.gmra.mxu2 %vm539_vm0, %v1762_v7  ;;  %v1298_v39 = vadd.f32 %v4028_v5, %v1265_v42  ;;  %3471 = vrsqrt.f32 %v881_v19  ;;  %vm1045_vm3 = vweird.f32 %v881_v19 }
 0x1c6   : > { %v1658_v0 = vpop.f32.mrf.mxu1  ;;  %625 = vadd.xlane.f32.xlu1 %v624_v11  ;;  %v1264_v43 = vmul.f32 %v4011_v53, %v1231_v34  ;;  %v617_v10 = vpop.xlane.xlu0 %616  ;;  %3473 = vrsqrt.f32 %v884_v44  ;;  %v853_v11 = vmul.f32 %v795_v46, %v3830_v24  ;;  %vm1075_vm6 = vweird.f32 %v884_v44 }
 0x1c7   : > { %v1659_v47 = vadd.f32 %v1658_v0, %v1518_v31  ;;  %v668_v27 = vmul.f32 %v3830_v24, %v617_v10  ;;  %v1523_v20 = vpop.f32.mrf.mxu0 }
 0x1c8   : > { %v1297_v58 = vadd.f32 %v4028_v5, %v1264_v43  ;;  %v4438_v34 = vadd.f32 1e-05, %v853_v11 }
 0x1c9   : > { %v1733_v62 = vadd.f32 %v4310_v25, %v1659_v47  ;;  %v4412_v56 = vsub.f32 %v3380_v21, %v668_v27 }
 0x1ca   : > { %v1323_v38 = vpack.c.bf16 %v1298_v39, %v1297_v58 }
 0x1cb   : > { %v732_v23 = vmul.f32 %v4412_v56, %v4412_v56  ;;  %v3472_v55 = vpop.eup %3471 }
 0x1cc   : > { %v1040_v22 = vmul.f32 %v3472_v55, %v881_v19  ;;  %vm1046_vm4 = vweird.f32 %v3472_v55 }
 0x1cd   : > { %v814_v37 = vsel %vm539_vm0, %v732_v23, 0.0  ;;  %vm4443_vm5 = vmor %vm1045_vm3, %vm1046_vm4  ;;  %vm1085_vm3 = vweird.f32 %v4438_v34 }
 0x1ce   : > { %v1660_v63 = vpop.f32.mrf.mxu1  ;;  %815 = vadd.xlane.f32.xlu1 %v814_v37  ;;  %v620_v60 = vpop.xlane.xlu0 %619  ;;  %v1041_v36 = vmul.f32 %v3472_v55, %v1040_v22 }
 0x1cf   : > { %v1661_v51 = vadd.f32 %v1660_v63, %v1520_v9  ;;  %v669_v59 = vmul.f32 %v3830_v24, %v620_v60  ;;  %v1525_v39 = vpop.f32.mrf.mxu0 }
 0x1d0   : > { %v1042_v31 = vmul.f32 0.5, %v1041_v36 }
 0x1d1   : > { %v1734_v3 = vadd.f32 %v4310_v25, %v1661_v51  ;;  %v4422_v21 = vsub.f32 %v3383_v4, %v669_v59  ;;  %v4430_v4 = vpop.eup %3473 }
 0x1d2   : > { %v1070_v7 = vmul.f32 %v4430_v4, %v884_v44  ;;  %v1043_v14 = vsub.f32 1.5, %v1042_v31  ;;  %vm1076_vm7 = vweird.f32 %v4430_v4 }
 0x1d3   : > { %v1763_v18 = vpack.c.bf16 %v1734_v3, %v1733_v62  ;;  %v733_v17 = vmul.f32 %v4422_v21, %v4422_v21  ;;  %vm4467_vm8 = vmor %vm1075_vm6, %vm1076_vm7 }
 0x1d4   : > { %3234 = vmatmul.msk.bf16.gmra.mxu1 %vm539_vm0, %v1323_v38  ;;  %v1071_v0 = vmul.f32 %v4430_v4, %v1070_v7  ;;  %v1044_v42 = vmul.f32 %v3472_v55, %v1043_v14 }
 0x1d5   : > { %3246 = vmatmul.msk.bf16.gmra.mxu2 %vm539_vm0, %v1763_v18  ;;  %v817_v32 = vsel %vm539_vm0, %v733_v17, 0.0 }
 0x1d6   : > { %818 = vadd.xlane.f32.xlu1 %v817_v32  ;;  %v1072_v46 = vmul.f32 0.5, %v1071_v0  ;;  %v1048_v62 = vsel %vm4443_vm5, %v3472_v55, %v1044_v42  ;;  %v3388_v55 = vunpack.c.h.bf16 %v4378_v45 }
 0x1d7   : > { %v1233_v59 = vmul.f32 %v1048_v62, %v4123_v26  ;;  %v4495_v42 = vpop.f32.mrf.mxu0 }
 0x1d8   : > { %v1073_v3 = vsub.f32 1.5, %v1072_v46 }
 0x1da   : > { %v1074_v19 = vmul.f32 %v4430_v4, %v1073_v3 }
 0x1dc   : > { %v1078_v14 = vsel %vm4467_vm8, %v4430_v4, %v1074_v19 }
 0x20f   : > { %v786_v40 = vpop.xlane.xlu1 %785 }
 0x210   : > { %v850_v15 = vmul.f32 %v786_v40, %v3830_v24 }
 0x212   : > { %v882_v16 = vadd.f32 1e-05, %v850_v15  ;;  %v1266_v15 = vmul.f32 %v4011_v53, %v1233_v59 }
 0x214   : > { %3475 = vrsqrt.f32 %v882_v16  ;;  %vm1055_vm10 = vweird.f32 %v882_v16 }
 0x215   : > { %3477 = vrsqrt.f32 %v4438_v34 }
 0x217   : > { %v608_v43 = vpop.xlane.xlu1 %607 }
 0x218   : > { %v789_v48 = vpop.xlane.xlu2 %788  ;;  %v665_v47 = vmul.f32 %v3830_v24, %v608_v43  ;;  %v4493_v43 = vld [vmem:[%s3810_s20 + $0x78] sm:$0xff]  }
 0x219   : > { %v851_v9 = vmul.f32 %v789_v48, %v3830_v24 }
 0x21a   : > { %v3476_v51 = vpop.eup %3475  ;;  %v4451_v27 = vsub.f32 %v3375_v33, %v665_v47 }
 0x21b   : > { %v4447_v10 = vadd.f32 1e-05, %v851_v9  ;;  %v1050_v58 = vmul.f32 %v3476_v51, %v882_v16  ;;  %v4458_v38 = vpop.eup %3477  ;;  %vm1056_vm9 = vweird.f32 %v3476_v51 }
 0x21c   : > { %v729_v18 = vmul.f32 %v4451_v27, %v4451_v27  ;;  %v1080_v36 = vmul.f32 %v4458_v38, %v4438_v34  ;;  %vm1057_vm11 = vmor %vm1055_vm10, %vm1056_vm9  ;;  %vm1086_vm4 = vweird.f32 %v4458_v38 }
 0x21d   : > { %3479 = vrsqrt.f32 %v4447_v10  ;;  %v1051_v23 = vmul.f32 %v3476_v51, %v1050_v58  ;;  %v1236_v58 = vmul.f32 %v1078_v14, %v4152_v28  ;;  %vm1065_vm13 = vweird.f32 %v4447_v10  ;;  %vm4561_vm6 = vmor %vm1085_vm3, %vm1086_vm4 }
 0x21e   : > { %v805_v33 = vsel %vm539_vm0, %v729_v18, 0.0  ;;  %v1081_v0 = vmul.f32 %v4458_v38, %v1080_v36 }
 0x21f   : > { %v1052_v17 = vmul.f32 0.5, %v1051_v23  ;;  %806 = vadd.xlane.f32.xlu2 %v805_v33  ;;  %v3391_v23 = vunpack.c.l.bf16 %v4493_v43 }
 0x220   : > { %v611_v37 = vpop.xlane.xlu2 %610  ;;  %v1663_v60 = vpop.f32.mrf.mxu1 }
 0x221   : > { %v666_v32 = vmul.f32 %v3830_v24, %v611_v37  ;;  %v798_v6 = vpop.xlane.xlu1 %797  ;;  %v1053_v26 = vsub.f32 1.5, %v1052_v17  ;;  %v1664_v48 = vadd.f32 %v1663_v60, %v1523_v20  ;;  %v1299_v20 = vadd.f32 %v4028_v5, %v1266_v15 }
 0x222   : > { %v854_v49 = vmul.f32 %v798_v6, %v3830_v24  ;;  %v1082_v37 = vmul.f32 0.5, %v1081_v0  ;;  %v630_v22 = vsel %vm539_vm0, %v3391_v23, 0.0 }
 0x223   : > { %v3480_v44 = vpop.eup %3479  ;;  %v4475_v54 = vsub.f32 %v3376_v8, %v666_v32  ;;  %v1054_v7 = vmul.f32 %v3476_v51, %v1053_v26  ;;  %v627_v8 = vsel %vm539_vm0, %v3388_v55, 0.0 }
 0x224   : > { %v1060_v40 = vmul.f32 %v3480_v44, %v4447_v10  ;;  %v4478_v31 = vadd.f32 1e-05, %v854_v49  ;;  %vm1066_vm12 = vweird.f32 %v3480_v44  ;;  %v1083_v10 = vsub.f32 1.5, %v1082_v37 }
 0x225   : > { %v730_v11 = vmul.f32 %v4475_v54, %v4475_v54  ;;  %v1058_v16 = vsel %vm1057_vm11, %v3476_v51, %v1054_v7  ;;  %vm1067_vm14 = vmor %vm1065_vm13, %vm1066_vm12  ;;  %v3392_v7 = vunpack.c.h.bf16 %v4493_v43 }
 0x226   : > { %v1061_v29 = vmul.f32 %v3480_v44, %v1060_v40  ;;  %3481 = vrsqrt.f32 %v4478_v31  ;;  %v1234_v4 = vmul.f32 %v1058_v16, %v4228_v12  ;;  %v1735_v12 = vadd.f32 %v4310_v25, %v1664_v48  ;;  %v4529_v40 = vld [vmem:[%s5620_s4] ss:$0 sm:$0xff] }
 0x227   : > { %v808_v9 = vsel %vm539_vm0, %v730_v11, 0.0  ;;  %628 = vadd.xlane.f32.xlu2 %v627_v8  ;;  %vm1095_vm15 = vweird.f32 %v4478_v31  ;;  %v4533_v11 = vpop.f32.mrf.mxu2  ;;  %v1530_v8 = vpop.f32.mrf.mxu0 }
 0x228   : > { %v1062_v46 = vmul.f32 0.5, %v1061_v29  ;;  %v614_v47 = vpop.xlane.xlu2 %613  ;;  %809 = vadd.xlane.f32.xlu0 %v808_v9  ;;  %v1665_v63 = vpop.f32.mrf.mxu1  ;;  %v1267_v18 = vmul.f32 %v4011_v53, %v1234_v4  ;;  %v4542_v9 = vld [vmem:[%s5620_s4 + $0x1] ss:$0 sm:$0xff] }
 0x229   : > { %v667_v62 = vmul.f32 %v3830_v24, %v614_v47  ;;  %v1666_v3 = vadd.f32 %v1665_v63, %v1525_v39  ;;  %v801_v28 = vpop.xlane.xlu1 %800 }
 0x22a   : > { %v1063_v51 = vsub.f32 1.5, %v1062_v46  ;;  %v855_v17 = vmul.f32 %v801_v28, %v3830_v24  ;;  %v1300_v53 = vadd.f32 %v4028_v5, %v1267_v18 }
 0x22b   : > { %v4506_v33 = vsub.f32 %v3379_v61, %v667_v62  ;;  %v1736_v60 = vadd.f32 %v4310_v25, %v1666_v3  ;;  %v1084_v62 = vmul.f32 %v4458_v38, %v1083_v10 }
 0x22c   : > { %v3482_v59 = vpop.eup %3481  ;;  %v1064_v39 = vmul.f32 %v3480_v44, %v1063_v51  ;;  %v4515_v19 = vadd.f32 1e-05, %v855_v17  ;;  %v1324_v49 = vpack.c.bf16 %v1300_v53, %v1299_v20  ;;  %v633_v20 = vsel %vm539_vm0, %v3392_v7, 0.0 }
 0x22d   : > { %v1090_v32 = vmul.f32 %v3482_v59, %v4478_v31  ;;  %v1764_v6 = vpack.c.bf16 %v1736_v60, %v1735_v12  ;;  %v731_v2 = vmul.f32 %v4506_v33, %v4506_v33  ;;  %vm1096_vm1 = vweird.f32 %v3482_v59 }
 0x22e   : > { %v1068_v61 = vsel %vm1067_vm14, %v3480_v44, %v1064_v39  ;;  %3483 = vrsqrt.f32 %v4515_v19  ;;  %3235 = vmatmul.msk.bf16.gmra.mxu1 %vm539_vm0, %v1324_v49  ;;  %vm4547_vm5 = vmor %vm1095_vm15, %vm1096_vm1  ;;  %v1088_v34 = vsel %vm4561_vm6, %v4458_v38, %v1084_v62  ;;  %vm1105_vm9 = vweird.f32 %v4515_v19 }
 0x22f   : > { %v1235_v36 = vmul.f32 %v1068_v61, %v4252_v50  ;;  %v1091_v26 = vmul.f32 %v3482_v59, %v1090_v32  ;;  %3247 = vmatmul.msk.bf16.gmra.mxu2 %vm539_vm0, %v1764_v6  ;;  %v811_v5 = vsel %vm539_vm0, %v731_v2, 0.0  ;;  %v1269_v50 = vmul.f32 %v4529_v40, %v1236_v58  ;;  %631 = vadd.xlane.f32.xlu2 %v630_v22  ;;  %v4580_v53 = vpop.f32.mrf.mxu2  ;;  %v1533_v22 = vpop.f32.mrf.mxu0 }
 0x230   : > { %v804_v44 = vpop.xlane.xlu2 %803  ;;  %812 = vadd.xlane.f32.xlu0 %v811_v5  ;;  %v1237_v6 = vmul.f32 %v1088_v34, %v4168_v57 }
 0x231   : > { %v1092_v15 = vmul.f32 0.5, %v1091_v26  ;;  %v856_v14 = vmul.f32 %v804_v44, %v3830_v24  ;;  %v1268_v29 = vmul.f32 %v4529_v40, %v1235_v36  ;;  %v623_v48 = vpop.xlane.xlu1 %622  ;;  %v1668_v63 = vpop.f32.mrf.mxu1  ;;  %v1302_v58 = vadd.f32 %v4542_v9, %v1269_v50 }
 0x232   : > { %v670_v47 = vmul.f32 %v3830_v24, %v623_v48  ;;  %v1270_v50 = vmul.f32 %v4529_v40, %v1237_v6 }
 0x233   : > { %v1093_v0 = vsub.f32 1.5, %v1092_v15  ;;  %v888_v16 = vadd.f32 1e-05, %v856_v14  ;;  %v1301_v4 = vadd.f32 %v4542_v9, %v1268_v29 }
 0x234   : > { %v3484_v51 = vpop.eup %3483  ;;  %v4567_v18 = vsub.f32 %v3384_v35, %v670_v47 }
 0x235   : > { %v1094_v3 = vmul.f32 %v3482_v59, %v1093_v0  ;;  %3485 = vrsqrt.f32 %v888_v16  ;;  %v1325_v37 = vpack.c.bf16 %v1302_v58, %v1301_v4  ;;  %v1100_v28 = vmul.f32 %v3484_v51, %v4515_v19 }
 0x236   : > { %v734_v60 = vmul.f32 %v4567_v18, %v4567_v18  ;;  %vm1115_vm7 = vweird.f32 %v888_v16  ;;  %vm1106_vm10 = vweird.f32 %v3484_v51  ;;  %v1303_v4 = vadd.f32 %v4542_v9, %v1270_v50 }
 0x237   : > { %v1098_v12 = vsel %vm4547_vm5, %v3482_v59, %v1094_v3  ;;  %3236 = vmatmul.msk.bf16.vlgmr.msra.gmra.mxu3 %vm539_vm0, %v1325_v37  ;;  %v1101_v39 = vmul.f32 %v3484_v51, %v1100_v28  ;;  %v1669_v59 = vadd.f32 %v1668_v63, %v4495_v42  ;;  %v4600_v46 = vpop.f32.mrf.mxu2  ;;  %vm1107_vm12 = vmor %vm1105_vm9, %vm1106_vm10  ;;  %v1535_v63 = vpop.f32.mrf.mxu0 }
 0x238   : > { %634 = vadd.xlane.f32.xlu0 %v633_v20  ;;  %v1238_v52 = vmul.f32 %v1098_v12, %v4290_v30  ;;  %v820_v35 = vsel %vm539_vm0, %v734_v60, 0.0 }
 0x239   : > { %821 = vadd.xlane.f32.xlu2 %v820_v35  ;;  %v626_v32 = vpop.xlane.xlu1 %625  ;;  %v1670_v49 = vpop.f32.mrf.mxu1  ;;  %v1102_v38 = vmul.f32 0.5, %v1101_v39  ;;  %v1737_v42 = vadd.f32 %v4310_v25, %v1669_v59 }
 0x23a   : > { %v671_v61 = vmul.f32 %v3830_v24, %v626_v32  ;;  %v1671_v10 = vadd.f32 %v1670_v49, %v1530_v8  ;;  %v1271_v26 = vmul.f32 %v4529_v40, %v1238_v52 }
 0x23b   : > { %v3486_v17 = vpop.eup %3485  ;;  %v1103_v15 = vsub.f32 1.5, %v1102_v38 }
 0x23c   : > { %v1110_v2 = vmul.f32 %v3486_v17, %v888_v16  ;;  %v4587_v30 = vsub.f32 %v3387_v1, %v671_v61  ;;  %v1738_v5 = vadd.f32 %v4310_v25, %v1671_v10  ;;  %vm1116_vm8 = vweird.f32 %v3486_v17 }
 0x23d   : > { %v1304_v8 = vadd.f32 %v4542_v9, %v1271_v26  ;;  %vm1117_vm11 = vmor %vm1115_vm7, %vm1116_vm8  ;;  %v1104_v16 = vmul.f32 %v3484_v51, %v1103_v15 }
 0x23e   : > { %v1111_v36 = vmul.f32 %v3486_v17, %v1110_v2  ;;  %v735_v57 = vmul.f32 %v4587_v30, %v4587_v30  ;;  %v1765_v14 = vpack.c.bf16 %v1738_v5, %v1737_v42 }
 0x23f   : > { %v1326_v47 = vpack.c.bf16 %v1304_v8, %v1303_v4  ;;  %v1108_v62 = vsel %vm1107_vm12, %v3484_v51, %v1104_v16  ;;  %v4606_v28 = vpop.f32.mrf.mxu2  ;;  %v1538_v39 = vpop.f32.mrf.mxu0 }
 0x240   : > { %v1112_v44 = vmul.f32 0.5, %v1111_v36  ;;  %v823_v1 = vsel %vm539_vm0, %v735_v57, 0.0  ;;  %3248 = vmatmul.msk.bf16.gmra.mxu2 %vm539_vm0, %v1765_v14  ;;  %v1239_v20 = vmul.f32 %v1108_v62, %v4330_v41 }
 0x241   : > { %824 = vadd.xlane.f32.xlu0 %v823_v1  ;;  %v1673_v48 = vpop.f32.mrf.mxu1  ;;  %v816_v36 = vpop.xlane.xlu1 %815 }
 0x242   : > { %v1113_v29 = vsub.f32 1.5, %v1112_v44  ;;  %v1674_v3 = vadd.f32 %v1673_v48, %v1533_v22  ;;  %v1272_v52 = vmul.f32 %v4529_v40, %v1239_v20  ;;  %v860_v42 = vmul.f32 %v816_v36, %v3830_v24 }
 0x244   : > { %v1114_v0 = vmul.f32 %v3486_v17, %v1113_v29  ;;  %v1739_v60 = vadd.f32 %v4310_v25, %v1674_v3  ;;  %v1305_v41 = vadd.f32 %v4542_v9, %v1272_v52  ;;  %v4624_v57 = vadd.f32 1e-05, %v860_v42 }
 0x246   : > { %v1118_v58 = vsel %vm1117_vm11, %v3486_v17, %v1114_v0  ;;  %vm1155_vm5 = vweird.f32 %v4624_v57 }
 0x247   : > { %3237 = vmatmul.msk.bf16.gmra.mxu3 %vm539_vm0, %v1326_v47  ;;  %v1240_v19 = vmul.f32 %v1118_v58, %v4363_v13  ;;  %v4615_v59 = vpop.f32.mrf.mxu2  ;;  %v1540_v32 = vpop.f32.mrf.mxu0 }
 0x249   : > { %v1675_v31 = vpop.f32.mrf.mxu1  ;;  %v1273_v12 = vmul.f32 %v4529_v40, %v1240_v19 }
 0x24a   : > { %v1676_v37 = vadd.f32 %v1675_v31, %v1535_v63  ;;  %v819_v63 = vpop.xlane.xlu1 %818 }
 0x24b   : > { %v1306_v51 = vadd.f32 %v4542_v9, %v1273_v12  ;;  %v861_v12 = vmul.f32 %v819_v63, %v3830_v24 }
 0x24c   : > { %v1740_v34 = vadd.f32 %v4310_v25, %v1676_v37 }
 0x24d   : > { %v1327_v17 = vpack.c.bf16 %v1306_v51, %v1305_v41 }
 0x24e   : > { %v1766_v35 = vpack.c.bf16 %v1740_v34, %v1739_v60 }
 0x24f   : > { %v4619_v10 = vpop.f32.mrf.mxu2  ;;  %v1543_v41 = vpop.f32.mrf.mxu0 }
 0x250   : > { %3249 = vmatmul.msk.bf16.gmra.mxu2 %vm539_vm0, %v1766_v35 }
 0x251   : > { %v1678_v13 = vpop.f32.mrf.mxu1 }
 0x252   : > { %v1679_v6 = vadd.f32 %v1678_v13, %v1538_v39 }
 0x254   : > { %v1741_v49 = vadd.f32 %v4310_v25, %v1679_v6 }
 0x257   : > { %3238 = vmatmul.msk.bf16.gmra.mxu3 %vm539_vm0, %v1327_v17  ;;  %v4640_v31 = vpop.f32.mrf.mxu2 }
 0x259   : > { %v1680_v2 = vpop.f32.mrf.mxu1 }
 0x25a   : > { %v1681_v61 = vadd.f32 %v1680_v2, %v1540_v32  ;;  %v4655_v32 = vadd.f32 1e-05, %v861_v12 }
 0x25c   : > { %v1742_v22 = vadd.f32 %v4310_v25, %v1681_v61 }
 0x25e   : > { %v1767_v38 = vpack.c.bf16 %v1742_v22, %v1741_v49 }
 0x260   : > { %3250 = vmatmul.msk.bf16.gmra.mxu2 %vm539_vm0, %v1767_v38 }
 0x292   : > { %v807_v26 = vpop.xlane.xlu2 %806 }
 0x293   : > { %v857_v5 = vmul.f32 %v807_v26, %v3830_v24 }
 0x295   : > { %v889_v44 = vadd.f32 1e-05, %v857_v5 }
 0x297   : > { %3487 = vrsqrt.f32 %v889_v44  ;;  %vm1125_vm14 = vweird.f32 %v889_v44 }
 0x298   : > { %3489 = vrsqrt.f32 %v4624_v57 }
 0x29a   : > { %v629_v15 = vpop.xlane.xlu2 %628 }
 0x29b   : > { %v810_v50 = vpop.xlane.xlu0 %809  ;;  %v672_v29 = vmul.f32 %v3830_v24, %v629_v15 }
 0x29c   : > { %v858_v14 = vmul.f32 %v810_v50, %v3830_v24 }
 0x29d   : > { %v3488_v8 = vpop.eup %3487  ;;  %v4631_v0 = vsub.f32 %v3388_v55, %v672_v29  ;;  %v4667_v29 = vpop.f32.mrf.mxu2 }
 0x29e   : > { %v890_v1 = vadd.f32 1e-05, %v858_v14  ;;  %v1120_v48 = vmul.f32 %v3488_v8, %v889_v44  ;;  %v4635_v47 = vpop.eup %3489  ;;  %vm1126_vm13 = vweird.f32 %v3488_v8 }
 0x29f   : > { %v736_v4 = vmul.f32 %v4631_v0, %v4631_v0  ;;  %v1150_v37 = vmul.f32 %v4635_v47, %v4624_v57  ;;  %vm1127_vm15 = vmor %vm1125_vm14, %vm1126_vm13  ;;  %vm1156_vm6 = vweird.f32 %v4635_v47  ;;  %vm1165_vm13 = vweird.f32 %v4655_v32 }
 0x2a0   : > { %3491 = vrsqrt.f32 %v890_v1  ;;  %v1121_v16 = vmul.f32 %v3488_v8, %v1120_v48  ;;  %vm1135_vm3 = vweird.f32 %v890_v1  ;;  %vm4691_vm8 = vmor %vm1155_vm5, %vm1156_vm6 }
 0x2a1   : > { %v826_v58 = vsel %vm539_vm0, %v736_v4, 0.0  ;;  %v1151_v17 = vmul.f32 %v4635_v47, %v1150_v37 }
 0x2a2   : > { %v1122_v19 = vmul.f32 0.5, %v1121_v16  ;;  %v632_v3 = vpop.xlane.xlu2 %631  ;;  %827 = vadd.xlane.f32.xlu1 %v826_v58  ;;  %v1545_v58 = vpop.f32.mrf.mxu0 }
 0x2a3   : > { %v813_v62 = vpop.xlane.xlu0 %812  ;;  %v673_v45 = vmul.f32 %v3830_v24, %v632_v3  ;;  %v1152_v26 = vmul.f32 0.5, %v1151_v17  ;;  %v1935_v17 = vld [vmem:[%s454_s28] sm:$0xf] }
 0x2a4   : > { %v859_v20 = vmul.f32 %v813_v62, %v3830_v24  ;;  %v1123_v60 = vsub.f32 1.5, %v1122_v19 }
 0x2a5   : > { %v4649_v52 = vsub.f32 %v3391_v23, %v673_v45  ;;  %v1153_v16 = vsub.f32 1.5, %v1152_v26 }
 0x2a6   : > { %v3492_v55 = vpop.eup %3491  ;;  %v4645_v34 = vadd.f32 1e-05, %v859_v20  ;;  %v1124_v35 = vmul.f32 %v3488_v8, %v1123_v60 }
 0x2a7   : > { %v1130_v39 = vmul.f32 %v3492_v55, %v890_v1  ;;  %v737_v13 = vmul.f32 %v4649_v52, %v4649_v52  ;;  %vm1136_vm1 = vweird.f32 %v3492_v55  ;;  %v1154_v57 = vmul.f32 %v4635_v47, %v1153_v16 }
 0x2a8   : > { %3493 = vrsqrt.f32 %v4645_v34  ;;  %v1128_v6 = vsel %vm1127_vm15, %v3488_v8, %v1124_v35  ;;  %vm1137_vm4 = vmor %vm1135_vm3, %vm1136_vm1  ;;  %vm1145_vm9 = vweird.f32 %v4645_v34 }
 0x2a9   : > { %v1131_v51 = vmul.f32 %v3492_v55, %v1130_v39  ;;  %v829_v61 = vsel %vm539_vm0, %v737_v13, 0.0  ;;  %3495 = vrsqrt.f32 %v4655_v32  ;;  %v1241_v42 = vmul.f32 %v1128_v6, %v4451_v27 }
 0x2aa   : > { %830 = vadd.xlane.f32.xlu2 %v829_v61  ;;  %v1989_v61 = vsel %vm539_vm0, %v1935_v17, 0 }
 0x2ab   : > { %v1132_v2 = vmul.f32 0.5, %v1131_v51  ;;  %v635_v23 = vpop.xlane.xlu0 %634  ;;  %v1683_v38 = vpop.f32.mrf.mxu1  ;;  %v1274_v1 = vmul.f32 %v4529_v40, %v1241_v42  ;;  %1998 = vmatpush.bf16.xpose.msrb.mxu3 %v1989_v61 }
 0x2ac   : > { %v674_v49 = vmul.f32 %v3830_v24, %v635_v23  ;;  %v822_v5 = vpop.xlane.xlu2 %821  ;;  %v1684_v19 = vadd.f32 %v1683_v38, %v1543_v41  ;;  %v4707_v23 = vpop.f32.mrf.mxu2 }
 0x2ad   : > { %v1133_v22 = vsub.f32 1.5, %v1132_v2  ;;  %v862_v14 = vmul.f32 %v822_v5, %v3830_v24 }
 0x2ae   : > { %v3494_v36 = vpop.eup %3493  ;;  %v4663_v44 = vsub.f32 %v3392_v7, %v674_v49  ;;  %v1743_v51 = vadd.f32 %v4310_v25, %v1684_v19 }
 0x2af   : > { %v1134_v50 = vmul.f32 %v3492_v55, %v1133_v22  ;;  %v1140_v15 = vmul.f32 %v3494_v36, %v4645_v34  ;;  %v4671_v4 = vadd.f32 1e-05, %v862_v14  ;;  %v4678_v62 = vpop.eup %3495  ;;  %vm1146_vm7 = vweird.f32 %v3494_v36 }
 0x2b0   : > { %v738_v8 = vmul.f32 %v4663_v44, %v4663_v44  ;;  %v1160_v60 = vmul.f32 %v4678_v62, %v4655_v32  ;;  %vm4698_vm10 = vmor %vm1145_vm9, %vm1146_vm7  ;;  %v1158_v22 = vsel %vm4691_vm8, %v4635_v47, %v1154_v57  ;;  %vm1166_vm14 = vweird.f32 %v4678_v62 }
 0x2b1   : > { %v1138_v48 = vsel %vm1137_vm4, %v3492_v55, %v1134_v50  ;;  %v1141_v27 = vmul.f32 %v3494_v36, %v1140_v15  ;;  %3497 = vrsqrt.f32 %v4671_v4  ;;  %v1307_v55 = vadd.f32 %v4542_v9, %v1274_v1  ;;  %vm1167_vm1 = vmor %vm1165_vm13, %vm1166_vm14 }
 0x2b2   : > { %v1242_v43 = vmul.f32 %v1138_v48, %v4475_v54  ;;  %v832_v7 = vsel %vm539_vm0, %v738_v8, 0.0  ;;  %v1161_v38 = vmul.f32 %v4678_v62, %v1160_v60  ;;  %v1244_v5 = vmul.f32 %v1158_v22, %v4412_v56 }
 0x2b3   : > { %v1142_v63 = vmul.f32 0.5, %v1141_v27  ;;  %833 = vadd.xlane.f32.xlu0 %v832_v7  ;;  %v1685_v20 = vpop.f32.mrf.mxu1  ;;  %vm1175_vm11 = vweird.f32 %v4671_v4 }
 0x2b4   : > { %v1275_v54 = vmul.f32 %v4529_v40, %v1242_v43  ;;  %v1686_v45 = vadd.f32 %v1685_v20, %v1545_v58  ;;  %v1162_v15 = vmul.f32 0.5, %v1161_v38  ;;  %v1277_v48 = vmul.f32 %v4529_v40, %v1244_v5  ;;  %v4721_v43 = vpop.f32.mrf.mxu2  ;;  %v825_v22 = vpop.xlane.xlu0 %824 }
 0x2b5   : > { %v1143_v3 = vsub.f32 1.5, %v1142_v63 }
 0x2b6   : > { %v1308_v37 = vadd.f32 %v4542_v9, %v1275_v54  ;;  %v1744_v13 = vadd.f32 %v4310_v25, %v1686_v45  ;;  %v1163_v27 = vsub.f32 1.5, %v1162_v15 }
 0x2b7   : > { %v1144_v39 = vmul.f32 %v3494_v36, %v1143_v3  ;;  %v3498_v6 = vpop.eup %3497 }
 0x2b8   : > { %v1328_v41 = vpack.c.bf16 %v1308_v37, %v1307_v55  ;;  %v1170_v34 = vmul.f32 %v3498_v6, %v4671_v4  ;;  %v1768_v49 = vpack.c.bf16 %v1744_v13, %v1743_v51  ;;  %vm1176_vm12 = vweird.f32 %v3498_v6 }
 0x2b9   : > { %v1148_v2 = vsel %vm4698_vm10, %v3494_v36, %v1144_v39  ;;  %vm1177_vm15 = vmor %vm1175_vm11, %vm1176_vm12  ;;  %v1310_v4 = vadd.f32 %v4542_v9, %v1277_v48  ;;  %v1164_v63 = vmul.f32 %v4678_v62, %v1163_v27 }
 0x2ba   : > { %3239 = vmatmul.msk.bf16.gmra.mxu3 %vm539_vm0, %v1328_v41  ;;  %v1688_v26 = vpop.f32.mrf.mxu3  ;;  %v1243_v42 = vmul.f32 %v1148_v2, %v4506_v33  ;;  %v1171_v36 = vmul.f32 %v3498_v6, %v1170_v34  ;;  %3251 = vmatmul.msk.bf16.gmra.mxu2 %vm539_vm0, %v1768_v49 }
 0x2bb   : > { %v1689_v33 = vadd.f32 %v1688_v26, %v4533_v11  ;;  %v1168_v32 = vsel %vm1167_vm1, %v4678_v62, %v1164_v63  ;;  %v863_v26 = vmul.f32 %v825_v22, %v3830_v24  ;;  %vm2690_vm1 = vcmask 1043456  }
 0x2bc   : > { %v1172_v50 = vmul.f32 0.5, %v1171_v36  ;;  %v1276_v14 = vmul.f32 %v4529_v40, %v1243_v42  ;;  %v4736_v20 = vpop.f32.mrf.mxu2  ;;  %v1245_v45 = vmul.f32 %v1168_v32, %v4422_v21 }
 0x2bd   : > { %v1745_v58 = vadd.f32 %v4310_v25, %v1689_v33  ;;  %v895_v42 = vadd.f32 1e-05, %v863_v26 }
 0x2be   : > { %v1173_v8 = vsub.f32 1.5, %v1172_v50  ;;  %v1309_v56 = vadd.f32 %v4542_v9, %v1276_v14 }
 0x2bf   : > { %3499 = vrsqrt.f32 %v895_v42  ;;  %vm1185_vm3 = vweird.f32 %v895_v42 }
 0x2c0   : > { %v1174_v1 = vmul.f32 %v3498_v6, %v1173_v8  ;;  %v1329_v11 = vpack.c.bf16 %v1310_v4, %v1309_v56 }
 0x2c2   : > { %v1690_v47 = vpop.f32.mrf.mxu3  ;;  %v1178_v19 = vsel %vm1177_vm15, %v3498_v6, %v1174_v1  ;;  %vm2080_vm15 = vcmask 64512  }
 0x2c3   : > { %v1691_v7 = vadd.f32 %v1690_v47, %v4580_v53  ;;  %v1246_v3 = vmul.f32 %v1178_v19, %v4567_v18  ;;  %v4747_v18 = vld [vmem:[%s5620_s4 + $0x2] ss:$0 sm:$0xff] }
 0x2c4   : > { %v4751_v39 = vpop.f32.mrf.mxu2 }
 0x2c5   : > { %v1746_v16 = vadd.f32 %v4310_v25, %v1691_v7  ;;  %v1279_v55 = vmul.f32 %v4529_v40, %v1246_v3  ;;  %v1278_v25 = vmul.f32 %v4529_v40, %v1245_v45 }
 0x2c7   : > { %v1769_v53 = vpack.c.bf16 %v1746_v16, %v1745_v58  ;;  %v1312_v62 = vadd.f32 %v4542_v9, %v1279_v55  ;;  %v1311_v21 = vadd.f32 %v4542_v9, %v1278_v25 }
 0x2c9   : > { %v1330_v51 = vpack.c.bf16 %v1312_v62, %v1311_v21 }
 0x2ca   : > { %3240 = vmatmul.msk.bf16.gmra.mxu3 %vm539_vm0, %v1329_v11  ;;  %v1693_v54 = vpop.f32.mrf.mxu3  ;;  %3252 = vmatmul.msk.bf16.gmra.mxu2 %vm539_vm0, %v1769_v53 }
 0x2cb   : > { %v1694_v57 = vadd.f32 %v1693_v54, %v4600_v46 }
 0x2cd   : > { %v1747_v35 = vadd.f32 %v4747_v18, %v1694_v57 }
 0x2d2   : > { %v1695_v37 = vpop.f32.mrf.mxu3 }
 0x2d3   : > { %v1696_v12 = vadd.f32 %v1695_v37, %v4606_v28  ;;  %v4756_v28 = vpop.f32.mrf.mxu2 }
 0x2d5   : > { %v1748_v60 = vadd.f32 %v4747_v18, %v1696_v12 }
 0x2d7   : > { %v1770_v13 = vpack.c.bf16 %v1748_v60, %v1747_v35 }
 0x2da   : > { %3241 = vmatmul.msk.bf16.gmra.mxu3 %vm539_vm0, %v1330_v51  ;;  %v1698_v46 = vpop.f32.mrf.mxu3  ;;  %3253 = vmatmul.msk.bf16.gmra.mxu2 %vm539_vm0, %v1770_v13 }
 0x2db   : > { %v1699_v17 = vadd.f32 %v1698_v46, %v4615_v59  ;;  %v4762_v49 = vpop.f32.mrf.mxu2  ;;  %v3500_v59 = vpop.eup %3499 }
 0x2dc   : > { %vm1186_vm4 = vweird.f32 %v3500_v59 }
 0x2dd   : > { %v1749_v61 = vadd.f32 %v4747_v18, %v1699_v17  ;;  %vm1187_vm5 = vmor %vm1185_vm3, %vm1186_vm4 }
 0x2e2   : > { %v1700_v41 = vpop.f32.mrf.mxu3 }
 0x2e3   : > { %v1701_v6 = vadd.f32 %v1700_v41, %v4619_v10  ;;  %v4765_v38 = vpop.f32.mrf.mxu2  ;;  %v1180_v10 = vmul.f32 %v3500_v59, %v895_v42 }
 0x2e5   : > { %v1750_v2 = vadd.f32 %v4747_v18, %v1701_v6  ;;  %v1181_v50 = vmul.f32 %v3500_v59, %v1180_v10 }
 0x2e7   : > { %v1771_v34 = vpack.c.bf16 %v1750_v2, %v1749_v61  ;;  %v1182_v8 = vmul.f32 0.5, %v1181_v50 }
 0x2e9   : > { %v1183_v27 = vsub.f32 1.5, %v1182_v8 }
 0x2ea   : > { %3254 = vmatmul.msk.bf16.gmra.mxu2 %vm539_vm0, %v1771_v34 }
 0x2eb   : > { %v4768_v36 = vpop.f32.mrf.mxu2  ;;  %v1184_v1 = vmul.f32 %v3500_v59, %v1183_v27 }
 0x2ed   : > { %v1188_v58 = vsel %vm1187_vm5, %v3500_v59, %v1184_v1 }
 0x2ee   : > { %v1247_v54 = vmul.f32 %v1188_v58, %v4587_v30 }
 0x2f0   : > { %v1280_v62 = vmul.f32 %v4529_v40, %v1247_v54 }
 0x2f2   : > { %v1313_v51 = vadd.f32 %v4542_v9, %v1280_v62 }
 0x2f3   : > { %v4770_v5 = vpop.f32.mrf.mxu2 }
 0x2fb   : > { %v4773_v47 = vpop.f32.mrf.mxu2 }
 0x303   : > { %v4777_v32 = vpop.f32.mrf.mxu2 }
 0x30b   : > { %v1846_v41 = vpop.f32.mrf.mxu2 }
 0x313   : > { %v1849_v59 = vpop.f32.mrf.mxu2 }
 0x315   : > { %v828_v15 = vpop.xlane.xlu1 %827 }
 0x316   : > { %v864_v14 = vmul.f32 %v828_v15, %v3830_v24 }
 0x318   : > { %v896_v48 = vadd.f32 1e-05, %v864_v14 }
 0x31a   : > { %3501 = vrsqrt.f32 %v896_v48  ;;  %vm1195_vm7 = vweird.f32 %v896_v48 }
 0x31d   : > { %v831_v33 = vpop.xlane.xlu2 %830 }
 0x31e   : > { %v865_v7 = vmul.f32 %v831_v33, %v3830_v24 }
 0x320   : > { %v3502_v56 = vpop.eup %3501  ;;  %v897_v16 = vadd.f32 1e-05, %v865_v7 }
 0x321   : > { %v1190_v4 = vmul.f32 %v3502_v56, %v896_v48  ;;  %vm1196_vm6 = vweird.f32 %v3502_v56 }
 0x322   : > { %3503 = vrsqrt.f32 %v897_v16  ;;  %vm1197_vm8 = vmor %vm1195_vm7, %vm1196_vm6  ;;  %vm1205_vm9 = vweird.f32 %v897_v16 }
 0x323   : > { %v1191_v63 = vmul.f32 %v3502_v56, %v1190_v4 }
 0x325   : > { %v1192_v19 = vmul.f32 0.5, %v1191_v63 }
 0x326   : > { %v834_v11 = vpop.xlane.xlu0 %833 }
 0x327   : > { %v866_v53 = vmul.f32 %v834_v11, %v3830_v24  ;;  %v1193_v3 = vsub.f32 1.5, %v1192_v19 }
 0x328   : > { %v3504_v55 = vpop.eup %3503 }
 0x329   : > { %v898_v45 = vadd.f32 1e-05, %v866_v53  ;;  %v1194_v25 = vmul.f32 %v3502_v56, %v1193_v3  ;;  %v1200_v37 = vmul.f32 %v3504_v55, %v897_v16  ;;  %vm1206_vm10 = vweird.f32 %v3504_v55 }
 0x32a   : > { %vm1207_vm11 = vmor %vm1205_vm9, %vm1206_vm10 }
 0x32b   : > { %3505 = vrsqrt.f32 %v898_v45  ;;  %v1198_v57 = vsel %vm1197_vm8, %v3502_v56, %v1194_v25  ;;  %v1201_v12 = vmul.f32 %v3504_v55, %v1200_v37  ;;  %vm1215_vm13 = vweird.f32 %v898_v45  ;;  %v1851_v56 = vpop.f32.mrf.mxu2 }
 0x32c   : > { %v1248_v60 = vmul.f32 %v1198_v57, %v4631_v0 }
 0x32d   : > { %v1202_v24 = vmul.f32 0.5, %v1201_v12 }
 0x32e   : > { %v1281_v21 = vmul.f32 %v4529_v40, %v1248_v60 }
 0x32f   : > { %v1203_v30 = vsub.f32 1.5, %v1202_v24 }
 0x330   : > { %v1314_v46 = vadd.f32 %v4542_v9, %v1281_v21 }
 0x331   : > { %v3506_v35 = vpop.eup %3505  ;;  %v1204_v17 = vmul.f32 %v3504_v55, %v1203_v30 }
 0x332   : > { %v1210_v13 = vmul.f32 %v3506_v35, %v898_v45  ;;  %v1331_v2 = vpack.c.bf16 %v1314_v46, %v1313_v51  ;;  %vm1216_vm12 = vweird.f32 %v3506_v35 }
 0x333   : > { %v1208_v61 = vsel %vm1207_vm11, %v3504_v55, %v1204_v17  ;;  %vm1217_vm14 = vmor %vm1215_vm13, %vm1216_vm12 }
 0x334   : > { %v1211_v6 = vmul.f32 %v3506_v35, %v1210_v13  ;;  %3242 = vmatmul.msk.bf16.gmra.mxu3 %vm539_vm0, %v1331_v2  ;;  %v1249_v22 = vmul.f32 %v1208_v61, %v4649_v52 }
 0x336   : > { %v1212_v34 = vmul.f32 0.5, %v1211_v6  ;;  %v1282_v15 = vmul.f32 %v4529_v40, %v1249_v22 }
 0x338   : > { %v1213_v0 = vsub.f32 1.5, %v1212_v34  ;;  %v1315_v8 = vadd.f32 %v4542_v9, %v1282_v15 }
 0x33a   : > { %v1214_v26 = vmul.f32 %v3506_v35, %v1213_v0 }
 0x33c   : > { %v1218_v42 = vsel %vm1217_vm14, %v3506_v35, %v1214_v26 }
 0x33d   : > { %v1250_v10 = vmul.f32 %v1218_v42, %v4663_v44  ;;  %v1703_v50 = vpop.f32.mrf.mxu3 }
 0x33e   : > { %v1704_v33 = vadd.f32 %v1703_v50, %v4640_v31  ;;  %v1854_v31 = vpop.f32.mrf.mxu2 }
 0x33f   : > { %v1283_v14 = vmul.f32 %v4529_v40, %v1250_v10 }
 0x340   : > { %v1751_v44 = vadd.f32 %v4747_v18, %v1704_v33 }
 0x341   : > { %v1316_v48 = vadd.f32 %v4542_v9, %v1283_v14  ;;  %v4801_v9 = vld [vmem:[%s5620_s4 + $0x3] ss:$0 sm:$0xff] }
 0x342   : > { %v1840_v4 = vadd.f32 %v4801_v9, %v4770_v5  ;;  %v1847_v55 = vadd.f32 %v4801_v9, %v1846_v41  ;;  %v1845_v5 = vadd.f32 %v4801_v9, %v4777_v32  ;;  %v1852_v21 = vadd.f32 %v4801_v9, %v1851_v56 }
 0x343   : > { %v1332_v27 = vpack.c.bf16 %v1316_v48, %v1315_v8  ;;  %v1850_v32 = vadd.f32 %v4801_v9, %v1849_v59  ;;  %v1855_v51 = vadd.f32 %v4801_v9, %v1854_v31 }
 0x344   : > { %v1920_v25 = vpack.c.bf16 %v1847_v55, %v1845_v5 }
 0x345   : > { %v1705_v52 = vpop.f32.mrf.mxu3  ;;  %3243 = vmatmul.msk.bf16.gmra.mxu3 %vm539_vm0, %v1332_v27  ;;  %v1921_v35 = vpack.c.bf16 %v1852_v21, %v1850_v32 }
 0x346   : > { %v1706_v7 = vadd.f32 %v1705_v52, %v4667_v29  ;;  %v1842_v29 = vadd.f32 %v4801_v9, %v4773_v47  ;;  %v1856_v3 = vpop.f32.mrf.mxu2 }
 0x348   : > { %v1752_v1 = vadd.f32 %v4747_v18, %v1706_v7  ;;  %v1919_v63 = vpack.c.bf16 %v1842_v29, %v1840_v4 }
 0x34a   : > { %v1772_v16 = vpack.c.bf16 %v1752_v1, %v1751_v44 }
 0x34c   : > { %3255 = vmatmul.msk.bf16.gmra.mxu2 %vm539_vm0, %v1772_v16 }
 0x34d   : > { %v1708_v40 = vpop.f32.mrf.mxu3 }
 0x34e   : > { %v1709_v58 = vadd.f32 %v1708_v40, %v4707_v23  ;;  %v1859_v23 = vpop.f32.mrf.mxu2 }
 0x34f   : > { %v1860_v17 = vadd.f32 %v4801_v9, %v1859_v23 }
 0x350   : > { %v1753_v53 = vadd.f32 %v4747_v18, %v1709_v58 }
 0x355   : > { %v1710_v11 = vpop.f32.mrf.mxu3  ;;  %3260 = vmatmul.msk.bf16.vlgmr.msrb.gmra.mxu3 %vm539_vm0, %v1919_v63 }
 0x356   : > { %v1711_v19 = vadd.f32 %v1710_v11, %v4721_v43  ;;  %v1861_v24 = vpop.f32.mrf.mxu2 }
 0x357   : > { %v1862_v41 = vadd.f32 %v4801_v9, %v1861_v24 }
 0x358   : > { %v1754_v54 = vadd.f32 %v4747_v18, %v1711_v19 }
 0x359   : > { %v1923_v6 = vpack.c.bf16 %v1862_v41, %v1860_v17 }
 0x35a   : > { %v1773_v45 = vpack.c.bf16 %v1754_v54, %v1753_v53  ;;  %v4855_v54 = vld [vmem:[%s5625_s9] ss:$0 sm:$0xff] }
 0x35c   : > { %3256 = vmatmul.msk.bf16.gmra.mxu2 %vm539_vm0, %v1773_v45 }
 0x35d   : > { %v1713_v47 = vpop.f32.mrf.mxu3 }
 0x35e   : > { %v1714_v43 = vadd.f32 %v1713_v47, %v4736_v20  ;;  %v1864_v20 = vpop.f32.mrf.mxu2 }
 0x35f   : > { %v1865_v0 = vadd.f32 %v4801_v9, %v1864_v20 }
 0x360   : > { %v1755_v12 = vadd.f32 %v4747_v18, %v1714_v43 }
 0x365   : > { %v1715_v37 = vpop.f32.mrf.mxu3  ;;  %3261 = vmatmul.msk.bf16.gmra.mxu3 %vm539_vm0, %v1920_v25 }
 0x366   : > { %v1716_v57 = vadd.f32 %v1715_v37, %v4751_v39  ;;  %v1857_v39 = vadd.f32 %v4801_v9, %v1856_v3  ;;  %v1866_v30 = vpop.f32.mrf.mxu2 }
 0x367   : > { %v1867_v34 = vadd.f32 %v4801_v9, %v1866_v30 }
 0x368   : > { %v1756_v62 = vadd.f32 %v4747_v18, %v1716_v57  ;;  %v1922_v13 = vpack.c.bf16 %v1857_v39, %v1855_v51 }
 0x369   : > { %v1924_v22 = vpack.c.bf16 %v1867_v34, %v1865_v0 }
 0x36a   : > { %v1774_v60 = vpack.c.bf16 %v1756_v62, %v1755_v12 }
 0x36c   : > { %3257 = vmatmul.msk.bf16.gmra.mxu2 %vm539_vm0, %v1774_v60 }
 0x36e   : > { %v1869_v46 = vpop.f32.mrf.mxu2 }
 0x36f   : > { %v1870_v10 = vadd.f32 %v4801_v9, %v1869_v46 }
 0x375   : > { %3262 = vmatmul.msk.bf16.gmra.mxu3 %vm539_vm0, %v1921_v35 }
 0x376   : > { %v1871_v2 = vpop.f32.mrf.mxu2 }
 0x377   : > { %v1872_v42 = vadd.f32 %v4801_v9, %v1871_v2 }
 0x379   : > { %v1925_v50 = vpack.c.bf16 %v1872_v42, %v1870_v10 }
 0x37e   : > { %v1874_v61 = vpop.f32.mrf.mxu2 }
 0x37f   : > { %v1875_v33 = vadd.f32 %v4801_v9, %v1874_v61 }
 0x385   : > { %3263 = vmatmul.msk.bf16.gmra.mxu3 %vm539_vm0, %v1922_v13 }
 0x386   : > { %v1876_v26 = vpop.f32.mrf.mxu2 }
 0x387   : > { %v1877_v8 = vadd.f32 %v4801_v9, %v1876_v26 }
 0x389   : > { %v1926_v7 = vpack.c.bf16 %v1877_v8, %v1875_v33 }
 0x38e   : > { %v1879_v59 = vpop.f32.mrf.mxu2 }
 0x395   : > { %3264 = vmatmul.msk.bf16.gmra.mxu3 %vm539_vm0, %v1923_v6 }
 0x396   : > { %v1881_v14 = vpop.f32.mrf.mxu2 }
 0x39e   : > { %v1884_v1 = vpop.f32.mrf.mxu2 }
 0x39f   : > { %v1885_v55 = vadd.f32 %v4801_v9, %v1884_v1 }
 0x3a5   : > { %3265 = vmatmul.msk.bf16.gmra.mxu3 %vm539_vm0, %v1924_v22 }
 0x3a6   : > { %v1886_v31 = vpop.f32.mrf.mxu2 }
 0x3b5   : > { %3266 = vmatmul.msk.bf16.gmra.mxu3 %vm539_vm0, %v1925_v50 }
 0x3b7   : > { %v1718_v15 = vpop.f32.mrf.mxu3 }
 0x3b8   : > { %v1719_v48 = vadd.f32 %v1718_v15, %v4756_v28  ;;  %v1882_v28 = vadd.f32 %v4801_v9, %v1881_v14 }
 0x3ba   : > { %v1757_v56 = vadd.f32 %v4747_v18, %v1719_v48 }
 0x3bf   : > { %v1720_v27 = vpop.f32.mrf.mxu3 }
 0x3c0   : > { %v1721_v52 = vadd.f32 %v1720_v27, %v4762_v49  ;;  %v1880_v49 = vadd.f32 %v4801_v9, %v1879_v59 }
 0x3c2   : > { %v1758_v44 = vadd.f32 %v4747_v18, %v1721_v52  ;;  %v1927_v58 = vpack.c.bf16 %v1882_v28, %v1880_v49 }
 0x3c4   : > { %v1775_v16 = vpack.c.bf16 %v1758_v44, %v1757_v56 }
 0x3c5   : > { %3267 = vmatmul.msk.bf16.gmra.mxu3 %vm539_vm0, %v1926_v7 }
 0x3c6   : > { %3258 = vmatmul.msk.bf16.gmra.mxu2 %vm539_vm0, %v1775_v16 }
 0x3c8   : > { %v1723_v40 = vpop.f32.mrf.mxu3 }
 0x3c9   : > { %v1724_v29 = vadd.f32 %v1723_v40, %v4765_v38  ;;  %v1889_v38 = vpop.f32.mrf.mxu2 }
 0x3ca   : > { %v1890_v21 = vadd.f32 %v4801_v9, %v1889_v38 }
 0x3cb   : > { %v1759_v11 = vadd.f32 %v4747_v18, %v1724_v29 }
 0x3d0   : > { %v1725_v4 = vpop.f32.mrf.mxu3 }
 0x3d1   : > { %v1726_v63 = vadd.f32 %v1725_v4, %v4768_v36  ;;  %v1891_v23 = vpop.f32.mrf.mxu2 }
 0x3d2   : > { %v1892_v60 = vadd.f32 %v4801_v9, %v1891_v23 }
 0x3d3   : > { %v1760_v19 = vadd.f32 %v4747_v18, %v1726_v63  ;;  %v1887_v18 = vadd.f32 %v4801_v9, %v1886_v31 }
 0x3d4   : > { %v1929_v35 = vpack.c.bf16 %v1892_v60, %v1890_v21 }
 0x3d5   : > { %v1776_v53 = vpack.c.bf16 %v1760_v19, %v1759_v11  ;;  %3268 = vmatmul.msk.bf16.gmra.mxu3 %vm539_vm0, %v1927_v58  ;;  %v1928_v25 = vpack.c.bf16 %v1887_v18, %v1885_v55 }
 0x3d7   : > { %3259 = vmatmul.msk.bf16.gmra.mxu2 %vm539_vm0, %v1776_v53 }
 0x3d8   : > { %v2000_v3 = vpop.f32.mrf.mxu3 }
 0x3d9   : > { %v4859_v36 = vadd.f32 %v4855_v54, %v2000_v3  ;;  %v1894_v12 = vpop.f32.mrf.mxu2 }
 0x3da   : > { %v1895_v6 = vadd.f32 %v4801_v9, %v1894_v12 }
 0x3db   : > { %v2081_v45 = vsel %vm2080_vm15, %v4859_v36, -inf }
 0x3dc   : > { %2082 = vmax.xlane.f32.xlu1 %v2081_v45 }
 0x3e0   : > { %v2002_v47 = vpop.f32.mrf.mxu3 }
 0x3e1   : > { %v4866_v5 = vadd.f32 %v4855_v54, %v2002_v47  ;;  %v1896_v39 = vpop.f32.mrf.mxu2 }
 0x3e2   : > { %v1897_v41 = vadd.f32 %v4801_v9, %v1896_v39 }
 0x3e3   : > { %v2084_v43 = vsel %vm2080_vm15, %v4866_v5, -inf }
 0x3e4   : > { %2085 = vmax.xlane.f32.xlu2 %v2084_v43  ;;  %v1930_v61 = vpack.c.bf16 %v1897_v41, %v1895_v6 }
 0x3e5   : > { %3269 = vmatmul.msk.bf16.gmra.mxu3 %vm539_vm0, %v1928_v25 }
 0x3e8   : > { %v2005_v37 = vpop.f32.mrf.mxu3 }
 0x3e9   : > { %v4872_v57 = vadd.f32 %v4855_v54, %v2005_v37  ;;  %v1899_v46 = vpop.f32.mrf.mxu2 }
 0x3ea   : > { %v1900_v50 = vadd.f32 %v4801_v9, %v1899_v46 }
 0x3eb   : > { %v2087_v62 = vsel %vm2080_vm15, %v4872_v57, -inf }
 0x3ec   : > { %2088 = vmax.xlane.f32.xlu0 %v2087_v62 }
 0x3f0   : > { %v2007_v24 = vpop.f32.mrf.mxu3 }
 0x3f1   : > { %v4879_v32 = vadd.f32 %v4855_v54, %v2007_v24  ;;  %v1901_v0 = vpop.f32.mrf.mxu2 }
 0x3f2   : > { %v1902_v59 = vadd.f32 %v4801_v9, %v1901_v0 }
 0x3f3   : > { %v2090_v20 = vsel %vm2080_vm15, %v4879_v32, -inf }
 0x3f4   : > { %2091 = vmax.xlane.f32.xlu1 %v2090_v20  ;;  %v1931_v8 = vpack.c.bf16 %v1902_v59, %v1900_v50 }
 0x3f5   : > { %3270 = vmatmul.msk.bf16.gmra.mxu3 %vm539_vm0, %v1929_v35 }
 0x3f8   : > { %v2010_v30 = vpop.f32.mrf.mxu3 }
 0x3f9   : > { %v4885_v51 = vadd.f32 %v4855_v54, %v2010_v30  ;;  %v1904_v14 = vpop.f32.mrf.mxu2 }
 0x3fa   : > { %v1905_v44 = vadd.f32 %v4801_v9, %v1904_v14 }
 0x3fb   : > { %v2093_v13 = vsel %vm2080_vm15, %v4885_v51, -inf }
 0x3fc   : > { %2094 = vmax.xlane.f32.xlu2 %v2093_v13 }
 0x400   : > { %v2012_v17 = vpop.f32.mrf.mxu3 }
 0x401   : > { %v4892_v2 = vadd.f32 %v4855_v54, %v2012_v17  ;;  %v1906_v7 = vpop.f32.mrf.mxu2 }
 0x402   : > { %v1907_v56 = vadd.f32 %v4801_v9, %v1906_v7 }
 0x403   : > { %v2096_v34 = vsel %vm2080_vm15, %v4892_v2, -inf }
 0x404   : > { %2097 = vmax.xlane.f32.xlu0 %v2096_v34  ;;  %v1932_v1 = vpack.c.bf16 %v1907_v56, %v1905_v44 }
 0x405   : > { %3271 = vmatmul.msk.bf16.gmra.mxu3 %vm539_vm0, %v1930_v61 }
 0x408   : > { %v2015_v22 = vpop.f32.mrf.mxu3 }
 0x409   : > { %v4898_v26 = vadd.f32 %v4855_v54, %v2015_v22 }
 0x40b   : > { %v2099_v42 = vsel %vm2080_vm15, %v4898_v26, -inf }
 0x40c   : > { %2100 = vmax.xlane.f32.xlu1 %v2099_v42 }
 0x410   : > { %v2017_v10 = vpop.f32.mrf.mxu3 }
 0x411   : > { %v4905_v15 = vadd.f32 %v4855_v54, %v2017_v10 }
 0x413   : > { %v2102_v48 = vsel %vm2080_vm15, %v4905_v15, -inf }
 0x414   : > { %2103 = vmax.xlane.f32.xlu2 %v2102_v48 }
 0x415   : > { %3272 = vmatmul.msk.bf16.gmra.mxu3 %vm539_vm0, %v1931_v8 }
 0x418   : > { %v2020_v27 = vpop.f32.mrf.mxu3 }
 0x419   : > { %v4911_v33 = vadd.f32 %v4855_v54, %v2020_v27 }
 0x41b   : > { %v2105_v52 = vsel %vm2080_vm15, %v4911_v33, -inf }
 0x41c   : > { %2106 = vmax.xlane.f32.xlu2 %v2105_v52 }
 0x420   : > { %v2022_v40 = vpop.f32.mrf.mxu3 }
 0x421   : > { %v4941_v43 = vadd.f32 %v4855_v54, %v2022_v40 }
 0x423   : > { %v2108_v20 = vsel %vm2080_vm15, %v4941_v43, -inf }
 0x425   : > { %3273 = vmatmul.msk.bf16.gmra.mxu3 %vm539_vm0, %v1932_v1 }
 0x428   : > { %v2025_v19 = vpop.f32.mrf.mxu3 }
 0x430   : > { %v2027_v23 = vpop.f32.mrf.mxu3 }
 0x431   : > { %v4974_v0 = vadd.f32 %v4855_v54, %v2027_v23 }
 0x433   : > { %v2114_v10 = vsel %vm2080_vm15, %v4974_v0, -inf }
 0x438   : > { %v2030_v30 = vpop.f32.mrf.mxu3 }
 0x439   : > { %v4989_v48 = vadd.f32 %v4855_v54, %v2030_v30 }
 0x43b   : > { %v2117_v7 = vsel %vm2080_vm15, %v4989_v48, -inf }
 0x440   : > { %v2032_v42 = vpop.f32.mrf.mxu3 }
 0x441   : > { %v5004_v40 = vadd.f32 %v4855_v54, %v2032_v42 }
 0x448   : > { %v2035_v44 = vpop.f32.mrf.mxu3 }
 0x449   : > { %v1909_v16 = vpop.f32.mrf.mxu2 }
 0x44a   : > { %v1910_v49 = vadd.f32 %v4801_v9, %v1909_v16 }
 0x44f   : > { %v4918_v31 = vpop.xlane.xlu1 %2082 }
 0x450   : > { %v2177_v28 = vmax.f32 %v4918_v31, 0.0 }
 0x451   : > { %v1911_v4 = vpop.f32.mrf.mxu2 }
 0x452   : > { %v2209_v29 = vsub.f32 %v4859_v36, %v2177_v28  ;;  %v1912_v63 = vadd.f32 %v4801_v9, %v1911_v4 }
 0x454   : > { %v2241_v58 = vmul.f32 1.442695, %v2209_v29  ;;  %v1933_v11 = vpack.c.bf16 %v1912_v63, %v1910_v49  ;;  %v2120_v63 = vsel %vm2080_vm15, %v5004_v40, -inf }
 0x456   : > { %3507 = vpow2.f32 %v2241_v58  ;;  %3274 = vmatmul.msk.bf16.gmra.mxu3 %vm539_vm0, %v1933_v11  ;;  %v2037_v11 = vpop.f32.mrf.mxu3 }
 0x457   : > { %v4927_v53 = vpop.xlane.xlu2 %2085 }
 0x458   : > { %v2178_v38 = vmax.f32 %v4927_v53, 0.0 }
 0x45a   : > { %v2210_v3 = vsub.f32 %v4866_v5, %v2178_v38  ;;  %v1914_v36 = vpop.f32.mrf.mxu2 }
 0x45b   : > { %v1915_v12 = vadd.f32 %v4801_v9, %v1914_v36 }
 0x45c   : > { %v4933_v45 = vpop.eup %3507  ;;  %v2243_v18 = vmul.f32 1.442695, %v2210_v3  ;;  %v5019_v3 = vadd.f32 %v4855_v54, %v2035_v44 }
 0x45d   : > { %v2305_v47 = vsel %vm2080_vm15, %v4933_v45, 0.0 }
 0x45e   : > { %3509 = vpow2.f32 %v2243_v18  ;;  %2306 = vadd.xlane.f32.xlu0 %v2305_v47  ;;  %v2123_v47 = vsel %vm2080_vm15, %v5019_v3, -inf }
 0x45f   : > { %v4937_v55 = vpop.xlane.xlu0 %2088 }
 0x460   : > { %v2179_v25 = vmax.f32 %v4937_v55, 0.0 }
 0x462   : > { %v2211_v5 = vsub.f32 %v4872_v57, %v2179_v25  ;;  %v1916_v37 = vpop.f32.mrf.mxu2 }
 0x463   : > { %v1917_v62 = vadd.f32 %v4801_v9, %v1916_v37  ;;  %v4959_v9 = vadd.f32 %v4855_v54, %v2025_v19 }
 0x464   : > { %v4948_v60 = vpop.eup %3509  ;;  %v2245_v24 = vmul.f32 1.442695, %v2211_v5 }
 0x465   : > { %v1934_v21 = vpack.c.bf16 %v1917_v62, %v1915_v12  ;;  %v2308_v35 = vsel %vm2080_vm15, %v4948_v60, 0.0  ;;  %v2111_v6 = vsel %vm2080_vm15, %v4959_v9, -inf  ;;  %v5034_v12 = vadd.f32 %v4855_v54, %v2037_v11 }
 0x466   : > { %3511 = vpow2.f32 %v2245_v24  ;;  %2309 = vadd.xlane.f32.xlu1 %v2308_v35  ;;  %2109 = vmax.xlane.f32.xlu0 %v2108_v20 }
 0x467   : > { %v4954_v39 = vpop.xlane.xlu1 %2091  ;;  %3275 = vmatmul.msk.bf16.gmra.mxu3 %vm539_vm0, %v1934_v21  ;;  %v2126_v20 = vsel %vm2080_vm15, %v5034_v12, -inf }
 0x468   : > { %v2180_v57 = vmax.f32 %v4954_v39, 0.0 }
 0x46a   : > { %v2212_v13 = vsub.f32 %v4879_v32, %v2180_v57 }
 0x46c   : > { %v4964_v46 = vpop.eup %3511  ;;  %v2247_v41 = vmul.f32 1.442695, %v2212_v13 }
 0x46d   : > { %v2311_v17 = vsel %vm2080_vm15, %v4964_v46, 0.0 }
 0x46e   : > { %3513 = vpow2.f32 %v2247_v41  ;;  %2312 = vadd.xlane.f32.xlu1 %v2311_v17  ;;  %2112 = vmax.xlane.f32.xlu0 %v2111_v6 }
 0x46f   : > { %v4970_v61 = vpop.xlane.xlu2 %2094 }
 0x470   : > { %v2181_v34 = vmax.f32 %v4970_v61, 0.0 }
 0x472   : > { %v2213_v32 = vsub.f32 %v4885_v51, %v2181_v34 }
 0x474   : > { %v4979_v22 = vpop.eup %3513  ;;  %v2249_v59 = vmul.f32 1.442695, %v2213_v32 }
 0x475   : > { %v2314_v50 = vsel %vm2080_vm15, %v4979_v22, 0.0 }
 0x476   : > { %3515 = vpow2.f32 %v2249_v59  ;;  %2115 = vmax.xlane.f32.xlu1 %v2114_v10  ;;  %2315 = vadd.xlane.f32.xlu2 %v2314_v50  ;;  %v2401_v50 = vsub.f32 0.0, %v2177_v28 }
 0x477   : > { %v4985_v14 = vpop.xlane.xlu0 %2097 }
 0x478   : > { %v2182_v8 = vmax.f32 %v4985_v14, 0.0 }
 0x47a   : > { %v2214_v51 = vsub.f32 %v4892_v2, %v2182_v8  ;;  %v2406_v61 = vsub.f32 0.0, %v2182_v8 }
 0x47c   : > { %v4994_v27 = vpop.eup %3515  ;;  %v2251_v52 = vmul.f32 1.442695, %v2214_v51  ;;  %v2641_v51 = vld [vmem:[%s458_s22] sm:$0xf] }
 0x47d   : > { %v2317_v56 = vsel %vm2080_vm15, %v4994_v27, 0.0 }
 0x47e   : > { %3517 = vpow2.f32 %v2251_v52  ;;  %2118 = vmax.xlane.f32.xlu1 %v2117_v7  ;;  %2318 = vadd.xlane.f32.xlu2 %v2317_v56  ;;  %v2692_v52 = vsel %vm2690_vm1, %v2641_v51, 0  ;;  %v2433_v7 = vmul.f32 1.442695, %v2401_v50  ;;  %v2402_v56 = vsub.f32 0.0, %v2178_v38 }
 0x47f   : > { %v5000_v1 = vpop.xlane.xlu1 %2100  ;;  %2701 = vmatpush.bf16.msrb.mxu0 %v2692_v52 }
 0x480   : > { %v2183_v16 = vmax.f32 %v5000_v1, 0.0  ;;  %v2435_v44 = vmul.f32 1.442695, %v2402_v56 }
 0x482   : > { %v2215_v2 = vsub.f32 %v4898_v26, %v2183_v16 }
 0x484   : > { %v5009_v29 = vpop.eup %3517  ;;  %v2253_v4 = vmul.f32 1.442695, %v2215_v2 }
 0x485   : > { %v2320_v49 = vsel %vm2080_vm15, %v5009_v29, 0.0 }
 0x486   : > { %3519 = vpow2.f32 %v2253_v4  ;;  %2321 = vadd.xlane.f32.xlu0 %v2320_v49  ;;  %2121 = vmax.xlane.f32.xlu2 %v2120_v63  ;;  %v2403_v49 = vsub.f32 0.0, %v2179_v25 }
 0x487   : > { %v5015_v58 = vpop.xlane.xlu2 %2103 }
 0x488   : > { %v2184_v19 = vmax.f32 %v5015_v58, 0.0  ;;  %v2437_v28 = vmul.f32 1.442695, %v2403_v49  ;;  %v2443_v49 = vmul.f32 1.442695, %v2406_v61 }
 0x48a   : > { %v2216_v26 = vsub.f32 %v4905_v15, %v2184_v19  ;;  %v2040_v15 = vpop.f32.mrf.mxu3  ;;  %v2408_v1 = vsub.f32 0.0, %v2184_v19 }
 0x48b   : > { %v5046_v30 = vadd.f32 %v4855_v54, %v2040_v15 }
 0x48c   : > { %v5024_v36 = vpop.eup %3519  ;;  %v2255_v18 = vmul.f32 1.442695, %v2216_v26  ;;  %v2404_v26 = vsub.f32 0.0, %v2180_v57 }
 0x48d   : > { %v2323_v23 = vsel %vm2080_vm15, %v5024_v36, 0.0  ;;  %v2129_v17 = vsel %vm2080_vm15, %v5046_v30, -inf }
 0x48e   : > { %3521 = vpow2.f32 %v2255_v18  ;;  %2124 = vmax.xlane.f32.xlu2 %v2123_v47  ;;  %2324 = vadd.xlane.f32.xlu0 %v2323_v23  ;;  %v2439_v15 = vmul.f32 1.442695, %v2404_v26 }
 0x48f   : > { %v5030_v5 = vpop.xlane.xlu2 %2106 }
 0x490   : > { %v2185_v37 = vmax.f32 %v5030_v5, 0.0 }
 0x492   : > { %v2217_v62 = vsub.f32 %v4911_v33, %v2185_v37  ;;  %v2042_v41 = vpop.f32.mrf.mxu3 }
 0x493   : > { %v5055_v6 = vadd.f32 %v4855_v54, %v2042_v41 }
 0x494   : > { %v5039_v24 = vpop.eup %3521  ;;  %v2257_v21 = vmul.f32 1.442695, %v2217_v62 }
 0x495   : > { %v2326_v35 = vsel %vm2080_vm15, %v5039_v24, 0.0  ;;  %v2132_v32 = vsel %vm2080_vm15, %v5055_v6, -inf }
 0x496   : > { %3523 = vpow2.f32 %v2257_v21  ;;  %2327 = vadd.xlane.f32.xlu1 %v2326_v35  ;;  %2127 = vmax.xlane.f32.xlu0 %v2126_v20 }
 0x497   : > { %3525 = vpow2.f32 %v2433_v7 }
 0x498   : > { %3527 = vpow2.f32 %v2435_v44 }
 0x49a   : > { %v2045_v42 = vpop.f32.mrf.mxu3 }
 0x49b   : > { %v5060_v59 = vadd.f32 %v4855_v54, %v2045_v42 }
 0x49c   : > { %v5048_v13 = vpop.eup %3523 }
 0x49d   : > { %v2329_v33 = vsel %vm2080_vm15, %v5048_v13, 0.0  ;;  %v2135_v10 = vsel %vm2080_vm15, %v5060_v59, -inf  ;;  %v3526_v2 = vpop.eup %3525 }
 0x49e   : > { %2330 = vadd.xlane.f32.xlu1 %v2329_v33  ;;  %2130 = vmax.xlane.f32.xlu0 %v2129_v17  ;;  %v2497_v63 = vmul.f32 248.0, %v3526_v2  ;;  %v3528_v11 = vpop.eup %3527  ;;  %v2405_v33 = vsub.f32 0.0, %v2181_v34 }
 0x49f   : > { %v2498_v18 = vmul.f32 248.0, %v3528_v11 }
 0x4a0   : > { %v2441_v56 = vmul.f32 1.442695, %v2405_v33 }
 0x4a2   : > { %v2047_v39 = vpop.f32.mrf.mxu3 }
 0x4a6   : > { %2133 = vmax.xlane.f32.xlu1 %v2132_v32 }
 0x4aa   : > { %v2050_v44 = vpop.f32.mrf.mxu3 }
 0x4ab   : > { %v5136_v19 = vadd.f32 %v4855_v54, %v2050_v44 }
 0x4ae   : > { %2136 = vmax.xlane.f32.xlu1 %v2135_v10 }
 0x4d1   : > { %v2307_v4 = vpop.xlane.xlu0 %2306 }
 0x4d2   : > { %v2529_v31 = vadd.f32 %v2497_v63, %v2307_v4 }
 0x4d4   : > { %3529 = vrcp.f32 %v2529_v31 }
 0x4d5   : > { %3531 = vpow2.f32 %v2437_v28 }
 0x4d9   : > { %v5077_v47 = vpop.xlane.xlu0 %2109  ;;  %v2310_v53 = vpop.xlane.xlu1 %2309 }
 0x4da   : > { %v2186_v38 = vmax.f32 %v5077_v47, 0.0  ;;  %v2530_v23 = vadd.f32 %v2498_v18, %v2310_v53  ;;  %v3530_v62 = vpop.eup %3529 }
 0x4db   : > { %v3532_v57 = vpop.eup %3531  ;;  %v2593_v17 = vmul.f32 %v3530_v62, %v4933_v45  ;;  %v2052_v62 = vpop.f32.mrf.mxu3 }
 0x4dc   : > { %v2218_v55 = vsub.f32 %v4941_v43, %v2186_v38  ;;  %3533 = vrcp.f32 %v2530_v23  ;;  %v2499_v42 = vmul.f32 248.0, %v3532_v57  ;;  %v5153_v5 = vadd.f32 %v4855_v54, %v2052_v62 }
 0x4dd   : > { %3535 = vpow2.f32 %v2439_v15  ;;  %v5114_v15 = vadd.f32 %v4855_v54, %v2047_v39 }
 0x4de   : > { %v2259_v25 = vmul.f32 1.442695, %v2218_v55 }
 0x4e0   : > { %3537 = vpow2.f32 %v2259_v25 }
 0x4e1   : > { %v5083_v21 = vpop.xlane.xlu0 %2112  ;;  %v2313_v35 = vpop.xlane.xlu1 %2312 }
 0x4e2   : > { %v3534_v20 = vpop.eup %3533  ;;  %v2187_v41 = vmax.f32 %v5083_v21, 0.0  ;;  %v2531_v7 = vadd.f32 %v2499_v42, %v2313_v35 }
 0x4e3   : > { %v2594_v43 = vmul.f32 %v3534_v20, %v4948_v60  ;;  %v3536_v10 = vpop.eup %3535 }
 0x4e4   : > { %v2219_v32 = vsub.f32 %v4959_v9, %v2187_v41  ;;  %v2500_v60 = vmul.f32 248.0, %v3536_v10 }
 0x4e5   : > { %v2625_v50 = vpack.c.bf16 %v2594_v43, %v2593_v17 }
 0x4e6   : > { %v5093_v51 = vpop.eup %3537  ;;  %v2261_v52 = vmul.f32 1.442695, %v2219_v32 }
 0x4e7   : > { %3276 = vmatmul.msk.bf16.vlgmr.msrb.gmra.mxu0 %vm2080_vm15, %v2625_v50  ;;  %v2332_v45 = vsel %vm2080_vm15, %v5093_v51, 0.0  ;;  %v2447_v50 = vmul.f32 1.442695, %v2408_v1 }
 0x4e8   : > { %3539 = vpow2.f32 %v2261_v52  ;;  %2333 = vadd.xlane.f32.xlu2 %v2332_v45  ;;  %v2409_v45 = vsub.f32 0.0, %v2185_v37 }
 0x4e9   : > { %v2316_v9 = vpop.xlane.xlu2 %2315  ;;  %v5100_v34 = vpop.xlane.xlu1 %2115  ;;  %3541 = vrcp.f32 %v2531_v7 }
 0x4ea   : > { %v2532_v2 = vadd.f32 %v2500_v60, %v2316_v9  ;;  %v2188_v4 = vmax.f32 %v5100_v34, 0.0  ;;  %3543 = vpow2.f32 %v2441_v56  ;;  %v2055_v56 = vpop.f32.mrf.mxu3  ;;  %v2141_v60 = vsel %vm2080_vm15, %v5136_v19, -inf }
 0x4eb   : > { %v2449_v37 = vmul.f32 1.442695, %v2409_v45 }
 0x4ec   : > { %3545 = vrcp.f32 %v2532_v2  ;;  %v2220_v14 = vsub.f32 %v4974_v0, %v2188_v4  ;;  %v2407_v0 = vsub.f32 0.0, %v2183_v16 }
 0x4ed   : > { %3547 = vpow2.f32 %v2443_v49 }
 0x4ee   : > { %v5106_v8 = vpop.eup %3539  ;;  %v2263_v63 = vmul.f32 1.442695, %v2220_v14  ;;  %v2445_v32 = vmul.f32 1.442695, %v2407_v0 }
 0x4ef   : > { %v2335_v11 = vsel %vm2080_vm15, %v5106_v8, 0.0  ;;  %v3542_v31 = vpop.eup %3541 }
 0x4f0   : > { %3549 = vpow2.f32 %v2263_v63  ;;  %2336 = vadd.xlane.f32.xlu2 %v2335_v11  ;;  %v3544_v28 = vpop.eup %3543  ;;  %v2595_v55 = vmul.f32 %v3542_v31, %v4964_v46  ;;  %v2138_v46 = vsel %vm2080_vm15, %v5114_v15, -inf }
 0x4f1   : > { %v2319_v26 = vpop.xlane.xlu2 %2318  ;;  %v5110_v18 = vpop.xlane.xlu1 %2118  ;;  %v2501_v57 = vmul.f32 248.0, %v3544_v28 }
 0x4f2   : > { %v3546_v53 = vpop.eup %3545  ;;  %v2189_v23 = vmax.f32 %v5110_v18, 0.0 }
 0x4f3   : > { %v2596_v25 = vmul.f32 %v3546_v53, %v4979_v22  ;;  %v3548_v20 = vpop.eup %3547  ;;  %v2533_v43 = vadd.f32 %v2501_v57, %v2319_v26 }
 0x4f4   : > { %v2221_v35 = vsub.f32 %v4989_v48, %v2189_v23  ;;  %v2502_v48 = vmul.f32 248.0, %v3548_v20 }
 0x4f5   : > { %v2626_v33 = vpack.c.bf16 %v2596_v25, %v2595_v55 }
 0x4f6   : > { %v5123_v17 = vpop.eup %3549  ;;  %v2265_v39 = vmul.f32 1.442695, %v2221_v35 }
 0x4f7   : > { %3277 = vmatmul.msk.bf16.gmra.mxu0 %vm2080_vm15, %v2626_v33  ;;  %v2338_v22 = vsel %vm2080_vm15, %v5123_v17, 0.0 }
 0x4f8   : > { %3551 = vpow2.f32 %v2265_v39  ;;  %2139 = vmax.xlane.f32.xlu2 %v2138_v46  ;;  %2339 = vadd.xlane.f32.xlu0 %v2338_v22  ;;  %v5171_v39 = vadd.f32 %v4855_v54, %v2055_v56 }
 0x4f9   : > { %v2322_v16 = vpop.xlane.xlu0 %2321  ;;  %v5132_v42 = vpop.xlane.xlu2 %2121  ;;  %3553 = vrcp.f32 %v2533_v43 }
 0x4fa   : > { %v2534_v10 = vadd.f32 %v2502_v48, %v2322_v16  ;;  %v2190_v58 = vmax.f32 %v5132_v42, 0.0  ;;  %3555 = vpow2.f32 %v2445_v32  ;;  %v2147_v16 = vsel %vm2080_vm15, %v5171_v39, -inf }
 0x4fc   : > { %3557 = vrcp.f32 %v2534_v10  ;;  %v2222_v52 = vsub.f32 %v5004_v40, %v2190_v58 }
 0x4fd   : > { %3559 = vpow2.f32 %v2447_v50 }
 0x4fe   : > { %v5141_v7 = vpop.eup %3551  ;;  %v2267_v61 = vmul.f32 1.442695, %v2222_v52 }
 0x4ff   : > { %v2341_v9 = vsel %vm2080_vm15, %v5141_v7, 0.0  ;;  %v3554_v44 = vpop.eup %3553 }
 0x500   : > { %3561 = vpow2.f32 %v2267_v61  ;;  %2142 = vmax.xlane.f32.xlu2 %v2141_v60  ;;  %2342 = vadd.xlane.f32.xlu0 %v2341_v9  ;;  %v3556_v2 = vpop.eup %3555  ;;  %v2597_v11 = vmul.f32 %v3554_v44, %v4994_v27  ;;  %v2144_v27 = vsel %vm2080_vm15, %v5153_v5, -inf }
 0x501   : > { %v5149_v40 = vpop.xlane.xlu2 %2124  ;;  %v2325_v49 = vpop.xlane.xlu0 %2324  ;;  %v2503_v26 = vmul.f32 248.0, %v3556_v2  ;;  %3563 = vpow2.f32 %v2449_v37 }
 0x502   : > { %v3558_v14 = vpop.eup %3557  ;;  %v2191_v63 = vmax.f32 %v5149_v40, 0.0 }
 0x503   : > { %v2598_v31 = vmul.f32 %v3558_v14, %v5009_v29  ;;  %v3560_v53 = vpop.eup %3559  ;;  %v2535_v57 = vadd.f32 %v2503_v26, %v2325_v49  ;;  %v2057_v29 = vpop.f32.mrf.mxu3 }
 0x504   : > { %v2223_v28 = vsub.f32 %v5019_v3, %v2191_v63  ;;  %v2504_v3 = vmul.f32 248.0, %v3560_v53  ;;  %v5188_v9 = vadd.f32 %v4855_v54, %v2057_v29 }
 0x505   : > { %v2627_v0 = vpack.c.bf16 %v2598_v31, %v2597_v11 }
 0x506   : > { %v5160_v55 = vpop.eup %3561  ;;  %v2269_v25 = vmul.f32 1.442695, %v2223_v28  ;;  %v2150_v31 = vsel %vm2080_vm15, %v5188_v9, -inf }
 0x507   : > { %3278 = vmatmul.msk.bf16.gmra.mxu0 %vm2080_vm15, %v2627_v0  ;;  %v2344_v62 = vsel %vm2080_vm15, %v5160_v55, 0.0  ;;  %v3564_v1 = vpop.eup %3563 }
 0x508   : > { %3565 = vpow2.f32 %v2269_v25  ;;  %2345 = vadd.xlane.f32.xlu1 %v2344_v62  ;;  %2145 = vmax.xlane.f32.xlu0 %v2144_v27  ;;  %v2505_v50 = vmul.f32 248.0, %v3564_v1 }
 0x509   : > { %v5167_v35 = vpop.xlane.xlu0 %2127  ;;  %v2328_v20 = vpop.xlane.xlu1 %2327  ;;  %3567 = vrcp.f32 %v2535_v57 }
 0x50a   : > { %v2192_v33 = vmax.f32 %v5167_v35, 0.0  ;;  %v2536_v43 = vadd.f32 %v2504_v3, %v2328_v20 }
 0x50b   : > { %v2060_v61 = vpop.f32.mrf.mxu3 }
 0x50c   : > { %v2224_v32 = vsub.f32 %v5034_v12, %v2192_v33  ;;  %3569 = vrcp.f32 %v2536_v43  ;;  %v2416_v40 = vsub.f32 0.0, %v2192_v33 }
 0x50e   : > { %v5176_v46 = vpop.eup %3565  ;;  %v2271_v22 = vmul.f32 1.442695, %v2224_v32 }
 0x50f   : > { %v2347_v48 = vsel %vm2080_vm15, %v5176_v46, 0.0  ;;  %v3568_v10 = vpop.eup %3567 }
 0x510   : > { %3571 = vpow2.f32 %v2271_v22  ;;  %2348 = vadd.xlane.f32.xlu1 %v2347_v48  ;;  %2148 = vmax.xlane.f32.xlu0 %v2147_v16  ;;  %v2599_v44 = vmul.f32 %v3568_v10, %v5024_v36 }
 0x511   : > { %v5182_v52 = vpop.xlane.xlu0 %2130  ;;  %v2331_v56 = vpop.xlane.xlu1 %2330 }
 0x512   : > { %v3570_v12 = vpop.eup %3569  ;;  %v2193_v45 = vmax.f32 %v5182_v52, 0.0  ;;  %v5185_v60 = vadd.f32 %v2505_v50, %v2331_v56 }
 0x513   : > { %v2600_v2 = vmul.f32 %v3570_v12, %v5039_v24  ;;  %v2062_v26 = vpop.f32.mrf.mxu3 }
 0x514   : > { %v2225_v49 = vsub.f32 %v5046_v30, %v2193_v45  ;;  %v5206_v30 = vadd.f32 %v4855_v54, %v2060_v61  ;;  %v5221_v3 = vadd.f32 %v4855_v54, %v2062_v26 }
 0x515   : > { %v2628_v14 = vpack.c.bf16 %v2600_v2, %v2599_v44 }
 0x516   : > { %v5195_v37 = vpop.eup %3571  ;;  %v2273_v11 = vmul.f32 1.442695, %v2225_v49  ;;  %v2153_v57 = vsel %vm2080_vm15, %v5206_v30, -inf  ;;  %v2156_v1 = vsel %vm2080_vm15, %v5221_v3, -inf  ;;  %v2410_v49 = vsub.f32 0.0, %v2186_v38 }
 0x517   : > { %3279 = vmatmul.msk.bf16.gmra.mxu0 %vm2080_vm15, %v2628_v14  ;;  %v2350_v28 = vsel %vm2080_vm15, %v5195_v37, 0.0  ;;  %v2799_v14 = vld [vmem:[%s5624_s8] sm:$0x3] }
 0x518   : > { %3573 = vpow2.f32 %v2273_v11  ;;  %2151 = vmax.xlane.f32.xlu1 %v2150_v31  ;;  %2351 = vadd.xlane.f32.xlu2 %v2350_v28  ;;  %v2451_v11 = vmul.f32 1.442695, %v2410_v49  ;;  %v2850_v31 = vsel %vm1495_vm2, %v2799_v14, 0  ;;  %v2411_v28 = vsub.f32 0.0, %v2187_v41 }
 0x519   : > { %v5202_v36 = vpop.xlane.xlu1 %2133  ;;  %2859 = vmatpush.bf16.msrb.mxu1 %v2850_v31  ;;  %v2413_v41 = vsub.f32 0.0, %v2189_v23  ;;  %vm2973_vm2 = vcmask 27648  }
 0x51a   : > { %v2194_v24 = vmax.f32 %v5202_v36, 0.0 }
 0x51b   : > { %v2065_v43 = vpop.f32.mrf.mxu3 }
 0x51c   : > { %v2226_v53 = vsub.f32 %v5055_v6, %v2194_v24  ;;  %v5233_v48 = vadd.f32 %v4855_v54, %v2065_v43  ;;  %v2418_v52 = vsub.f32 0.0, %v2194_v24 }
 0x51e   : > { %v5211_v0 = vpop.eup %3573  ;;  %v2275_v25 = vmul.f32 1.442695, %v2226_v53  ;;  %v2453_v53 = vmul.f32 1.442695, %v2411_v28 }
 0x51f   : > { %v2353_v62 = vsel %vm2080_vm15, %v5211_v0, 0.0 }
 0x520   : > { %3575 = vpow2.f32 %v2275_v25  ;;  %2154 = vmax.xlane.f32.xlu1 %v2153_v57  ;;  %2354 = vadd.xlane.f32.xlu2 %v2353_v62  ;;  %v2412_v25 = vsub.f32 0.0, %v2188_v4 }
 0x521   : > { %v5217_v27 = vpop.xlane.xlu1 %2136 }
 0x522   : > { %v2195_v29 = vmax.f32 %v5217_v27, 0.0  ;;  %v2455_v62 = vmul.f32 1.442695, %v2412_v25 }
 0x523   : > { %v2067_v50 = vpop.f32.mrf.mxu3 }
 0x524   : > { %v2227_v6 = vsub.f32 %v5060_v59, %v2195_v29  ;;  %v2159_v59 = vsel %vm2080_vm15, %v5233_v48, -inf  ;;  %v5242_v56 = vadd.f32 %v4855_v54, %v2067_v50  ;;  %v2457_v50 = vmul.f32 1.442695, %v2413_v41 }
 0x526   : > { %v5226_v20 = vpop.eup %3575  ;;  %v2277_v32 = vmul.f32 1.442695, %v2227_v6  ;;  %v2162_v12 = vsel %vm2080_vm15, %v5242_v56, -inf }
 0x527   : > { %v2356_v22 = vsel %vm2080_vm15, %v5226_v20, 0.0 }
 0x528   : > { %3577 = vpow2.f32 %v2277_v32  ;;  %2157 = vmax.xlane.f32.xlu2 %v2156_v1  ;;  %2357 = vadd.xlane.f32.xlu0 %v2356_v22 }
 0x529   : > { %3579 = vpow2.f32 %v2451_v11 }
 0x52a   : > { %3581 = vrcp.f32 %v5185_v60 }
 0x52b   : > { %v2070_v61 = vpop.f32.mrf.mxu3  ;;  %3583 = vpow2.f32 %v2453_v53 }
 0x52c   : > { %v5247_v44 = vadd.f32 %v4855_v54, %v2070_v61 }
 0x52e   : > { %v5235_v16 = vpop.eup %3577  ;;  %v2165_v2 = vsel %vm2080_vm15, %v5247_v44, -inf }
 0x52f   : > { %v2359_v10 = vsel %vm2080_vm15, %v5235_v16, 0.0  ;;  %v3580_v26 = vpop.eup %3579 }
 0x530   : > { %2160 = vmax.xlane.f32.xlu2 %v2159_v59  ;;  %2360 = vadd.xlane.f32.xlu0 %v2359_v10  ;;  %v2506_v57 = vmul.f32 248.0, %v3580_v26  ;;  %v3582_v6 = vpop.eup %3581 }
 0x531   : > { %v3584_v43 = vpop.eup %3583  ;;  %v2601_v34 = vmul.f32 %v3582_v6, %v5048_v13 }
 0x532   : > { %v2507_v22 = vmul.f32 248.0, %v3584_v43 }
 0x533   : > { %v2072_v33 = vpop.f32.mrf.mxu3 }
 0x538   : > { %2163 = vmax.xlane.f32.xlu0 %v2162_v12  ;;  %v2414_v12 = vsub.f32 0.0, %v2190_v58 }
 0x540   : > { %2166 = vmax.xlane.f32.xlu0 %v2165_v2 }
 0x55b   : > { %v2334_v47 = vpop.xlane.xlu2 %2333 }
 0x55c   : > { %v2538_v38 = vadd.f32 %v2506_v57, %v2334_v47  ;;  %v2415_v47 = vsub.f32 0.0, %v2191_v63 }
 0x55e   : > { %3585 = vrcp.f32 %v2538_v38 }
 0x55f   : > { %3587 = vpow2.f32 %v2455_v62 }
 0x563   : > { %v2337_v32 = vpop.xlane.xlu2 %2336 }
 0x564   : > { %v3586_v1 = vpop.eup %3585  ;;  %v2703_v21 = vpop.f32.mrf.mxu0  ;;  %v2539_v10 = vadd.f32 %v2507_v22, %v2337_v32 }
 0x565   : > { %v2602_v4 = vmul.f32 %v3586_v1, %v5093_v51  ;;  %v3588_v59 = vpop.eup %3587  ;;  %v2459_v51 = vmul.f32 1.442695, %v2414_v12 }
 0x566   : > { %v2508_v61 = vmul.f32 248.0, %v3588_v59  ;;  %3589 = vrcp.f32 %v2539_v10 }
 0x567   : > { %v2629_v60 = vpack.c.bf16 %v2602_v4, %v2601_v34  ;;  %3591 = vpow2.f32 %v2457_v50  ;;  %v2461_v34 = vmul.f32 1.442695, %v2415_v47 }
 0x569   : > { %3280 = vmatmul.msk.bf16.gmra.mxu0 %vm2080_vm15, %v2629_v60  ;;  %v2463_v60 = vmul.f32 1.442695, %v2416_v40  ;;  %v2467_v40 = vmul.f32 1.442695, %v2418_v52 }
 0x56b   : > { %v5269_v2 = vpop.xlane.xlu2 %2139  ;;  %v2340_v49 = vpop.xlane.xlu0 %2339 }
 0x56c   : > { %v2196_v18 = vmax.f32 %v5269_v2, 0.0  ;;  %v2540_v13 = vadd.f32 %v2508_v61, %v2340_v49  ;;  %v2705_v23 = vpop.f32.mrf.mxu0  ;;  %v3590_v58 = vpop.eup %3589 }
 0x56d   : > { %v2783_v14 = vpack.c.bf16 %v2705_v23, %v2703_v21  ;;  %v3592_v31 = vpop.eup %3591 }
 0x56e   : > { %v2228_v11 = vsub.f32 %v5114_v15, %v2196_v18  ;;  %3593 = vrcp.f32 %v2540_v13  ;;  %v2603_v15 = vmul.f32 %v3590_v58, %v5106_v8  ;;  %v2509_v6 = vmul.f32 248.0, %v3592_v31 }
 0x56f   : > { %3292 = vmatmul.msk.bf16.vlgmr.msrb.gmra.mxu1 %vm539_vm0, %v2783_v14  ;;  %3595 = vpow2.f32 %v2459_v51  ;;  %v2417_v58 = vsub.f32 0.0, %v2193_v45 }
 0x570   : > { %v2279_v42 = vmul.f32 1.442695, %v2228_v11 }
 0x572   : > { %3597 = vpow2.f32 %v2279_v42  ;;  %v5308_v42 = vadd.f32 %v4855_v54, %v2072_v33 }
 0x573   : > { %v5276_v28 = vpop.xlane.xlu2 %2142  ;;  %v2343_v26 = vpop.xlane.xlu0 %2342 }
 0x574   : > { %v3594_v53 = vpop.eup %3593  ;;  %v2197_v25 = vmax.f32 %v5276_v28, 0.0  ;;  %v2708_v57 = vpop.f32.mrf.mxu0  ;;  %v2541_v41 = vadd.f32 %v2509_v6, %v2343_v26 }
 0x575   : > { %v2604_v38 = vmul.f32 %v3594_v53, %v5123_v17  ;;  %v3596_v43 = vpop.eup %3595 }
 0x576   : > { %v2229_v62 = vsub.f32 %v5136_v19, %v2197_v25  ;;  %v2510_v17 = vmul.f32 248.0, %v3596_v43  ;;  %v2465_v43 = vmul.f32 1.442695, %v2417_v58 }
 0x577   : > { %v2630_v32 = vpack.c.bf16 %v2604_v38, %v2603_v15 }
 0x578   : > { %v5286_v1 = vpop.eup %3597  ;;  %v2281_v21 = vmul.f32 1.442695, %v2229_v62  ;;  %v2075_v62 = vpop.f32.mrf.mxu3 }
 0x579   : > { %3281 = vmatmul.msk.bf16.gmra.mxu0 %vm2080_vm15, %v2630_v32  ;;  %v2362_v8 = vsel %vm2080_vm15, %v5286_v1, 0.0 }
 0x57a   : > { %3599 = vpow2.f32 %v2281_v21  ;;  %2363 = vadd.xlane.f32.xlu1 %v2362_v8 }
 0x57b   : > { %v5293_v19 = vpop.xlane.xlu0 %2145  ;;  %v2346_v63 = vpop.xlane.xlu1 %2345  ;;  %3601 = vrcp.f32 %v2541_v41  ;;  %v3702_v41 = vld [vmem:[%s5625_s9] ss:$0 sm:$0xff] }
 0x57c   : > { %v2198_v4 = vmax.f32 %v5293_v19, 0.0  ;;  %v2542_v22 = vadd.f32 %v2510_v17, %v2346_v63  ;;  %v2710_v59 = vpop.f32.mrf.mxu0  ;;  %3603 = vpow2.f32 %v2461_v34  ;;  %v5332_v34 = vadd.f32 %v3702_v41, %v2075_v62 }
 0x57d   : > { %v2784_v35 = vpack.c.bf16 %v2710_v59, %v2708_v57  ;;  %v2419_v59 = vsub.f32 0.0, %v2195_v29 }
 0x57e   : > { %v2230_v10 = vsub.f32 %v5153_v5, %v2198_v4  ;;  %3605 = vrcp.f32 %v2542_v22 }
 0x57f   : > { %3293 = vmatmul.msk.bf16.gmra.mxu1 %vm539_vm0, %v2784_v35  ;;  %3607 = vpow2.f32 %v2463_v60  ;;  %v2171_v35 = vsel %vm2080_vm15, %v5332_v34, -inf }
 0x580   : > { %v5300_v50 = vpop.eup %3599  ;;  %v2283_v12 = vmul.f32 1.442695, %v2230_v10  ;;  %v2077_v10 = vpop.f32.mrf.mxu3 }
 0x581   : > { %v2365_v61 = vsel %vm2080_vm15, %v5300_v50, 0.0  ;;  %v3602_v49 = vpop.eup %3601  ;;  %v5349_v29 = vadd.f32 %v3702_v41, %v2077_v10 }
 0x582   : > { %3609 = vpow2.f32 %v2283_v12  ;;  %2366 = vadd.xlane.f32.xlu1 %v2365_v61  ;;  %v3604_v13 = vpop.eup %3603  ;;  %v2605_v31 = vmul.f32 %v3602_v49, %v5141_v7  ;;  %v2168_v7 = vsel %vm2080_vm15, %v5308_v42, -inf }
 0x583   : > { %v5304_v23 = vpop.xlane.xlu0 %2148  ;;  %v2349_v51 = vpop.xlane.xlu1 %2348  ;;  %v2511_v57 = vmul.f32 248.0, %v3604_v13 }
 0x584   : > { %v3606_v14 = vpop.eup %3605  ;;  %v2199_v5 = vmax.f32 %v5304_v23, 0.0  ;;  %v2713_v11 = vpop.f32.mrf.mxu0 }
 0x585   : > { %v2606_v26 = vmul.f32 %v3606_v14, %v5160_v55  ;;  %v3608_v47 = vpop.eup %3607  ;;  %v2543_v54 = vadd.f32 %v2511_v57, %v2349_v51  ;;  %v2469_v51 = vmul.f32 1.442695, %v2419_v59 }
 0x586   : > { %v2231_v53 = vsub.f32 %v5171_v39, %v2199_v5  ;;  %v2512_v39 = vmul.f32 248.0, %v3608_v47 }
 0x587   : > { %v2631_v15 = vpack.c.bf16 %v2606_v26, %v2605_v31 }
 0x588   : > { %v5317_v38 = vpop.eup %3609  ;;  %v2285_v6 = vmul.f32 1.442695, %v2231_v53 }
 0x589   : > { %3282 = vmatmul.msk.bf16.gmra.mxu0 %vm2080_vm15, %v2631_v15  ;;  %v2368_v55 = vsel %vm2080_vm15, %v5317_v38, 0.0 }
 0x58a   : > { %3611 = vpow2.f32 %v2285_v6  ;;  %2169 = vmax.xlane.f32.xlu1 %v2168_v7  ;;  %2369 = vadd.xlane.f32.xlu2 %v2368_v55 }
 0x58b   : > { %v2352_v45 = vpop.xlane.xlu2 %2351  ;;  %v5326_v32 = vpop.xlane.xlu1 %2151  ;;  %3613 = vrcp.f32 %v2543_v54 }
 0x58c   : > { %v2544_v21 = vadd.f32 %v2512_v39, %v2352_v45  ;;  %v2200_v36 = vmax.f32 %v5326_v32, 0.0  ;;  %v2715_v24 = vpop.f32.mrf.mxu0  ;;  %3615 = vpow2.f32 %v2465_v43 }
 0x58d   : > { %v2785_v8 = vpack.c.bf16 %v2715_v24, %v2713_v11 }
 0x58e   : > { %3617 = vrcp.f32 %v2544_v21  ;;  %v2232_v17 = vsub.f32 %v5188_v9, %v2200_v36 }
 0x58f   : > { %3294 = vmatmul.msk.bf16.gmra.mxu1 %vm539_vm0, %v2785_v8  ;;  %3619 = vpow2.f32 %v2467_v40 }
 0x590   : > { %v5338_v63 = vpop.eup %3611  ;;  %v2287_v22 = vmul.f32 1.442695, %v2232_v17 }
 0x591   : > { %v2371_v60 = vsel %vm2080_vm15, %v5338_v63, 0.0  ;;  %v3614_v33 = vpop.eup %3613 }
 0x592   : > { %3621 = vpow2.f32 %v2287_v22  ;;  %2372 = vadd.xlane.f32.xlu2 %v2371_v60  ;;  %2172 = vmax.xlane.f32.xlu1 %v2171_v35  ;;  %v3616_v9 = vpop.eup %3615  ;;  %v2607_v14 = vmul.f32 %v3614_v33, %v5176_v46  ;;  %v2174_v46 = vsel %vm2080_vm15, %v5349_v29, -inf }
 0x593   : > { %v2355_v12 = vpop.xlane.xlu2 %2354  ;;  %v5346_v61 = vpop.xlane.xlu1 %2154  ;;  %v2513_v58 = vmul.f32 248.0, %v3616_v9  ;;  %3623 = vpow2.f32 %v2469_v51 }
 0x594   : > { %v3618_v49 = vpop.eup %3617  ;;  %v2201_v13 = vmax.f32 %v5346_v61, 0.0  ;;  %v2718_v27 = vpop.f32.mrf.mxu0 }
 0x595   : > { %v2608_v11 = vmul.f32 %v3618_v49, %v5195_v37  ;;  %v3620_v26 = vpop.eup %3619  ;;  %v2545_v47 = vadd.f32 %v2513_v58, %v2355_v12 }
 0x596   : > { %v2233_v31 = vsub.f32 %v5206_v30, %v2201_v13  ;;  %v2514_v37 = vmul.f32 248.0, %v3620_v26 }
 0x597   : > { %v2632_v53 = vpack.c.bf16 %v2608_v11, %v2607_v14 }
 0x598   : > { %v5356_v57 = vpop.eup %3621  ;;  %v2289_v15 = vmul.f32 1.442695, %v2233_v31 }
 0x599   : > { %3283 = vmatmul.msk.bf16.gmra.mxu0 %vm2080_vm15, %v2632_v53  ;;  %v2374_v62 = vsel %vm2080_vm15, %v5356_v57, 0.0  ;;  %v3624_v39 = vpop.eup %3623 }
 0x59a   : > { %3625 = vpow2.f32 %v2289_v15  ;;  %2375 = vadd.xlane.f32.xlu0 %v2374_v62  ;;  %2175 = vmax.xlane.f32.xlu2 %v2174_v46  ;;  %v2515_v40 = vmul.f32 248.0, %v3624_v39  ;;  %v2420_v62 = vsub.f32 0.0, %v2196_v18 }
 0x59b   : > { %v5363_v30 = vpop.xlane.xlu2 %2157  ;;  %v2358_v6 = vpop.xlane.xlu0 %2357  ;;  %3627 = vrcp.f32 %v2545_v47 }
 0x59c   : > { %v2202_v54 = vmax.f32 %v5363_v30, 0.0  ;;  %v2546_v43 = vadd.f32 %v2514_v37, %v2358_v6  ;;  %v2720_v52 = vpop.f32.mrf.mxu0  ;;  %v2471_v46 = vmul.f32 1.442695, %v2420_v62  ;;  %v2421_v37 = vsub.f32 0.0, %v2197_v25 }
 0x59d   : > { %v2786_v7 = vpack.c.bf16 %v2720_v52, %v2718_v27 }
 0x59e   : > { %v2234_v55 = vsub.f32 %v5221_v3, %v2202_v54  ;;  %3629 = vrcp.f32 %v2546_v43  ;;  %v5418_v43 = vld [vmem:[%s5620_s4 + $0x4] ss:$0 sm:$0xff]  ;;  %v2473_v52 = vmul.f32 1.442695, %v2421_v37 }
 0x59f   : > { %3295 = vmatmul.msk.bf16.gmra.mxu1 %vm539_vm0, %v2786_v7  ;;  %v2422_v7 = vsub.f32 0.0, %v2198_v4 }
 0x5a0   : > { %v5370_v45 = vpop.eup %3625  ;;  %v2291_v21 = vmul.f32 1.442695, %v2234_v55 }
 0x5a1   : > { %v2377_v24 = vsel %vm2080_vm15, %v5370_v45, 0.0  ;;  %v3628_v41 = vpop.eup %3627 }
 0x5a2   : > { %3631 = vpow2.f32 %v2291_v21  ;;  %2378 = vadd.xlane.f32.xlu0 %v2377_v24  ;;  %v2609_v60 = vmul.f32 %v3628_v41, %v5211_v0  ;;  %v2475_v21 = vmul.f32 1.442695, %v2422_v7 }
 0x5a3   : > { %v5374_v8 = vpop.xlane.xlu2 %2160  ;;  %v2361_v17 = vpop.xlane.xlu0 %2360 }
 0x5a4   : > { %v3630_v22 = vpop.eup %3629  ;;  %v2203_v3 = vmax.f32 %v5374_v8, 0.0  ;;  %v2547_v59 = vadd.f32 %v2515_v40, %v2361_v17 }
 0x5a5   : > { %v2610_v35 = vmul.f32 %v3630_v22, %v5226_v20 }
 0x5a6   : > { %v2235_v33 = vsub.f32 %v5233_v48, %v2203_v3 }
 0x5a7   : > { %v2633_v10 = vpack.c.bf16 %v2610_v35, %v2609_v60  ;;  %v2423_v35 = vsub.f32 0.0, %v2199_v5 }
 0x5a8   : > { %v5382_v9 = vpop.eup %3631  ;;  %v2293_v12 = vmul.f32 1.442695, %v2235_v33 }
 0x5a9   : > { %3284 = vmatmul.msk.bf16.gmra.mxu0 %vm2080_vm15, %v2633_v10  ;;  %v2380_v49 = vsel %vm2080_vm15, %v5382_v9, 0.0 }
 0x5aa   : > { %3633 = vpow2.f32 %v2293_v12  ;;  %2381 = vadd.xlane.f32.xlu1 %v2380_v49 }
 0x5ab   : > { %v5387_v27 = vpop.xlane.xlu0 %2163 }
 0x5ac   : > { %v2204_v0 = vmax.f32 %v5387_v27, 0.0 }
 0x5ae   : > { %v2236_v20 = vsub.f32 %v5242_v56, %v2204_v0 }
 0x5b0   : > { %v5393_v48 = vpop.eup %3633  ;;  %v2295_v51 = vmul.f32 1.442695, %v2236_v20 }
 0x5b1   : > { %v2383_v14 = vsel %vm2080_vm15, %v5393_v48, 0.0 }
 0x5b2   : > { %3635 = vpow2.f32 %v2295_v51  ;;  %2384 = vadd.xlane.f32.xlu2 %v2383_v14 }
 0x5b3   : > { %v5397_v11 = vpop.xlane.xlu0 %2166 }
 0x5b4   : > { %v2205_v58 = vmax.f32 %v5397_v11, 0.0 }
 0x5b6   : > { %v2237_v31 = vsub.f32 %v5247_v44, %v2205_v58 }
 0x5b8   : > { %v5403_v26 = vpop.eup %3635  ;;  %v2297_v53 = vmul.f32 1.442695, %v2237_v31  ;;  %v2477_v31 = vmul.f32 1.442695, %v2423_v35 }
 0x5b9   : > { %v2386_v56 = vsel %vm2080_vm15, %v5403_v26, 0.0 }
 0x5ba   : > { %3637 = vpow2.f32 %v2297_v53  ;;  %2387 = vadd.xlane.f32.xlu0 %v2386_v56  ;;  %v2424_v53 = vsub.f32 0.0, %v2200_v36 }
 0x5bb   : > { %3639 = vpow2.f32 %v2471_v46 }
 0x5bc   : > { %3641 = vrcp.f32 %v2547_v59 }
 0x5bd   : > { %3643 = vpow2.f32 %v2473_v52 }
 0x5c0   : > { %v5407_v47 = vpop.eup %3637 }
 0x5c1   : > { %v2389_v15 = vsel %vm2080_vm15, %v5407_v47, 0.0  ;;  %v3640_v6 = vpop.eup %3639 }
 0x5c2   : > { %2390 = vadd.xlane.f32.xlu1 %v2389_v15  ;;  %v2516_v39 = vmul.f32 248.0, %v3640_v6  ;;  %v3642_v4 = vpop.eup %3641 }
 0x5c3   : > { %v3644_v40 = vpop.eup %3643  ;;  %v2611_v33 = vmul.f32 %v3642_v4, %v5235_v16 }
 0x5c4   : > { %v2517_v49 = vmul.f32 248.0, %v3644_v40 }
 0x5e6   : > { %v2723_v44 = vpop.f32.mrf.mxu0 }
 0x5ec   : > { %v2861_v55 = vpop.f32.mrf.mxu1 }
 0x5ed   : > { %v2862_v2 = vadd.f32 %v5418_v43, %v2861_v55  ;;  %v2364_v18 = vpop.xlane.xlu1 %2363 }
 0x5ee   : > { %v2548_v28 = vadd.f32 %v2516_v39, %v2364_v18  ;;  %v2725_v25 = vpop.f32.mrf.mxu0 }
 0x5ef   : > { %v2941_v24 = vpack.c.bf16 %v2862_v2, %v2862_v2  ;;  %v2787_v19 = vpack.c.bf16 %v2725_v25, %v2723_v44  ;;  %v2479_v44 = vmul.f32 1.442695, %v2424_v53 }
 0x5f0   : > { %3645 = vrcp.f32 %v2548_v28 }
 0x5f1   : > { %2974 = vst.msk [vmem:[%s5427_s30] sm:$0xf] %vm2973_vm2, %v2941_v24  ;;  %3296 = vmatmul.msk.bf16.gmra.mxu1 %vm539_vm0, %v2787_v19  ;;  %3647 = vpow2.f32 %v2475_v21  ;;  %v2425_v21 = vsub.f32 0.0, %v2201_v13 }
 0x5f3   : > { %v2481_v61 = vmul.f32 1.442695, %v2425_v21  ;;  %v2428_v21 = vsub.f32 0.0, %v2204_v0 }
 0x5f4   : > { %v2863_v41 = vpop.f32.mrf.mxu1 }
 0x5f5   : > { %v2864_v17 = vadd.f32 %v5418_v43, %v2863_v41  ;;  %v2367_v22 = vpop.xlane.xlu1 %2366 }
 0x5f6   : > { %v3646_v59 = vpop.eup %3645  ;;  %v2728_v60 = vpop.f32.mrf.mxu0  ;;  %v2549_v14 = vadd.f32 %v2517_v49, %v2367_v22 }
 0x5f7   : > { %v2612_v10 = vmul.f32 %v3646_v59, %v5286_v1  ;;  %v2942_v12 = vpack.c.bf16 %v2864_v17, %v2864_v17  ;;  %v3648_v20 = vpop.eup %3647 }
 0x5f8   : > { %v2518_v5 = vmul.f32 248.0, %v3648_v20  ;;  %3649 = vrcp.f32 %v2549_v14 }
 0x5f9   : > { %2975 = vst.msk [vmem:[%s5427_s30 + $0x4] sm:$0xf] %vm2973_vm2, %v2942_v12  ;;  %v2634_v51 = vpack.c.bf16 %v2612_v10, %v2611_v33  ;;  %3651 = vpow2.f32 %v2477_v31 }
 0x5fb   : > { %3285 = vmatmul.msk.bf16.gmra.mxu0 %vm2080_vm15, %v2634_v51 }
 0x5fc   : > { %v2866_v23 = vpop.f32.mrf.mxu1 }
 0x5fd   : > { %v2867_v16 = vadd.f32 %v5418_v43, %v2866_v23  ;;  %v2370_v56 = vpop.xlane.xlu2 %2369  ;;  %v5443_v1 = vpop.xlane.xlu1 %2169 }
 0x5fe   : > { %v2550_v15 = vadd.f32 %v2518_v5, %v2370_v56  ;;  %v2206_v62 = vmax.f32 %v5443_v1, 0.0  ;;  %v2730_v46 = vpop.f32.mrf.mxu0  ;;  %v3650_v52 = vpop.eup %3649 }
 0x5ff   : > { %v2943_v37 = vpack.c.bf16 %v2867_v16, %v2867_v16  ;;  %v2788_v32 = vpack.c.bf16 %v2730_v46, %v2728_v60  ;;  %v3652_v55 = vpop.eup %3651  ;;  %v2613_v24 = vmul.f32 %v3650_v52, %v5300_v50  ;;  %v2426_v50 = vsub.f32 0.0, %v2202_v54 }
 0x600   : > { %3653 = vrcp.f32 %v2550_v15  ;;  %v2238_v36 = vsub.f32 %v5308_v42, %v2206_v62  ;;  %v2519_v41 = vmul.f32 248.0, %v3652_v55 }
 0x601   : > { %2976 = vst.msk [vmem:[%s5427_s30 + $0x8] sm:$0xf] %vm2973_vm2, %v2943_v37  ;;  %3297 = vmatmul.msk.bf16.gmra.mxu1 %vm539_vm0, %v2788_v32  ;;  %3655 = vpow2.f32 %v2479_v44  ;;  %v2483_v20 = vmul.f32 1.442695, %v2426_v50  ;;  %v2427_v37 = vsub.f32 0.0, %v2203_v3 }
 0x602   : > { %v2299_v6 = vmul.f32 1.442695, %v2238_v36 }
 0x604   : > { %3657 = vpow2.f32 %v2299_v6  ;;  %v2868_v7 = vpop.f32.mrf.mxu1 }
 0x605   : > { %v2869_v39 = vadd.f32 %v5418_v43, %v2868_v7  ;;  %v2373_v2 = vpop.xlane.xlu2 %2372  ;;  %v5453_v18 = vpop.xlane.xlu1 %2172 }
 0x606   : > { %v3654_v28 = vpop.eup %3653  ;;  %v2207_v25 = vmax.f32 %v5453_v18, 0.0  ;;  %v2733_v42 = vpop.f32.mrf.mxu0  ;;  %v2551_v60 = vadd.f32 %v2519_v41, %v2373_v2  ;;  %v2487_v41 = vmul.f32 1.442695, %v2428_v21 }
 0x607   : > { %v2614_v19 = vmul.f32 %v3654_v28, %v5317_v38  ;;  %v2944_v4 = vpack.c.bf16 %v2869_v39, %v2869_v39  ;;  %v3656_v17 = vpop.eup %3655 }
 0x608   : > { %v2239_v40 = vsub.f32 %v5332_v34, %v2207_v25  ;;  %v2520_v34 = vmul.f32 248.0, %v3656_v17 }
 0x609   : > { %2977 = vst.msk [vmem:[%s5427_s30 + $0xc] sm:$0xf] %vm2973_vm2, %v2944_v4  ;;  %v2635_v22 = vpack.c.bf16 %v2614_v19, %v2613_v24 }
 0x60a   : > { %v5465_v59 = vpop.eup %3657  ;;  %v2301_v35 = vmul.f32 1.442695, %v2239_v40 }
 0x60b   : > { %3286 = vmatmul.msk.bf16.gmra.mxu0 %vm2080_vm15, %v2635_v22  ;;  %v2392_v38 = vsel %vm2080_vm15, %v5465_v59, 0.0 }
 0x60c   : > { %3659 = vpow2.f32 %v2301_v35  ;;  %v2871_v13 = vpop.f32.mrf.mxu1  ;;  %2393 = vadd.xlane.f32.xlu2 %v2392_v38 }
 0x60d   : > { %v2872_v33 = vadd.f32 %v5418_v43, %v2871_v13  ;;  %v2376_v10 = vpop.xlane.xlu0 %2375  ;;  %v5473_v12 = vpop.xlane.xlu2 %2175  ;;  %3661 = vrcp.f32 %v2551_v60 }
 0x60e   : > { %v2552_v49 = vadd.f32 %v2520_v34, %v2376_v10  ;;  %v2208_v30 = vmax.f32 %v5473_v12, 0.0  ;;  %v2735_v54 = vpop.f32.mrf.mxu0  ;;  %3663 = vpow2.f32 %v2481_v61 }
 0x60f   : > { %v2945_v51 = vpack.c.bf16 %v2872_v33, %v2872_v33  ;;  %v2789_v14 = vpack.c.bf16 %v2735_v54, %v2733_v42  ;;  %v2485_v42 = vmul.f32 1.442695, %v2427_v37 }
 0x610   : > { %3665 = vrcp.f32 %v2552_v49  ;;  %v2240_v31 = vsub.f32 %v5349_v29, %v2208_v30 }
 0x611   : > { %2978 = vst.msk [vmem:[%s5427_s30 + $0x10] sm:$0xf] %vm2973_vm2, %v2945_v51  ;;  %3298 = vmatmul.msk.bf16.gmra.mxu1 %vm539_vm0, %v2789_v14  ;;  %3667 = vpow2.f32 %v2483_v20 }
 0x612   : > { %v5482_v53 = vpop.eup %3659  ;;  %v2303_v23 = vmul.f32 1.442695, %v2240_v31 }
 0x613   : > { %v2395_v5 = vsel %vm2080_vm15, %v5482_v53, 0.0  ;;  %v3662_v16 = vpop.eup %3661 }
 0x614   : > { %3669 = vpow2.f32 %v2303_v23  ;;  %v2873_v56 = vpop.f32.mrf.mxu1  ;;  %2396 = vadd.xlane.f32.xlu0 %v2395_v5  ;;  %v3664_v15 = vpop.eup %3663  ;;  %v2615_v32 = vmul.f32 %v3662_v16, %v5338_v63 }
 0x615   : > { %v2874_v46 = vadd.f32 %v5418_v43, %v2873_v56  ;;  %v2379_v52 = vpop.xlane.xlu0 %2378  ;;  %v2521_v7 = vmul.f32 248.0, %v3664_v15  ;;  %v2429_v15 = vsub.f32 0.0, %v2205_v58  ;;  %v2431_v58 = vsub.f32 0.0, %v2207_v25 }
 0x616   : > { %v3666_v29 = vpop.eup %3665  ;;  %v2738_v44 = vpop.f32.mrf.mxu0 }
 0x617   : > { %v2616_v36 = vmul.f32 %v3666_v29, %v5356_v57  ;;  %v2946_v6 = vpack.c.bf16 %v2874_v46, %v2874_v46  ;;  %v3668_v55 = vpop.eup %3667  ;;  %v2553_v28 = vadd.f32 %v2521_v7, %v2379_v52  ;;  %v2489_v46 = vmul.f32 1.442695, %v2429_v15 }
 0x618   : > { %v2522_v8 = vmul.f32 248.0, %v3668_v55  ;;  %v2430_v29 = vsub.f32 0.0, %v2206_v62 }
 0x619   : > { %2979 = vst.msk [vmem:[%s5427_s30 + $0x14] sm:$0xf] %vm2973_vm2, %v2946_v6  ;;  %v2636_v39 = vpack.c.bf16 %v2616_v36, %v2615_v32  ;;  %3671 = vrcp.f32 %v2553_v28  ;;  %v2432_v28 = vsub.f32 0.0, %v2208_v30 }
 0x61a   : > { %v5493_v2 = vpop.eup %3669  ;;  %3673 = vpow2.f32 %v2485_v42  ;;  %v2491_v32 = vmul.f32 1.442695, %v2430_v29 }
 0x61b   : > { %3287 = vmatmul.msk.bf16.gmra.mxu0 %vm2080_vm15, %v2636_v39  ;;  %v2398_v63 = vsel %vm2080_vm15, %v5493_v2, 0.0  ;;  %v2493_v39 = vmul.f32 1.442695, %v2431_v58 }
 0x61c   : > { %v2876_v57 = vpop.f32.mrf.mxu1  ;;  %2399 = vadd.xlane.f32.xlu1 %v2398_v63 }
 0x61d   : > { %v2877_v3 = vadd.f32 %v5418_v43, %v2876_v57  ;;  %v2382_v24 = vpop.xlane.xlu1 %2381 }
 0x61e   : > { %v2554_v19 = vadd.f32 %v2522_v8, %v2382_v24  ;;  %v2740_v4 = vpop.f32.mrf.mxu0  ;;  %v2495_v8 = vmul.f32 1.442695, %v2432_v28 }
 0x61f   : > { %v2947_v40 = vpack.c.bf16 %v2877_v3, %v2877_v3  ;;  %v2790_v27 = vpack.c.bf16 %v2740_v4, %v2738_v44  ;;  %v3672_v0 = vpop.eup %3671 }
 0x620   : > { %3675 = vrcp.f32 %v2554_v19  ;;  %v3674_v22 = vpop.eup %3673  ;;  %v2617_v50 = vmul.f32 %v3672_v0, %v5370_v45 }
 0x621   : > { %2980 = vst.msk [vmem:[%s5427_s30 + $0x18] sm:$0xf] %vm2973_vm2, %v2947_v40  ;;  %3299 = vmatmul.msk.bf16.gmra.mxu1 %vm539_vm0, %v2790_v27  ;;  %3677 = vpow2.f32 %v2487_v41  ;;  %v2523_v33 = vmul.f32 248.0, %v3674_v22 }
 0x624   : > { %v2878_v17 = vpop.f32.mrf.mxu1 }
 0x625   : > { %v2879_v60 = vadd.f32 %v5418_v43, %v2878_v17  ;;  %v2385_v34 = vpop.xlane.xlu2 %2384 }
 0x626   : > { %v3676_v35 = vpop.eup %3675  ;;  %v2743_v61 = vpop.f32.mrf.mxu0  ;;  %v2555_v54 = vadd.f32 %v2523_v33, %v2385_v34 }
 0x627   : > { %v2618_v38 = vmul.f32 %v3676_v35, %v5382_v9  ;;  %v2948_v13 = vpack.c.bf16 %v2879_v60, %v2879_v60  ;;  %v3678_v10 = vpop.eup %3677 }
 0x628   : > { %v2524_v20 = vmul.f32 248.0, %v3678_v10  ;;  %3679 = vrcp.f32 %v2555_v54 }
 0x629   : > { %2981 = vst.msk [vmem:[%s5427_s30 + $0x1c] sm:$0xf] %vm2973_vm2, %v2948_v13  ;;  %v2637_v49 = vpack.c.bf16 %v2618_v38, %v2617_v50 }
 0x62b   : > { %3288 = vmatmul.msk.bf16.gmra.mxu0 %vm2080_vm15, %v2637_v49 }
 0x62d   : > { %v2388_v51 = vpop.xlane.xlu0 %2387 }
 0x62e   : > { %v2556_v14 = vadd.f32 %v2524_v20, %v2388_v51  ;;  %v2745_v31 = vpop.f32.mrf.mxu0  ;;  %v3680_v45 = vpop.eup %3679 }
 0x62f   : > { %v2791_v23 = vpack.c.bf16 %v2745_v31, %v2743_v61  ;;  %v2619_v5 = vmul.f32 %v3680_v45, %v5393_v48 }
 0x630   : > { %3681 = vrcp.f32 %v2556_v14 }
 0x631   : > { %3300 = vmatmul.msk.bf16.gmra.mxu1 %vm539_vm0, %v2791_v23  ;;  %3683 = vpow2.f32 %v2489_v46 }
 0x632   : > { %3685 = vpow2.f32 %v2491_v32 }
 0x635   : > { %v2391_v1 = vpop.xlane.xlu1 %2390 }
 0x636   : > { %v3682_v9 = vpop.eup %3681 }
 0x637   : > { %v2620_v16 = vmul.f32 %v3682_v9, %v5403_v26  ;;  %v3684_v26 = vpop.eup %3683 }
 0x638   : > { %v2525_v52 = vmul.f32 248.0, %v3684_v26  ;;  %v3686_v7 = vpop.eup %3685 }
 0x639   : > { %v2638_v56 = vpack.c.bf16 %v2620_v16, %v2619_v5  ;;  %v2526_v21 = vmul.f32 248.0, %v3686_v7 }
 0x63a   : > { %v2557_v55 = vadd.f32 %v2525_v52, %v2391_v1 }
 0x63b   : > { %3289 = vmatmul.msk.bf16.gmra.mxu0 %vm2080_vm15, %v2638_v56 }
 0x63c   : > { %3687 = vrcp.f32 %v2557_v55 }
 0x63d   : > { %3689 = vpow2.f32 %v2493_v39 }
 0x642   : > { %v3688_v12 = vpop.eup %3687 }
 0x643   : > { %v3690_v19 = vpop.eup %3689  ;;  %v2621_v27 = vmul.f32 %v3688_v12, %v5407_v47 }
 0x644   : > { %v2527_v60 = vmul.f32 248.0, %v3690_v19 }
 0x66e   : > { %v2881_v44 = vpop.f32.mrf.mxu1 }
 0x66f   : > { %v2882_v37 = vadd.f32 %v5418_v43, %v2881_v44 }
 0x671   : > { %v2949_v36 = vpack.c.bf16 %v2882_v37, %v2882_v37 }
 0x673   : > { %2982 = vst.msk [vmem:[%s5427_s30 + $0x20] sm:$0xf] %vm2973_vm2, %v2949_v36 }
 0x676   : > { %v2883_v48 = vpop.f32.mrf.mxu1 }
 0x677   : > { %v2884_v6 = vadd.f32 %v5418_v43, %v2883_v48 }
 0x678   : > { %v2748_v11 = vpop.f32.mrf.mxu0 }
 0x679   : > { %v2950_v62 = vpack.c.bf16 %v2884_v6, %v2884_v6 }
 0x67b   : > { %2983 = vst.msk [vmem:[%s5427_s30 + $0x24] sm:$0xf] %vm2973_vm2, %v2950_v62 }
 0x67e   : > { %v2886_v42 = vpop.f32.mrf.mxu1 }
 0x67f   : > { %v2887_v63 = vadd.f32 %v5418_v43, %v2886_v42  ;;  %v2394_v57 = vpop.xlane.xlu2 %2393 }
 0x680   : > { %v2558_v18 = vadd.f32 %v2526_v21, %v2394_v57  ;;  %v2750_v25 = vpop.f32.mrf.mxu0 }
 0x681   : > { %v2951_v3 = vpack.c.bf16 %v2887_v63, %v2887_v63  ;;  %v2792_v24 = vpack.c.bf16 %v2750_v25, %v2748_v11 }
 0x682   : > { %3691 = vrcp.f32 %v2558_v18 }
 0x683   : > { %2984 = vst.msk [vmem:[%s5427_s30 + $0x28] sm:$0xf] %vm2973_vm2, %v2951_v3  ;;  %3301 = vmatmul.msk.bf16.gmra.mxu1 %vm539_vm0, %v2792_v24  ;;  %3693 = vpow2.f32 %v2495_v8 }
 0x686   : > { %v2888_v30 = vpop.f32.mrf.mxu1 }
 0x687   : > { %v2889_v4 = vadd.f32 %v5418_v43, %v2888_v30  ;;  %v2397_v22 = vpop.xlane.xlu0 %2396 }
 0x688   : > { %v3692_v41 = vpop.eup %3691  ;;  %v2753_v40 = vpop.f32.mrf.mxu0  ;;  %v2559_v50 = vadd.f32 %v2527_v60, %v2397_v22 }
 0x689   : > { %v2622_v0 = vmul.f32 %v3692_v41, %v5465_v59  ;;  %v2952_v17 = vpack.c.bf16 %v2889_v4, %v2889_v4  ;;  %v3694_v35 = vpop.eup %3693 }
 0x68a   : > { %v2528_v13 = vmul.f32 248.0, %v3694_v35  ;;  %3695 = vrcp.f32 %v2559_v50 }
 0x68b   : > { %2985 = vst.msk [vmem:[%s5427_s30 + $0x2c] sm:$0xf] %vm2973_vm2, %v2952_v17  ;;  %v2639_v61 = vpack.c.bf16 %v2622_v0, %v2621_v27 }
 0x68d   : > { %3290 = vmatmul.msk.bf16.gmra.mxu0 %vm2080_vm15, %v2639_v61 }
 0x68e   : > { %v2891_v38 = vpop.f32.mrf.mxu1 }
 0x68f   : > { %v2892_v34 = vadd.f32 %v5418_v43, %v2891_v38  ;;  %v2400_v33 = vpop.xlane.xlu1 %2399 }
 0x690   : > { %v2560_v47 = vadd.f32 %v2528_v13, %v2400_v33  ;;  %v2755_v59 = vpop.f32.mrf.mxu0  ;;  %v3696_v54 = vpop.eup %3695 }
 0x691   : > { %v2953_v10 = vpack.c.bf16 %v2892_v34, %v2892_v34  ;;  %v2793_v49 = vpack.c.bf16 %v2755_v59, %v2753_v40  ;;  %v2623_v23 = vmul.f32 %v3696_v54, %v5482_v53 }
 0x692   : > { %3697 = vrcp.f32 %v2560_v47 }
 0x693   : > { %2986 = vst.msk [vmem:[%s5427_s30 + $0x30] sm:$0xf] %vm2973_vm2, %v2953_v10  ;;  %3302 = vmatmul.msk.bf16.gmra.mxu1 %vm539_vm0, %v2793_v49 }
 0x696   : > { %v2893_v20 = vpop.f32.mrf.mxu1 }
 0x697   : > { %v2894_v51 = vadd.f32 %v5418_v43, %v2893_v20 }
 0x698   : > { %v3698_v14 = vpop.eup %3697  ;;  %v2758_v31 = vpop.f32.mrf.mxu0 }
 0x699   : > { %v2624_v45 = vmul.f32 %v3698_v14, %v5493_v2  ;;  %v2954_v9 = vpack.c.bf16 %v2894_v51, %v2894_v51 }
 0x69b   : > { %2987 = vst.msk [vmem:[%s5427_s30 + $0x34] sm:$0xf] %vm2973_vm2, %v2954_v9  ;;  %v2640_v5 = vpack.c.bf16 %v2624_v45, %v2623_v23 }
 0x69d   : > { %3291 = vmatmul.msk.bf16.gmra.mxu0 %vm2080_vm15, %v2640_v5 }
 0x69e   : > { %v2896_v16 = vpop.f32.mrf.mxu1 }
 0x69f   : > { %v2897_v56 = vadd.f32 %v5418_v43, %v2896_v16 }
 0x6a0   : > { %v2760_v15 = vpop.f32.mrf.mxu0 }
 0x6a1   : > { %v2955_v46 = vpack.c.bf16 %v2897_v56, %v2897_v56  ;;  %v2794_v29 = vpack.c.bf16 %v2760_v15, %v2758_v31 }
 0x6a3   : > { %2988 = vst.msk [vmem:[%s5427_s30 + $0x38] sm:$0xf] %vm2973_vm2, %v2955_v46  ;;  %3303 = vmatmul.msk.bf16.gmra.mxu1 %vm539_vm0, %v2794_v29 }
 0x6a6   : > { %v2898_v53 = vpop.f32.mrf.mxu1 }
 0x6a7   : > { %v2899_v2 = vadd.f32 %v5418_v43, %v2898_v53 }
 0x6a8   : > { %v2763_v44 = vpop.f32.mrf.mxu0 }
 0x6a9   : > { %v2956_v37 = vpack.c.bf16 %v2899_v2, %v2899_v2 }
 0x6ab   : > { %2989 = vst.msk [vmem:[%s5427_s30 + $0x3c] sm:$0xf] %vm2973_vm2, %v2956_v37 }
 0x6ae   : > { %v2901_v32 = vpop.f32.mrf.mxu1 }
 0x6af   : > { %v2902_v36 = vadd.f32 %v5418_v43, %v2901_v32 }
 0x6b0   : > { %v2765_v48 = vpop.f32.mrf.mxu0 }
 0x6b1   : > { %v2957_v26 = vpack.c.bf16 %v2902_v36, %v2902_v36  ;;  %v2795_v6 = vpack.c.bf16 %v2765_v48, %v2763_v44 }
 0x6b3   : > { %2990 = vst.msk [vmem:[%s5427_s30 + $0x40] sm:$0xf] %vm2973_vm2, %v2957_v26  ;;  %3304 = vmatmul.msk.bf16.gmra.mxu1 %vm539_vm0, %v2795_v6 }
 0x6b6   : > { %v2903_v11 = vpop.f32.mrf.mxu1 }
 0x6b7   : > { %v2904_v58 = vadd.f32 %v5418_v43, %v2903_v11 }
 0x6b8   : > { %v2768_v1 = vpop.f32.mrf.mxu0 }
 0x6b9   : > { %v2958_v62 = vpack.c.bf16 %v2904_v58, %v2904_v58 }
 0x6bb   : > { %2991 = vst.msk [vmem:[%s5427_s30 + $0x44] sm:$0xf] %vm2973_vm2, %v2958_v62 }
 0x6c0   : > { %v2770_v52 = vpop.f32.mrf.mxu0 }
 0x6c1   : > { %v2796_v7 = vpack.c.bf16 %v2770_v52, %v2768_v1 }
 0x6c3   : > { %3305 = vmatmul.msk.bf16.gmra.mxu1 %vm539_vm0, %v2796_v7 }
 0x700   : > { %v2906_v55 = vpop.f32.mrf.mxu1 }
 0x701   : > { %v2907_v39 = vadd.f32 %v5418_v43, %v2906_v55 }
 0x703   : > { %v2959_v28 = vpack.c.bf16 %v2907_v39, %v2907_v39 }
 0x705   : > { %2992 = vst.msk [vmem:[%s5427_s30 + $0x48] sm:$0xf] %vm2973_vm2, %v2959_v28 }
 0x708   : > { %v2908_v42 = vpop.f32.mrf.mxu1 }
 0x709   : > { %v2909_v21 = vadd.f32 %v5418_v43, %v2908_v42 }
 0x70a   : > { %v2773_v63 = vpop.f32.mrf.mxu0 }
 0x70b   : > { %v2960_v57 = vpack.c.bf16 %v2909_v21, %v2909_v21 }
 0x70d   : > { %2993 = vst.msk [vmem:[%s5427_s30 + $0x4c] sm:$0xf] %vm2973_vm2, %v2960_v57 }
 0x710   : > { %v2911_v18 = vpop.f32.mrf.mxu1 }
 0x711   : > { %v2912_v25 = vadd.f32 %v5418_v43, %v2911_v18 }
 0x712   : > { %v2775_v8 = vpop.f32.mrf.mxu0 }
 0x713   : > { %v2961_v3 = vpack.c.bf16 %v2912_v25, %v2912_v25  ;;  %v2797_v24 = vpack.c.bf16 %v2775_v8, %v2773_v63 }
 0x715   : > { %2994 = vst.msk [vmem:[%s5427_s30 + $0x50] sm:$0xf] %vm2973_vm2, %v2961_v3  ;;  %3306 = vmatmul.msk.bf16.gmra.mxu1 %vm539_vm0, %v2797_v24 }
 0x718   : > { %v2913_v12 = vpop.f32.mrf.mxu1 }
 0x719   : > { %v2914_v30 = vadd.f32 %v5418_v43, %v2913_v12 }
 0x71a   : > { %v2778_v19 = vpop.f32.mrf.mxu0 }
 0x71b   : > { %v2962_v4 = vpack.c.bf16 %v2914_v30, %v2914_v30 }
 0x71d   : > { %2995 = vst.msk [vmem:[%s5427_s30 + $0x54] sm:$0xf] %vm2973_vm2, %v2962_v4 }
 0x720   : > { %v2916_v41 = vpop.f32.mrf.mxu1 }
 0x721   : > { %v2917_v40 = vadd.f32 %v5418_v43, %v2916_v41 }
 0x722   : > { %v2780_v27 = vpop.f32.mrf.mxu0 }
 0x723   : > { %v2963_v0 = vpack.c.bf16 %v2917_v40, %v2917_v40  ;;  %v2798_v17 = vpack.c.bf16 %v2780_v27, %v2778_v19 }
 0x725   : > { %2996 = vst.msk [vmem:[%s5427_s30 + $0x58] sm:$0xf] %vm2973_vm2, %v2963_v0  ;;  %3307 = vmatmul.msk.bf16.gmra.mxu1 %vm539_vm0, %v2798_v17 }
 0x728   : > { %v2918_v22 = vpop.f32.mrf.mxu1 }
 0x729   : > { %v2919_v60 = vadd.f32 %v5418_v43, %v2918_v22 }
 0x72b   : > { %v2964_v35 = vpack.c.bf16 %v2919_v60, %v2919_v60 }
 0x72d   : > { %2997 = vst.msk [vmem:[%s5427_s30 + $0x5c] sm:$0xf] %vm2973_vm2, %v2964_v35 }
 0x730   : > { %v2921_v61 = vpop.f32.mrf.mxu1 }
 0x731   : > { %v2922_v50 = vadd.f32 %v5418_v43, %v2921_v61 }
 0x733   : > { %v2965_v38 = vpack.c.bf16 %v2922_v50, %v2922_v50 }
 0x735   : > { %2998 = vst.msk [vmem:[%s5427_s30 + $0x60] sm:$0xf] %vm2973_vm2, %v2965_v38 }
 0x738   : > { %v2923_v13 = vpop.f32.mrf.mxu1 }
 0x739   : > { %v2924_v34 = vadd.f32 %v5418_v43, %v2923_v13 }
 0x73b   : > { %v2966_v33 = vpack.c.bf16 %v2924_v34, %v2924_v34 }
 0x73d   : > { %2999 = vst.msk [vmem:[%s5427_s30 + $0x64] sm:$0xf] %vm2973_vm2, %v2966_v33 }
 0x740   : > { %v2926_v47 = vpop.f32.mrf.mxu1 }
 0x741   : > { %v2927_v59 = vadd.f32 %v5418_v43, %v2926_v47 }
 0x743   : > { %v2967_v10 = vpack.c.bf16 %v2927_v59, %v2927_v59 }
 0x745   : > { %3000 = vst.msk [vmem:[%s5427_s30 + $0x68] sm:$0xf] %vm2973_vm2, %v2967_v10 }
 0x748   : > { %v2928_v49 = vpop.f32.mrf.mxu1 }
 0x749   : > { %v2929_v54 = vadd.f32 %v5418_v43, %v2928_v49 }
 0x74b   : > { %v2968_v20 = vpack.c.bf16 %v2929_v54, %v2929_v54 }
 0x74d   : > { %3001 = vst.msk [vmem:[%s5427_s30 + $0x6c] sm:$0xf] %vm2973_vm2, %v2968_v20 }
 0x792   : > { %v2931_v51 = vpop.f32.mrf.mxu1 }
 0x793   : > { %v2932_v14 = vadd.f32 %v5418_v43, %v2931_v51 }
 0x795   : > { %v2969_v31 = vpack.c.bf16 %v2932_v14, %v2932_v14 }
 0x797   : > { %3002 = vst.msk [vmem:[%s5427_s30 + $0x70] sm:$0xf] %vm2973_vm2, %v2969_v31 }
 0x79a   : > { %v2933_v23 = vpop.f32.mrf.mxu1 }
 0x79b   : > { %v2934_v45 = vadd.f32 %v5418_v43, %v2933_v23 }
 0x79d   : > { %v2970_v9 = vpack.c.bf16 %v2934_v45, %v2934_v45 }
 0x79f   : > { %3003 = vst.msk [vmem:[%s5427_s30 + $0x74] sm:$0xf] %vm2973_vm2, %v2970_v9 }
 0x7a2   : > { %v2936_v5 = vpop.f32.mrf.mxu1 }
 0x7a3   : > { %v2937_v16 = vadd.f32 %v5418_v43, %v2936_v5 }
 0x7a5   : > { %v2971_v56 = vpack.c.bf16 %v2937_v16, %v2937_v16 }
 0x7a7   : > { %3004 = vst.msk [vmem:[%s5427_s30 + $0x78] sm:$0xf] %vm2973_vm2, %v2971_v56 }
 0x7aa   : > { %v2938_v15 = vpop.f32.mrf.mxu1 }
 0x7ab   : > { %v2939_v46 = vadd.f32 %v5418_v43, %v2938_v15 }
 0x7ad   : > { %v2972_v29 = vpack.c.bf16 %v2939_v46, %v2939_v46 }
 0x7af   : > { %3005 = vst.msk [vmem:[%s5427_s30 + $0x7c] sm:$0xf] %vm2973_vm2, %v2972_v29 }
 0x7b0 PF: > { %s20_s15 = sadd.s32 1, %s3725_s15   ;;  %s5655_s13 = smov %s3721_s14 }
 0x7b1   : > { %p17_p5 = scmp.ge.s32.totalorder %s20_s15, 4   ;;  %s5656_s14 = smov %s5658_s16 }
 0x7b3   :  { %19 = sbr.rel (!%p17_p5) target bundleno = 2 (0x2), region = 99 }

</bundles_post_ra>
